<compile_context>
chip_gen: v7x
topology: tpu7x:2x2x1
jax: 0.10.0
libtpu: 0.0.40
codegen_flags: <defaults>
</compile_context>

<pallas_src>
import numpy as np
import jax
import jax.numpy as jnp
from jax.experimental import pallas as pl
from jax.experimental.pallas import tpu as pltpu

# ---------------------------------------------------------------- constants
H = W = 30                 # Filter asserts 30x30; output_shape is (30, 30)
HW = H * W                 # 900
HP = 32                    # sublane-padded rows per sample (multiple of 8)
B = 2                      # batch_size > 1 code path
D_IN = 32                  # RE_Decoder `input_shape`
D_HID = 2 * D_IN
NC0 = 10                   # conv_0 output channels

# Filter.C_layer conv configs (kh, kw, ph, pw) -- all "same" convs, 2 out ch each.
C_CFG = [(1, 3, 0, 1), (3, 1, 1, 0), (3, 3, 1, 1), (3, 5, 1, 2), (5, 3, 2, 1), (5, 5, 2, 2)]
NCH = 2 * len(C_CFG)       # 12
MAXP = 2                   # max row offset among C_CFG

SMEM = pl.BlockSpec(memory_space=pltpu.MemorySpace.SMEM)


def _crelu(x):
    # CappedReLU: x if 0 < x <= 1 else 0   (matches the PyTorch definition)
    return jnp.where((x > 0) & (x <= 1), x, jnp.zeros_like(x))


def _mm(a, b):
    return jnp.dot(a, b, preferred_element_type=jnp.float32)


# ------------------------------------------------------------ fused kernel
def re_decoder_kernel(
    pos_ref, scal_ref,                       # SMEM: (4,) i32 position, (2,) f32 [cnn0_b, conv1_b]
    x1_ref, x2_ref, rowid_ref,               # (B, D_IN), (1, HP, W), (HP, 1) i32
    cnn0_band_ref,                           # (3W, W)              f32
    c_band_ref, c_bias_ref,                  # (5W, NCH*W), (1, NCH*W)
    cwg_w_ref, csum_ref, cwg_b_ref,          # (HP, NCH*W), (NCH*W, W) bf16, (1, HW)
    rexp_ref, hmask_ref, rsum_ref,           # (W, HW) bf16, (HP, HW) bf16, (HW, W) bf16
    wa_ref, ba_ref, w0_ref, b0_ref, w1_ref, b1_ref,   # MLP weights (f32)
    c0_band_ref, c0_bias_ref,                # (3W, NC0*W), (1, NC0*W)
    c1_band_ref,                             # (3, NC0*W, W)
    gw_ref, gb_ref,                          # (HP, W) GeGate params
    o_ref,                                   # out block: (1, HP, W)
):
    f32 = jnp.float32
    rowid = rowid_ref[...]                                        # (HP, 1) i32

    def shifted(x, di):
        # out[i] = x[i + di] if 0 <= i + di < H else 0.
        # XLU sublane roll (HP is 8-aligned) + VPU mask; no MXU work, and the
        # mask also quarantines the 2 padded rows / array wrap-around.
        r = pltpu.roll(x, shift=(-di) % HP, axis=0)
        return jnp.where((rowid + di >= 0) & (rowid + di < H), r, 0.0)

    hmask = hmask_ref[...].astype(f32)                            # (HP, HW) 0/1

    def flatten(z):                                               # (HP, W) -> (1, HW)
        t = _mm(z, rexp_ref[...].astype(f32)) * hmask
        return jnp.sum(t, axis=0, keepdims=True)                  # XLU row reduce

    def unflatten(m):                                             # (1, HW) -> (HP, W)
        mb = jnp.broadcast_to(m, (HP, HW)) * hmask                # sublane broadcast
        return _mm(mb, rsum_ref[...].astype(f32))

    # ---- Filter.cnn_0 : Conv2d(1->1, 3x3, pad 1) + ReLU (row taps fused in K) ----
    x2 = x2_ref[0]                                                # (HP, W)
    xcat = jnp.concatenate([shifted(x2, -1), x2, shifted(x2, 1)], axis=1)
    y0 = jnp.maximum(_mm(xcat, cnn0_band_ref[...]) + scal_ref[0], 0.0)        # (HP, W)

    # ---- Filter.C_layer : 6 "same" convs (1->2 ch each), 5 row taps fused ----
    ycat = jnp.concatenate(
        [shifted(y0, -2), shifted(y0, -1), y0, shifted(y0, 1), shifted(y0, 2)], axis=1)
    cmaps = jnp.maximum(_mm(ycat, c_band_ref[...]) + c_bias_ref[...], 0.0)    # (HP, NCH*W)

    # ---- CWG (csl): per-position channel-weighted reduction + bias + ReLU ----
    # TODO(synk): the PyTorch source flattens (B,12,900)->(B,10800) before CWG,
    # which is shape-incompatible with CWG's (12, 900) weights; we implement the
    # intended per-sample (12,900)->(900,) channel-weighted reduction.
    u = _mm(cmaps * cwg_w_ref[...], csum_ref[...].astype(f32))                # (HP, W)
    cwg = jnp.maximum(flatten(u) + cwg_b_ref[...], 0.0)                       # (1, HW)

    # ---- fcl_a -> relu -> (+x1, relu) -> fcl_0 -> relu -> fcl_1 -> relu ----
    x1row = x1_ref[pl.ds(pl.program_id(0), 1), :]                             # (1, D_IN)
    ha = jnp.maximum(_mm(cwg, wa_ref[...]) + ba_ref[...], 0.0)
    h = jnp.maximum(x1row + ha, 0.0)
    h0 = jnp.maximum(_mm(h, w0_ref[...]) + b0_ref[...], 0.0)
    m = jnp.maximum(_mm(h0, w1_ref[...]) + b1_ref[...], 0.0)                  # (1, HW)

    # ---- conv_0 : Conv2d(1->10, 3x3, pad 1) + CappedReLU (row taps fused) ----
    m2d = unflatten(m)                                                        # (HP, W)
    mcat = jnp.concatenate([shifted(m2d, -1), m2d, shifted(m2d, 1)], axis=1)
    c0 = _crelu(_mm(mcat, c0_band_ref[...]) + c0_bias_ref[...])               # (HP, NC0*W)

    # ---- conv_1 : Conv2d(10->1, 3x3, pad 1) (per-tap; K=300 each, fusion marginal) ----
    c1 = _mm(c0, c1_band_ref[1])
    c1 += _mm(shifted(c0, -1), c1_band_ref[0])
    c1 += _mm(shifted(c0, 1), c1_band_ref[2])
    c1 = c1 + scal_ref[1]                                                     # (HP, W)

    # ---- FormMask (runtime position) + CappedReLU + GeGate + CappedReLU ----
    # FormMask keeps rows [y0, y1) of the single channel iff x0 <= 0 < x1.
    px0, py0, px1, py1 = pos_ref[0], pos_ref[1], pos_ref[2], pos_ref[3]
    keep = (rowid >= py0) & (rowid < py1) & (rowid < H) & (px0 <= 0) & (px1 > 0)
    g = _crelu(jnp.where(keep, c1, 0.0))
    o_ref[0] = _crelu(g * gw_ref[...] + gb_ref[...])


# ---------------------------------------------- host-side constant packing
def _eye_band(wrow, pw):
    # (kw,) kernel row -> (W, W) band: blk[w_out + (k - pw), w_out] = wrow[k]
    blk = np.zeros((W, W), np.float32)
    for k in range(len(wrow)):
        blk += float(wrow[k]) * np.eye(W, k=-(k - pw), dtype=np.float32)
    return blk


def _band_cat(w, pw):
    # w: (Cout, kh, kw) -> (kh*W, Cout*W): all kernel rows stacked along K so a
    # single matmul against concat([shifted taps], axis=-1) does the whole conv.
    cout, kh, _ = w.shape
    out = np.zeros((kh * W, cout * W), np.float32)
    for j in range(kh):
        for o in range(cout):
            out[j * W:(j + 1) * W, o * W:(o + 1) * W] = _eye_band(w[o, j], pw)
    return out


def _band_in(w, pw):
    # w: (Cin, kh, kw) -> (kh, Cin*W, W): per-kernel-row, multi-input-channel band.
    cin, kh, _ = w.shape
    out = np.zeros((kh, cin * W, W), np.float32)
    for j in range(kh):
        for c in range(cin):
            out[j, c * W:(c + 1) * W, :] = _eye_band(w[c, j], pw)
    return out


def _layout_mats():
    rexp = np.zeros((W, HW), np.float32)
    rsum = np.zeros((HW, W), np.float32)
    hmask = np.zeros((HP, HW), np.float32)
    for h in range(H):
        rexp[np.arange(W), h * W + np.arange(W)] = 1.0
        rsum[h * W + np.arange(W), np.arange(W)] = 1.0
        hmask[h, h * W:(h + 1) * W] = 1.0
    return rexp, rsum, hmask


def pack_params(p):
    f32 = np.float32
    bf16 = jnp.bfloat16
    g = lambda a: np.asarray(jax.device_get(a), f32)

    # Filter.C_layer: banded weights for all row taps (-2..2) stacked along K.
    c_band = np.zeros(((2 * MAXP + 1) * W, NCH * W), f32)
    c_bias = np.zeros((NCH,), f32)
    for n, (kh, kw, ph, pw) in enumerate(C_CFG):
        wn = g(p["c_w"][n])                 # (2, kh, kw)
        bn = g(p["c_b"][n])                 # (2,)
        for o in range(2):
            ch = 2 * n + o
            c_bias[ch] = bn[o]
            for j in range(kh):
                blk = (j - ph) + MAXP
                c_band[blk * W:(blk + 1) * W, ch * W:(ch + 1) * W] = _eye_band(wn[o, j], pw)

    # CWG weights: (12, 900) -> (HP, 12*W) matching the channel-block lane layout.
    cwg2d = g(p["cwg_w"]).reshape(NCH, H, W).transpose(1, 0, 2).reshape(H, NCH * W)
    cwg_w2d = np.zeros((HP, NCH * W), f32)
    cwg_w2d[:H] = cwg2d

    rexp, rsum, hmask = _layout_mats()
    gw2d = np.zeros((HP, W), f32); gw2d[:H] = g(p["gw"]).reshape(H, W)
    gb2d = np.zeros((HP, W), f32); gb2d[:H] = g(p["gb"]).reshape(H, W)

    packed = dict(
        scal=jnp.asarray(np.array([g(p["cnn0_b"])[0], g(p["conv1_b"])[0]], f32)),
        rowid=jnp.asarray(np.arange(HP, dtype=np.int32).reshape(HP, 1)),
        cnn0_band=jnp.asarray(_band_cat(g(p["cnn0_w"]), 1)),          # (90, 30)
        c_band=jnp.asarray(c_band),                                   # (150, 360)
        c_bias=jnp.asarray(np.repeat(c_bias, W).reshape(1, NCH * W)),
        cwg_w=jnp.asarray(cwg_w2d),
        csum=jnp.asarray(np.tile(np.eye(W, dtype=f32), (NCH, 1)), dtype=bf16),
        cwg_b=jnp.asarray(g(p["cwg_b"]).reshape(1, HW)),
        rexp=jnp.asarray(rexp, dtype=bf16),
        hmask=jnp.asarray(hmask, dtype=bf16),
        rsum=jnp.asarray(rsum, dtype=bf16),
        wa_t=jnp.asarray(g(p["wa_t"])), ba=jnp.asarray(g(p["ba"]).reshape(1, D_IN)),
        w0_t=jnp.asarray(g(p["w0_t"])), b0=jnp.asarray(g(p["b0"]).reshape(1, D_HID)),
        w1_t=jnp.asarray(g(p["w1_t"])), b1=jnp.asarray(g(p["b1"]).reshape(1, HW)),
        c0_band=jnp.asarray(_band_cat(g(p["conv0_w"]), 1)),           # (90, 300)
        c0_bias=jnp.asarray(np.repeat(g(p["conv0_b"]), W).reshape(1, NC0 * W)),
        c1_band=jnp.asarray(_band_in(g(p["conv1_w"]), 1)),            # (3, 300, 30)
        gw2d=jnp.asarray(gw2d), gb2d=jnp.asarray(gb2d),
    )
    return packed


def _const_spec(a):
    zeros = (0,) * a.ndim
    return pl.BlockSpec(tuple(a.shape), lambda i: zeros)


# ------------------------------------------------------------ forward glue
def re_decoder_forward(packed, x1, x2, position):
    # x1: (B, D_IN); x2: (B, 1, 30, 30) NCHW; position: (4,) int32 (runtime).
    xb = x1.shape[0]
    x2p = jnp.pad(x2.reshape(xb, H, W), ((0, 0), (0, HP - H), (0, 0)))
    pos = jnp.asarray(position, jnp.int32).reshape(4)

    cargs = (
        packed["rowid"],
        packed["cnn0_band"],
        packed["c_band"], packed["c_bias"],
        packed["cwg_w"], packed["csum"], packed["cwg_b"],
        packed["rexp"], packed["hmask"], packed["rsum"],
        packed["wa_t"], packed["ba"], packed["w0_t"], packed["b0"],
        packed["w1_t"], packed["b1"],
        packed["c0_band"], packed["c0_bias"], packed["c1_band"],
        packed["gw2d"], packed["gb2d"],
    )
    in_specs = (
        [SMEM, SMEM,
         _const_spec(x1),                                  # row picked via program_id
         pl.BlockSpec((1, HP, W), lambda i: (i, 0, 0))]
        + [_const_spec(c) for c in cargs]                  # resident across grid steps
    )

    out = pl.pallas_call(
        re_decoder_kernel,
        grid=(xb,),
        out_shape=jax.ShapeDtypeStruct((xb, HP, W), jnp.float32),
        in_specs=in_specs,
        out_specs=pl.BlockSpec((1, HP, W), lambda i: (i, 0, 0)),
        compiler_params=pltpu.CompilerParams(
            dimension_semantics=("parallel",)),
        cost_estimate=pl.CostEstimate(
            flops=23_000_000, transcendentals=0, bytes_accessed=1_200_000),
    )(pos, packed["scal"], x1, x2p, *cargs)

    # (B, HP, W) -> drop the 2 pad rows and take the lane-dense row-major view.
    return out[:, :H, :].reshape(xb, HW)


# ------------------------------------------------------ deterministic init
def init_params(key):
    ks = jax.random.split(key, 16)

    def nrm(k, shape, scale):
        return scale * jax.random.normal(k, shape, dtype=jnp.float32)

    p = {}
    p["cnn0_w"] = nrm(ks[0], (1, 3, 3), 0.3)
    p["cnn0_b"] = nrm(ks[1], (1,), 0.05)
    kk = jax.random.split(ks[2], 12)
    p["c_w"] = [nrm(kk[2 * n], (2, kh, kw), (2.0 / (kh * kw)) ** 0.5)
                for n, (kh, kw, _, _) in enumerate(C_CFG)]
    p["c_b"] = [nrm(kk[2 * n + 1], (2,), 0.05) for n in range(len(C_CFG))]
    bound = (6.0 / (NCH + HW)) ** 0.5
    p["cwg_w"] = jax.random.uniform(ks[3], (NCH, HW), jnp.float32, -bound, bound)
    p["cwg_b"] = jnp.zeros((HW,), jnp.float32)
    p["wa_t"] = nrm(ks[4], (HW, D_IN), 1.0 / (HW ** 0.5))
    p["ba"] = nrm(ks[5], (D_IN,), 0.05)
    p["w0_t"] = nrm(ks[6], (D_IN, D_HID), 1.0 / (D_IN ** 0.5))
    p["b0"] = nrm(ks[7], (D_HID,), 0.05)
    p["w1_t"] = nrm(ks[8], (D_HID, HW), 1.0 / (D_HID ** 0.5))
    p["b1"] = nrm(ks[9], (HW,), 0.05)
    p["conv0_w"] = nrm(ks[10], (NC0, 3, 3), 0.3)
    p["conv0_b"] = nrm(ks[11], (NC0,), 0.05)
    p["conv1_w"] = nrm(ks[12], (NC0, 3, 3), (2.0 / 90.0) ** 0.5)   # (Cin, kh, kw)
    p["conv1_b"] = nrm(ks[13], (1,), 0.05)
    # GeGate: weights ones, bias zeros per its weight_init (its unused .fcl is omitted)
    p["gw"] = jnp.ones((HW,), jnp.float32)
    p["gb"] = jnp.zeros((HW,), jnp.float32)
    return p


# ------------------------------------------- pure-JAX reference (sanity only)
def _conv2d(x, w, b, pad):
    out = jax.lax.conv_general_dilated(
        x, w, window_strides=(1, 1),
        padding=[(pad[0], pad[0]), (pad[1], pad[1])],
        dimension_numbers=("NCHW", "OIHW", "NCHW"))
    return out + b.reshape(1, -1, 1, 1)


def re_decoder_reference(p, x1, x2, position):
    relu = lambda v: jnp.maximum(v, 0.0)
    y = relu(_conv2d(x2, p["cnn0_w"].reshape(1, 1, 3, 3), p["cnn0_b"], (1, 1)))
    maps = []
    for n, (kh, kw, ph, pw) in enumerate(C_CFG):
        wn = p["c_w"][n].reshape(2, 1, kh, kw)
        maps.append(relu(_conv2d(y, wn, p["c_b"][n], (ph, pw))))
    cm = jnp.concatenate(maps, axis=1).reshape(B, NCH, HW)
    cwg = relu(jnp.einsum("bcs,cs->bs", cm, p["cwg_w"]) + p["cwg_b"])
    ha = relu(cwg @ p["wa_t"] + p["ba"])
    h = relu(x1 + ha)
    h0 = relu(h @ p["w0_t"] + p["b0"])
    m = relu(h0 @ p["w1_t"] + p["b1"])
    c0 = _crelu(_conv2d(m.reshape(B, 1, H, W), p["conv0_w"].reshape(NC0, 1, 3, 3),
                        p["conv0_b"], (1, 1)))
    c1 = _conv2d(c0, p["conv1_w"].reshape(1, NC0, 3, 3), p["conv1_b"], (1, 1))
    px0, py0, px1, py1 = [int(v) for v in np.asarray(position)]
    rows = jnp.arange(H).reshape(1, 1, H, 1)
    c1 = jnp.where((rows >= py0) & (rows < py1), c1, 0.0)
    if not (px0 <= 0 < px1):
        c1 = jnp.zeros_like(c1)
    g = _crelu(c1).reshape(B, HW)
    return _crelu(g * p["gw"] + p["gb"])


# --------------------------------------------------------------------- main
if __name__ == "__main__":
    key = jax.random.PRNGKey(0)
    kp, k1, k2 = jax.random.split(key, 3)
    params = init_params(kp)
    packed = pack_params(params)

    x1 = jax.random.normal(k1, (B, D_IN), dtype=jnp.float32)
    x2 = jax.random.normal(k2, (B, 1, H, W), dtype=jnp.float32)
    position = jnp.array([0, 5, 1, 25], jnp.int32)   # (x0, y0, x1, y1): keep ch 0, rows 5..24

    fwd = jax.jit(re_decoder_forward)
    out = fwd(packed, x1, x2, position)
    jax.block_until_ready(out)
    assert out.shape == (B, HW) and out.dtype == jnp.float32

    # Soft numerical sanity check against a plain-JAX reference (warning only).
    ref = re_decoder_reference(params, x1, x2, position)
    diff = float(jnp.max(jnp.abs(out - ref)))
    if diff > 5e-2:
        print(f"WARNING: kernel vs reference max abs diff = {diff:.3e}")

    print("KERNEL_OK")
</pallas_src>

<mosaic_0001>
module attributes {stable_mosaic.version = 11 : i64} {
  func.func @re_decoder_kernel(%arg0: i32, %arg1: memref<4xi32, #tpu.memory_space<smem>>, %arg2: memref<2xf32, #tpu.memory_space<smem>>, %arg3: memref<2x32xf32, #tpu.memory_space<vmem>>, %arg4: memref<1x32x30xf32, #tpu.memory_space<vmem>>, %arg5: memref<32x1xi32, #tpu.memory_space<vmem>>, %arg6: memref<90x30xf32, #tpu.memory_space<vmem>>, %arg7: memref<150x360xf32, #tpu.memory_space<vmem>>, %arg8: memref<1x360xf32, #tpu.memory_space<vmem>>, %arg9: memref<32x360xf32, #tpu.memory_space<vmem>>, %arg10: memref<360x30xbf16, #tpu.memory_space<vmem>>, %arg11: memref<1x900xf32, #tpu.memory_space<vmem>>, %arg12: memref<30x900xbf16, #tpu.memory_space<vmem>>, %arg13: memref<32x900xbf16, #tpu.memory_space<vmem>>, %arg14: memref<900x30xbf16, #tpu.memory_space<vmem>>, %arg15: memref<900x32xf32, #tpu.memory_space<vmem>>, %arg16: memref<1x32xf32, #tpu.memory_space<vmem>>, %arg17: memref<32x64xf32, #tpu.memory_space<vmem>>, %arg18: memref<1x64xf32, #tpu.memory_space<vmem>>, %arg19: memref<64x900xf32, #tpu.memory_space<vmem>>, %arg20: memref<1x900xf32, #tpu.memory_space<vmem>>, %arg21: memref<90x300xf32, #tpu.memory_space<vmem>>, %arg22: memref<1x300xf32, #tpu.memory_space<vmem>>, %arg23: memref<3x300x30xf32, #tpu.memory_space<vmem>>, %arg24: memref<32x30xf32, #tpu.memory_space<vmem>>, %arg25: memref<32x30xf32, #tpu.memory_space<vmem>>, %arg26: memref<1x32x30xf32, #tpu.memory_space<vmem>>) attributes {dimension_semantics = [#tpu.dimension_semantics<parallel>], iteration_bounds = array<i64: 2>, scalar_prefetch = 0 : i64, scratch_operands = 0 : i64, tpu.core_type = #tpu.core_type<tc>, window_params = [{transform_indices = @transform_0, window_bounds = array<i64: 4>}, {transform_indices = @transform_1, window_bounds = array<i64: 2>}, {pipeline_mode = #tpu.pipeline_mode<synchronous>, transform_indices = @transform_2, window_bounds = array<i64: 2, 32>}, {transform_indices = @transform_3, window_bounds = array<i64: 1, 32, 30>}, {pipeline_mode = #tpu.pipeline_mode<synchronous>, transform_indices = @transform_4, window_bounds = array<i64: 32, 1>}, {pipeline_mode = #tpu.pipeline_mode<synchronous>, transform_indices = @transform_5, window_bounds = array<i64: 90, 30>}, {pipeline_mode = #tpu.pipeline_mode<synchronous>, transform_indices = @transform_6, window_bounds = array<i64: 150, 360>}, {pipeline_mode = #tpu.pipeline_mode<synchronous>, transform_indices = @transform_7, window_bounds = array<i64: 1, 360>}, {pipeline_mode = #tpu.pipeline_mode<synchronous>, transform_indices = @transform_8, window_bounds = array<i64: 32, 360>}, {pipeline_mode = #tpu.pipeline_mode<synchronous>, transform_indices = @transform_9, window_bounds = array<i64: 360, 30>}, {pipeline_mode = #tpu.pipeline_mode<synchronous>, transform_indices = @transform_10, window_bounds = array<i64: 1, 900>}, {pipeline_mode = #tpu.pipeline_mode<synchronous>, transform_indices = @transform_11, window_bounds = array<i64: 30, 900>}, {pipeline_mode = #tpu.pipeline_mode<synchronous>, transform_indices = @transform_12, window_bounds = array<i64: 32, 900>}, {pipeline_mode = #tpu.pipeline_mode<synchronous>, transform_indices = @transform_13, window_bounds = array<i64: 900, 30>}, {pipeline_mode = #tpu.pipeline_mode<synchronous>, transform_indices = @transform_14, window_bounds = array<i64: 900, 32>}, {pipeline_mode = #tpu.pipeline_mode<synchronous>, transform_indices = @transform_15, window_bounds = array<i64: 1, 32>}, {pipeline_mode = #tpu.pipeline_mode<synchronous>, transform_indices = @transform_16, window_bounds = array<i64: 32, 64>}, {pipeline_mode = #tpu.pipeline_mode<synchronous>, transform_indices = @transform_17, window_bounds = array<i64: 1, 64>}, {pipeline_mode = #tpu.pipeline_mode<synchronous>, transform_indices = @transform_18, window_bounds = array<i64: 64, 900>}, {pipeline_mode = #tpu.pipeline_mode<synchronous>, transform_indices = @transform_19, window_bounds = array<i64: 1, 900>}, {pipeline_mode = #tpu.pipeline_mode<synchronous>, transform_indices = @transform_20, window_bounds = array<i64: 90, 300>}, {pipeline_mode = #tpu.pipeline_mode<synchronous>, transform_indices = @transform_21, window_bounds = array<i64: 1, 300>}, {pipeline_mode = #tpu.pipeline_mode<synchronous>, transform_indices = @transform_22, window_bounds = array<i64: 3, 300, 30>}, {pipeline_mode = #tpu.pipeline_mode<synchronous>, transform_indices = @transform_23, window_bounds = array<i64: 32, 30>}, {pipeline_mode = #tpu.pipeline_mode<synchronous>, transform_indices = @transform_24, window_bounds = array<i64: 32, 30>}, {transform_indices = @transform_25, window_bounds = array<i64: 1, 32, 30>}]} {
    %c0 = arith.constant 0 : index
    %c0_0 = arith.constant 0 : index
    %0 = vector.load %arg5[%c0, %c0_0] : memref<32x1xi32, #tpu.memory_space<vmem>>, vector<32x1xi32>
    %c0_1 = arith.constant 0 : index
    %c0_2 = arith.constant 0 : index
    %1 = vector.load %arg13[%c0_1, %c0_2] : memref<32x900xbf16, #tpu.memory_space<vmem>>, vector<32x900xbf16>
    %2 = arith.extf %1 : vector<32x900xbf16> to vector<32x900xf32>
    %c0_3 = arith.constant 0 : index
    %c0_4 = arith.constant 0 : index
    %c0_5 = arith.constant 0 : index
    %3 = vector.load %arg4[%c0_3, %c0_4, %c0_5] : memref<1x32x30xf32, #tpu.memory_space<vmem>>, vector<1x32x30xf32>
    %4 = vector.shape_cast %3 : vector<1x32x30xf32> to vector<32x30xf32>
    %c1_i32 = arith.constant 1 : i32
    %5 = tpu.dynamic_rotate %4 by %c1_i32 dim 0 : vector<32x30xf32>, i32 -> vector<32x30xf32>
    %c-1_i32 = arith.constant -1 : i32
    %6 = vector.broadcast %c-1_i32 : i32 to vector<32x1xi32>
    %7 = arith.addi %0, %6 : vector<32x1xi32>
    %c0_i32 = arith.constant 0 : i32
    %8 = vector.broadcast %c0_i32 : i32 to vector<32x1xi32>
    %9 = arith.cmpi sge, %7, %8 : vector<32x1xi32>
    %c-1_i32_6 = arith.constant -1 : i32
    %10 = vector.broadcast %c-1_i32_6 : i32 to vector<32x1xi32>
    %11 = arith.addi %0, %10 : vector<32x1xi32>
    %c30_i32 = arith.constant 30 : i32
    %12 = vector.broadcast %c30_i32 : i32 to vector<32x1xi32>
    %13 = arith.cmpi slt, %11, %12 : vector<32x1xi32>
    %14 = arith.andi %9, %13 : vector<32x1xi1>
    %cst = arith.constant 0.000000e+00 : f32
    %15 = vector.shape_cast %14 : vector<32x1xi1> to vector<32x1xi1>
    %16 = vector.broadcast %15 : vector<32x1xi1> to vector<32x30xi1>
    %17 = vector.broadcast %cst : f32 to vector<32x30xf32>
    %18 = arith.select %16, %5, %17 : vector<32x30xi1>, vector<32x30xf32>
    %c31_i32 = arith.constant 31 : i32
    %19 = tpu.dynamic_rotate %4 by %c31_i32 dim 0 : vector<32x30xf32>, i32 -> vector<32x30xf32>
    %c1_i32_7 = arith.constant 1 : i32
    %20 = vector.broadcast %c1_i32_7 : i32 to vector<32x1xi32>
    %21 = arith.addi %0, %20 : vector<32x1xi32>
    %c0_i32_8 = arith.constant 0 : i32
    %22 = vector.broadcast %c0_i32_8 : i32 to vector<32x1xi32>
    %23 = arith.cmpi sge, %21, %22 : vector<32x1xi32>
    %c1_i32_9 = arith.constant 1 : i32
    %24 = vector.broadcast %c1_i32_9 : i32 to vector<32x1xi32>
    %25 = arith.addi %0, %24 : vector<32x1xi32>
    %c30_i32_10 = arith.constant 30 : i32
    %26 = vector.broadcast %c30_i32_10 : i32 to vector<32x1xi32>
    %27 = arith.cmpi slt, %25, %26 : vector<32x1xi32>
    %28 = arith.andi %23, %27 : vector<32x1xi1>
    %cst_11 = arith.constant 0.000000e+00 : f32
    %29 = vector.shape_cast %28 : vector<32x1xi1> to vector<32x1xi1>
    %30 = vector.broadcast %29 : vector<32x1xi1> to vector<32x30xi1>
    %31 = vector.broadcast %cst_11 : f32 to vector<32x30xf32>
    %32 = arith.select %30, %19, %31 : vector<32x30xi1>, vector<32x30xf32>
    %33 = tpu.concatenate %18, %4, %32 in 1 : vector<32x30xf32>, vector<32x30xf32>, vector<32x30xf32> -> vector<32x90xf32>
    %c0_12 = arith.constant 0 : index
    %c0_13 = arith.constant 0 : index
    %34 = vector.load %arg6[%c0_12, %c0_13] : memref<90x30xf32, #tpu.memory_space<vmem>>, vector<90x30xf32>
    %cst_14 = arith.constant dense<0.000000e+00> : vector<32x30xf32>
    %35 = tpu.matmul %33, %34, %cst_14 {dimension_numbers = #tpu.dot_dimension_numbers<[1], [0], [0], [1], [0, 0, 1, 1], [], []>} : vector<32x90xf32>, vector<90x30xf32>, vector<32x30xf32> -> vector<32x30xf32>
    %c0_15 = arith.constant 0 : index
    %36 = memref.load %arg2[%c0_15] : memref<2xf32, #tpu.memory_space<smem>>
    %37 = vector.broadcast %36 : f32 to vector<32x30xf32>
    %38 = arith.addf %35, %37 : vector<32x30xf32>
    %cst_16 = arith.constant 0.000000e+00 : f32
    %39 = vector.broadcast %cst_16 : f32 to vector<32x30xf32>
    %40 = arith.maximumf %38, %39 : vector<32x30xf32>
    %c2_i32 = arith.constant 2 : i32
    %41 = tpu.dynamic_rotate %40 by %c2_i32 dim 0 : vector<32x30xf32>, i32 -> vector<32x30xf32>
    %c-2_i32 = arith.constant -2 : i32
    %42 = vector.broadcast %c-2_i32 : i32 to vector<32x1xi32>
    %43 = arith.addi %0, %42 : vector<32x1xi32>
    %c0_i32_17 = arith.constant 0 : i32
    %44 = vector.broadcast %c0_i32_17 : i32 to vector<32x1xi32>
    %45 = arith.cmpi sge, %43, %44 : vector<32x1xi32>
    %c-2_i32_18 = arith.constant -2 : i32
    %46 = vector.broadcast %c-2_i32_18 : i32 to vector<32x1xi32>
    %47 = arith.addi %0, %46 : vector<32x1xi32>
    %c30_i32_19 = arith.constant 30 : i32
    %48 = vector.broadcast %c30_i32_19 : i32 to vector<32x1xi32>
    %49 = arith.cmpi slt, %47, %48 : vector<32x1xi32>
    %50 = arith.andi %45, %49 : vector<32x1xi1>
    %cst_20 = arith.constant 0.000000e+00 : f32
    %51 = vector.shape_cast %50 : vector<32x1xi1> to vector<32x1xi1>
    %52 = vector.broadcast %51 : vector<32x1xi1> to vector<32x30xi1>
    %53 = vector.broadcast %cst_20 : f32 to vector<32x30xf32>
    %54 = arith.select %52, %41, %53 : vector<32x30xi1>, vector<32x30xf32>
    %c1_i32_21 = arith.constant 1 : i32
    %55 = tpu.dynamic_rotate %40 by %c1_i32_21 dim 0 : vector<32x30xf32>, i32 -> vector<32x30xf32>
    %c-1_i32_22 = arith.constant -1 : i32
    %56 = vector.broadcast %c-1_i32_22 : i32 to vector<32x1xi32>
    %57 = arith.addi %0, %56 : vector<32x1xi32>
    %c0_i32_23 = arith.constant 0 : i32
    %58 = vector.broadcast %c0_i32_23 : i32 to vector<32x1xi32>
    %59 = arith.cmpi sge, %57, %58 : vector<32x1xi32>
    %c-1_i32_24 = arith.constant -1 : i32
    %60 = vector.broadcast %c-1_i32_24 : i32 to vector<32x1xi32>
    %61 = arith.addi %0, %60 : vector<32x1xi32>
    %c30_i32_25 = arith.constant 30 : i32
    %62 = vector.broadcast %c30_i32_25 : i32 to vector<32x1xi32>
    %63 = arith.cmpi slt, %61, %62 : vector<32x1xi32>
    %64 = arith.andi %59, %63 : vector<32x1xi1>
    %cst_26 = arith.constant 0.000000e+00 : f32
    %65 = vector.shape_cast %64 : vector<32x1xi1> to vector<32x1xi1>
    %66 = vector.broadcast %65 : vector<32x1xi1> to vector<32x30xi1>
    %67 = vector.broadcast %cst_26 : f32 to vector<32x30xf32>
    %68 = arith.select %66, %55, %67 : vector<32x30xi1>, vector<32x30xf32>
    %c31_i32_27 = arith.constant 31 : i32
    %69 = tpu.dynamic_rotate %40 by %c31_i32_27 dim 0 : vector<32x30xf32>, i32 -> vector<32x30xf32>
    %c1_i32_28 = arith.constant 1 : i32
    %70 = vector.broadcast %c1_i32_28 : i32 to vector<32x1xi32>
    %71 = arith.addi %0, %70 : vector<32x1xi32>
    %c0_i32_29 = arith.constant 0 : i32
    %72 = vector.broadcast %c0_i32_29 : i32 to vector<32x1xi32>
    %73 = arith.cmpi sge, %71, %72 : vector<32x1xi32>
    %c1_i32_30 = arith.constant 1 : i32
    %74 = vector.broadcast %c1_i32_30 : i32 to vector<32x1xi32>
    %75 = arith.addi %0, %74 : vector<32x1xi32>
    %c30_i32_31 = arith.constant 30 : i32
    %76 = vector.broadcast %c30_i32_31 : i32 to vector<32x1xi32>
    %77 = arith.cmpi slt, %75, %76 : vector<32x1xi32>
    %78 = arith.andi %73, %77 : vector<32x1xi1>
    %cst_32 = arith.constant 0.000000e+00 : f32
    %79 = vector.shape_cast %78 : vector<32x1xi1> to vector<32x1xi1>
    %80 = vector.broadcast %79 : vector<32x1xi1> to vector<32x30xi1>
    %81 = vector.broadcast %cst_32 : f32 to vector<32x30xf32>
    %82 = arith.select %80, %69, %81 : vector<32x30xi1>, vector<32x30xf32>
    %c30_i32_33 = arith.constant 30 : i32
    %83 = tpu.dynamic_rotate %40 by %c30_i32_33 dim 0 : vector<32x30xf32>, i32 -> vector<32x30xf32>
    %c2_i32_34 = arith.constant 2 : i32
    %84 = vector.broadcast %c2_i32_34 : i32 to vector<32x1xi32>
    %85 = arith.addi %0, %84 : vector<32x1xi32>
    %c0_i32_35 = arith.constant 0 : i32
    %86 = vector.broadcast %c0_i32_35 : i32 to vector<32x1xi32>
    %87 = arith.cmpi sge, %85, %86 : vector<32x1xi32>
    %c2_i32_36 = arith.constant 2 : i32
    %88 = vector.broadcast %c2_i32_36 : i32 to vector<32x1xi32>
    %89 = arith.addi %0, %88 : vector<32x1xi32>
    %c30_i32_37 = arith.constant 30 : i32
    %90 = vector.broadcast %c30_i32_37 : i32 to vector<32x1xi32>
    %91 = arith.cmpi slt, %89, %90 : vector<32x1xi32>
    %92 = arith.andi %87, %91 : vector<32x1xi1>
    %cst_38 = arith.constant 0.000000e+00 : f32
    %93 = vector.shape_cast %92 : vector<32x1xi1> to vector<32x1xi1>
    %94 = vector.broadcast %93 : vector<32x1xi1> to vector<32x30xi1>
    %95 = vector.broadcast %cst_38 : f32 to vector<32x30xf32>
    %96 = arith.select %94, %83, %95 : vector<32x30xi1>, vector<32x30xf32>
    %97 = tpu.concatenate %54, %68, %40, %82, %96 in 1 : vector<32x30xf32>, vector<32x30xf32>, vector<32x30xf32>, vector<32x30xf32>, vector<32x30xf32> -> vector<32x150xf32>
    %c0_39 = arith.constant 0 : index
    %c0_40 = arith.constant 0 : index
    %98 = vector.load %arg7[%c0_39, %c0_40] : memref<150x360xf32, #tpu.memory_space<vmem>>, vector<150x360xf32>
    %cst_41 = arith.constant dense<0.000000e+00> : vector<32x360xf32>
    %99 = tpu.matmul %97, %98, %cst_41 {dimension_numbers = #tpu.dot_dimension_numbers<[1], [0], [0], [1], [0, 0, 1, 1], [], []>} : vector<32x150xf32>, vector<150x360xf32>, vector<32x360xf32> -> vector<32x360xf32>
    %c0_42 = arith.constant 0 : index
    %c0_43 = arith.constant 0 : index
    %100 = vector.load %arg8[%c0_42, %c0_43] : memref<1x360xf32, #tpu.memory_space<vmem>>, vector<1x360xf32>
    %101 = vector.broadcast %100 : vector<1x360xf32> to vector<32x360xf32>
    %102 = arith.addf %99, %101 : vector<32x360xf32>
    %cst_44 = arith.constant 0.000000e+00 : f32
    %103 = vector.broadcast %cst_44 : f32 to vector<32x360xf32>
    %104 = arith.maximumf %102, %103 : vector<32x360xf32>
    %c0_45 = arith.constant 0 : index
    %c0_46 = arith.constant 0 : index
    %105 = vector.load %arg9[%c0_45, %c0_46] : memref<32x360xf32, #tpu.memory_space<vmem>>, vector<32x360xf32>
    %106 = arith.mulf %104, %105 : vector<32x360xf32>
    %c0_47 = arith.constant 0 : index
    %c0_48 = arith.constant 0 : index
    %107 = vector.load %arg10[%c0_47, %c0_48] : memref<360x30xbf16, #tpu.memory_space<vmem>>, vector<360x30xbf16>
    %108 = arith.extf %107 : vector<360x30xbf16> to vector<360x30xf32>
    %cst_49 = arith.constant dense<0.000000e+00> : vector<32x30xf32>
    %109 = tpu.matmul %106, %108, %cst_49 {dimension_numbers = #tpu.dot_dimension_numbers<[1], [0], [0], [1], [0, 0, 1, 1], [], []>} : vector<32x360xf32>, vector<360x30xf32>, vector<32x30xf32> -> vector<32x30xf32>
    %c0_50 = arith.constant 0 : index
    %c0_51 = arith.constant 0 : index
    %110 = vector.load %arg12[%c0_50, %c0_51] : memref<30x900xbf16, #tpu.memory_space<vmem>>, vector<30x900xbf16>
    %111 = arith.extf %110 : vector<30x900xbf16> to vector<30x900xf32>
    %cst_52 = arith.constant dense<0.000000e+00> : vector<32x900xf32>
    %112 = tpu.matmul %109, %111, %cst_52 {dimension_numbers = #tpu.dot_dimension_numbers<[1], [0], [0], [1], [0, 0, 1, 1], [], []>} : vector<32x30xf32>, vector<30x900xf32>, vector<32x900xf32> -> vector<32x900xf32>
    %113 = arith.mulf %112, %2 : vector<32x900xf32>
    %cst_53 = arith.constant dense<0.000000e+00> : vector<900xf32>
    %114 = vector.multi_reduction <add>, %113, %cst_53 [0] : vector<32x900xf32> to vector<900xf32>
    %115 = vector.shape_cast %114 : vector<900xf32> to vector<1x900xf32>
    %c0_54 = arith.constant 0 : index
    %c0_55 = arith.constant 0 : index
    %116 = vector.load %arg11[%c0_54, %c0_55] : memref<1x900xf32, #tpu.memory_space<vmem>>, vector<1x900xf32>
    %117 = arith.addf %115, %116 : vector<1x900xf32>
    %cst_56 = arith.constant 0.000000e+00 : f32
    %118 = vector.broadcast %cst_56 : f32 to vector<1x900xf32>
    %119 = arith.maximumf %117, %118 : vector<1x900xf32>
    %120 = arith.index_cast %arg0 : i32 to index
    %c0_57 = arith.constant 0 : index
    %121 = vector.load %arg3[%120, %c0_57] : memref<2x32xf32, #tpu.memory_space<vmem>>, vector<1x32xf32>
    %c0_58 = arith.constant 0 : index
    %c0_59 = arith.constant 0 : index
    %122 = vector.load %arg15[%c0_58, %c0_59] : memref<900x32xf32, #tpu.memory_space<vmem>>, vector<900x32xf32>
    %cst_60 = arith.constant dense<0.000000e+00> : vector<1x32xf32>
    %123 = tpu.matmul %119, %122, %cst_60 {dimension_numbers = #tpu.dot_dimension_numbers<[1], [0], [0], [1], [0, 0, 1, 1], [], []>} : vector<1x900xf32>, vector<900x32xf32>, vector<1x32xf32> -> vector<1x32xf32>
    %c0_61 = arith.constant 0 : index
    %c0_62 = arith.constant 0 : index
    %124 = vector.load %arg16[%c0_61, %c0_62] : memref<1x32xf32, #tpu.memory_space<vmem>>, vector<1x32xf32>
    %125 = arith.addf %123, %124 : vector<1x32xf32>
    %cst_63 = arith.constant 0.000000e+00 : f32
    %126 = vector.broadcast %cst_63 : f32 to vector<1x32xf32>
    %127 = arith.maximumf %125, %126 : vector<1x32xf32>
    %128 = arith.addf %121, %127 : vector<1x32xf32>
    %cst_64 = arith.constant 0.000000e+00 : f32
    %129 = vector.broadcast %cst_64 : f32 to vector<1x32xf32>
    %130 = arith.maximumf %128, %129 : vector<1x32xf32>
    %c0_65 = arith.constant 0 : index
    %c0_66 = arith.constant 0 : index
    %131 = vector.load %arg17[%c0_65, %c0_66] : memref<32x64xf32, #tpu.memory_space<vmem>>, vector<32x64xf32>
    %cst_67 = arith.constant dense<0.000000e+00> : vector<1x64xf32>
    %132 = tpu.matmul %130, %131, %cst_67 {dimension_numbers = #tpu.dot_dimension_numbers<[1], [0], [0], [1], [0, 0, 1, 1], [], []>} : vector<1x32xf32>, vector<32x64xf32>, vector<1x64xf32> -> vector<1x64xf32>
    %c0_68 = arith.constant 0 : index
    %c0_69 = arith.constant 0 : index
    %133 = vector.load %arg18[%c0_68, %c0_69] : memref<1x64xf32, #tpu.memory_space<vmem>>, vector<1x64xf32>
    %134 = arith.addf %132, %133 : vector<1x64xf32>
    %cst_70 = arith.constant 0.000000e+00 : f32
    %135 = vector.broadcast %cst_70 : f32 to vector<1x64xf32>
    %136 = arith.maximumf %134, %135 : vector<1x64xf32>
    %c0_71 = arith.constant 0 : index
    %c0_72 = arith.constant 0 : index
    %137 = vector.load %arg19[%c0_71, %c0_72] : memref<64x900xf32, #tpu.memory_space<vmem>>, vector<64x900xf32>
    %cst_73 = arith.constant dense<0.000000e+00> : vector<1x900xf32>
    %138 = tpu.matmul %136, %137, %cst_73 {dimension_numbers = #tpu.dot_dimension_numbers<[1], [0], [0], [1], [0, 0, 1, 1], [], []>} : vector<1x64xf32>, vector<64x900xf32>, vector<1x900xf32> -> vector<1x900xf32>
    %c0_74 = arith.constant 0 : index
    %c0_75 = arith.constant 0 : index
    %139 = vector.load %arg20[%c0_74, %c0_75] : memref<1x900xf32, #tpu.memory_space<vmem>>, vector<1x900xf32>
    %140 = arith.addf %138, %139 : vector<1x900xf32>
    %cst_76 = arith.constant 0.000000e+00 : f32
    %141 = vector.broadcast %cst_76 : f32 to vector<1x900xf32>
    %142 = arith.maximumf %140, %141 : vector<1x900xf32>
    %143 = vector.shape_cast %142 : vector<1x900xf32> to vector<1x900xf32>
    %144 = vector.broadcast %143 : vector<1x900xf32> to vector<32x900xf32>
    %145 = arith.mulf %144, %2 : vector<32x900xf32>
    %c0_77 = arith.constant 0 : index
    %c0_78 = arith.constant 0 : index
    %146 = vector.load %arg14[%c0_77, %c0_78] : memref<900x30xbf16, #tpu.memory_space<vmem>>, vector<900x30xbf16>
    %147 = arith.extf %146 : vector<900x30xbf16> to vector<900x30xf32>
    %cst_79 = arith.constant dense<0.000000e+00> : vector<32x30xf32>
    %148 = tpu.matmul %145, %147, %cst_79 {dimension_numbers = #tpu.dot_dimension_numbers<[1], [0], [0], [1], [0, 0, 1, 1], [], []>} : vector<32x900xf32>, vector<900x30xf32>, vector<32x30xf32> -> vector<32x30xf32>
    %c1_i32_80 = arith.constant 1 : i32
    %149 = tpu.dynamic_rotate %148 by %c1_i32_80 dim 0 : vector<32x30xf32>, i32 -> vector<32x30xf32>
    %c-1_i32_81 = arith.constant -1 : i32
    %150 = vector.broadcast %c-1_i32_81 : i32 to vector<32x1xi32>
    %151 = arith.addi %0, %150 : vector<32x1xi32>
    %c0_i32_82 = arith.constant 0 : i32
    %152 = vector.broadcast %c0_i32_82 : i32 to vector<32x1xi32>
    %153 = arith.cmpi sge, %151, %152 : vector<32x1xi32>
    %c-1_i32_83 = arith.constant -1 : i32
    %154 = vector.broadcast %c-1_i32_83 : i32 to vector<32x1xi32>
    %155 = arith.addi %0, %154 : vector<32x1xi32>
    %c30_i32_84 = arith.constant 30 : i32
    %156 = vector.broadcast %c30_i32_84 : i32 to vector<32x1xi32>
    %157 = arith.cmpi slt, %155, %156 : vector<32x1xi32>
    %158 = arith.andi %153, %157 : vector<32x1xi1>
    %cst_85 = arith.constant 0.000000e+00 : f32
    %159 = vector.shape_cast %158 : vector<32x1xi1> to vector<32x1xi1>
    %160 = vector.broadcast %159 : vector<32x1xi1> to vector<32x30xi1>
    %161 = vector.broadcast %cst_85 : f32 to vector<32x30xf32>
    %162 = arith.select %160, %149, %161 : vector<32x30xi1>, vector<32x30xf32>
    %c31_i32_86 = arith.constant 31 : i32
    %163 = tpu.dynamic_rotate %148 by %c31_i32_86 dim 0 : vector<32x30xf32>, i32 -> vector<32x30xf32>
    %c1_i32_87 = arith.constant 1 : i32
    %164 = vector.broadcast %c1_i32_87 : i32 to vector<32x1xi32>
    %165 = arith.addi %0, %164 : vector<32x1xi32>
    %c0_i32_88 = arith.constant 0 : i32
    %166 = vector.broadcast %c0_i32_88 : i32 to vector<32x1xi32>
    %167 = arith.cmpi sge, %165, %166 : vector<32x1xi32>
    %c1_i32_89 = arith.constant 1 : i32
    %168 = vector.broadcast %c1_i32_89 : i32 to vector<32x1xi32>
    %169 = arith.addi %0, %168 : vector<32x1xi32>
    %c30_i32_90 = arith.constant 30 : i32
    %170 = vector.broadcast %c30_i32_90 : i32 to vector<32x1xi32>
    %171 = arith.cmpi slt, %169, %170 : vector<32x1xi32>
    %172 = arith.andi %167, %171 : vector<32x1xi1>
    %cst_91 = arith.constant 0.000000e+00 : f32
    %173 = vector.shape_cast %172 : vector<32x1xi1> to vector<32x1xi1>
    %174 = vector.broadcast %173 : vector<32x1xi1> to vector<32x30xi1>
    %175 = vector.broadcast %cst_91 : f32 to vector<32x30xf32>
    %176 = arith.select %174, %163, %175 : vector<32x30xi1>, vector<32x30xf32>
    %177 = tpu.concatenate %162, %148, %176 in 1 : vector<32x30xf32>, vector<32x30xf32>, vector<32x30xf32> -> vector<32x90xf32>
    %c0_92 = arith.constant 0 : index
    %c0_93 = arith.constant 0 : index
    %178 = vector.load %arg21[%c0_92, %c0_93] : memref<90x300xf32, #tpu.memory_space<vmem>>, vector<90x300xf32>
    %cst_94 = arith.constant dense<0.000000e+00> : vector<32x300xf32>
    %179 = tpu.matmul %177, %178, %cst_94 {dimension_numbers = #tpu.dot_dimension_numbers<[1], [0], [0], [1], [0, 0, 1, 1], [], []>} : vector<32x90xf32>, vector<90x300xf32>, vector<32x300xf32> -> vector<32x300xf32>
    %c0_95 = arith.constant 0 : index
    %c0_96 = arith.constant 0 : index
    %180 = vector.load %arg22[%c0_95, %c0_96] : memref<1x300xf32, #tpu.memory_space<vmem>>, vector<1x300xf32>
    %181 = vector.broadcast %180 : vector<1x300xf32> to vector<32x300xf32>
    %182 = arith.addf %179, %181 : vector<32x300xf32>
    %cst_97 = arith.constant 0.000000e+00 : f32
    %183 = vector.broadcast %cst_97 : f32 to vector<32x300xf32>
    %184 = arith.cmpf ogt, %182, %183 : vector<32x300xf32>
    %cst_98 = arith.constant 1.000000e+00 : f32
    %185 = vector.broadcast %cst_98 : f32 to vector<32x300xf32>
    %186 = arith.cmpf ole, %182, %185 : vector<32x300xf32>
    %187 = arith.andi %184, %186 : vector<32x300xi1>
    %cst_99 = arith.constant 0.000000e+00 : f32
    %188 = vector.broadcast %cst_99 : f32 to vector<32x300xf32>
    %189 = arith.select %187, %182, %188 : vector<32x300xi1>, vector<32x300xf32>
    %c1 = arith.constant 1 : index
    %c0_100 = arith.constant 0 : index
    %c0_101 = arith.constant 0 : index
    %190 = vector.load %arg23[%c1, %c0_100, %c0_101] : memref<3x300x30xf32, #tpu.memory_space<vmem>>, vector<1x300x30xf32>
    %191 = vector.shape_cast %190 : vector<1x300x30xf32> to vector<300x30xf32>
    %cst_102 = arith.constant dense<0.000000e+00> : vector<32x30xf32>
    %192 = tpu.matmul %189, %191, %cst_102 {dimension_numbers = #tpu.dot_dimension_numbers<[1], [0], [0], [1], [0, 0, 1, 1], [], []>} : vector<32x300xf32>, vector<300x30xf32>, vector<32x30xf32> -> vector<32x30xf32>
    %c1_i32_103 = arith.constant 1 : i32
    %193 = tpu.dynamic_rotate %189 by %c1_i32_103 dim 0 : vector<32x300xf32>, i32 -> vector<32x300xf32>
    %c-1_i32_104 = arith.constant -1 : i32
    %194 = vector.broadcast %c-1_i32_104 : i32 to vector<32x1xi32>
    %195 = arith.addi %0, %194 : vector<32x1xi32>
    %c0_i32_105 = arith.constant 0 : i32
    %196 = vector.broadcast %c0_i32_105 : i32 to vector<32x1xi32>
    %197 = arith.cmpi sge, %195, %196 : vector<32x1xi32>
    %c-1_i32_106 = arith.constant -1 : i32
    %198 = vector.broadcast %c-1_i32_106 : i32 to vector<32x1xi32>
    %199 = arith.addi %0, %198 : vector<32x1xi32>
    %c30_i32_107 = arith.constant 30 : i32
    %200 = vector.broadcast %c30_i32_107 : i32 to vector<32x1xi32>
    %201 = arith.cmpi slt, %199, %200 : vector<32x1xi32>
    %202 = arith.andi %197, %201 : vector<32x1xi1>
    %cst_108 = arith.constant 0.000000e+00 : f32
    %203 = vector.shape_cast %202 : vector<32x1xi1> to vector<32x1xi1>
    %204 = vector.broadcast %203 : vector<32x1xi1> to vector<32x300xi1>
    %205 = vector.broadcast %cst_108 : f32 to vector<32x300xf32>
    %206 = arith.select %204, %193, %205 : vector<32x300xi1>, vector<32x300xf32>
    %c0_109 = arith.constant 0 : index
    %c0_110 = arith.constant 0 : index
    %c0_111 = arith.constant 0 : index
    %207 = vector.load %arg23[%c0_109, %c0_110, %c0_111] : memref<3x300x30xf32, #tpu.memory_space<vmem>>, vector<1x300x30xf32>
    %208 = vector.shape_cast %207 : vector<1x300x30xf32> to vector<300x30xf32>
    %cst_112 = arith.constant dense<0.000000e+00> : vector<32x30xf32>
    %209 = tpu.matmul %206, %208, %cst_112 {dimension_numbers = #tpu.dot_dimension_numbers<[1], [0], [0], [1], [0, 0, 1, 1], [], []>} : vector<32x300xf32>, vector<300x30xf32>, vector<32x30xf32> -> vector<32x30xf32>
    %210 = arith.addf %192, %209 : vector<32x30xf32>
    %c31_i32_113 = arith.constant 31 : i32
    %211 = tpu.dynamic_rotate %189 by %c31_i32_113 dim 0 : vector<32x300xf32>, i32 -> vector<32x300xf32>
    %c1_i32_114 = arith.constant 1 : i32
    %212 = vector.broadcast %c1_i32_114 : i32 to vector<32x1xi32>
    %213 = arith.addi %0, %212 : vector<32x1xi32>
    %c0_i32_115 = arith.constant 0 : i32
    %214 = vector.broadcast %c0_i32_115 : i32 to vector<32x1xi32>
    %215 = arith.cmpi sge, %213, %214 : vector<32x1xi32>
    %c1_i32_116 = arith.constant 1 : i32
    %216 = vector.broadcast %c1_i32_116 : i32 to vector<32x1xi32>
    %217 = arith.addi %0, %216 : vector<32x1xi32>
    %c30_i32_117 = arith.constant 30 : i32
    %218 = vector.broadcast %c30_i32_117 : i32 to vector<32x1xi32>
    %219 = arith.cmpi slt, %217, %218 : vector<32x1xi32>
    %220 = arith.andi %215, %219 : vector<32x1xi1>
    %cst_118 = arith.constant 0.000000e+00 : f32
    %221 = vector.shape_cast %220 : vector<32x1xi1> to vector<32x1xi1>
    %222 = vector.broadcast %221 : vector<32x1xi1> to vector<32x300xi1>
    %223 = vector.broadcast %cst_118 : f32 to vector<32x300xf32>
    %224 = arith.select %222, %211, %223 : vector<32x300xi1>, vector<32x300xf32>
    %c2 = arith.constant 2 : index
    %c0_119 = arith.constant 0 : index
    %c0_120 = arith.constant 0 : index
    %225 = vector.load %arg23[%c2, %c0_119, %c0_120] : memref<3x300x30xf32, #tpu.memory_space<vmem>>, vector<1x300x30xf32>
    %226 = vector.shape_cast %225 : vector<1x300x30xf32> to vector<300x30xf32>
    %cst_121 = arith.constant dense<0.000000e+00> : vector<32x30xf32>
    %227 = tpu.matmul %224, %226, %cst_121 {dimension_numbers = #tpu.dot_dimension_numbers<[1], [0], [0], [1], [0, 0, 1, 1], [], []>} : vector<32x300xf32>, vector<300x30xf32>, vector<32x30xf32> -> vector<32x30xf32>
    %228 = arith.addf %210, %227 : vector<32x30xf32>
    %c1_122 = arith.constant 1 : index
    %229 = memref.load %arg2[%c1_122] : memref<2xf32, #tpu.memory_space<smem>>
    %230 = vector.broadcast %229 : f32 to vector<32x30xf32>
    %231 = arith.addf %228, %230 : vector<32x30xf32>
    %c0_123 = arith.constant 0 : index
    %232 = memref.load %arg1[%c0_123] : memref<4xi32, #tpu.memory_space<smem>>
    %c1_124 = arith.constant 1 : index
    %233 = memref.load %arg1[%c1_124] : memref<4xi32, #tpu.memory_space<smem>>
    %c2_125 = arith.constant 2 : index
    %234 = memref.load %arg1[%c2_125] : memref<4xi32, #tpu.memory_space<smem>>
    %c3 = arith.constant 3 : index
    %235 = memref.load %arg1[%c3] : memref<4xi32, #tpu.memory_space<smem>>
    %236 = vector.broadcast %233 : i32 to vector<32x1xi32>
    %237 = arith.cmpi sge, %0, %236 : vector<32x1xi32>
    %238 = vector.broadcast %235 : i32 to vector<32x1xi32>
    %239 = arith.cmpi slt, %0, %238 : vector<32x1xi32>
    %240 = arith.andi %237, %239 : vector<32x1xi1>
    %c30_i32_126 = arith.constant 30 : i32
    %241 = vector.broadcast %c30_i32_126 : i32 to vector<32x1xi32>
    %242 = arith.cmpi slt, %0, %241 : vector<32x1xi32>
    %243 = arith.andi %240, %242 : vector<32x1xi1>
    %c0_i32_127 = arith.constant 0 : i32
    %244 = arith.cmpi sle, %232, %c0_i32_127 : i32
    %245 = vector.broadcast %244 : i1 to vector<32x1xi1>
    %246 = arith.andi %243, %245 : vector<32x1xi1>
    %c0_i32_128 = arith.constant 0 : i32
    %247 = arith.cmpi sgt, %234, %c0_i32_128 : i32
    %248 = vector.broadcast %247 : i1 to vector<32x1xi1>
    %249 = arith.andi %246, %248 : vector<32x1xi1>
    %cst_129 = arith.constant 0.000000e+00 : f32
    %250 = vector.shape_cast %249 : vector<32x1xi1> to vector<32x1xi1>
    %251 = vector.broadcast %250 : vector<32x1xi1> to vector<32x30xi1>
    %252 = vector.broadcast %cst_129 : f32 to vector<32x30xf32>
    %253 = arith.select %251, %231, %252 : vector<32x30xi1>, vector<32x30xf32>
    %cst_130 = arith.constant 0.000000e+00 : f32
    %254 = vector.broadcast %cst_130 : f32 to vector<32x30xf32>
    %255 = arith.cmpf ogt, %253, %254 : vector<32x30xf32>
    %cst_131 = arith.constant 1.000000e+00 : f32
    %256 = vector.broadcast %cst_131 : f32 to vector<32x30xf32>
    %257 = arith.cmpf ole, %253, %256 : vector<32x30xf32>
    %258 = arith.andi %255, %257 : vector<32x30xi1>
    %cst_132 = arith.constant 0.000000e+00 : f32
    %259 = vector.broadcast %cst_132 : f32 to vector<32x30xf32>
    %260 = arith.select %258, %253, %259 : vector<32x30xi1>, vector<32x30xf32>
    %c0_133 = arith.constant 0 : index
    %c0_134 = arith.constant 0 : index
    %261 = vector.load %arg24[%c0_133, %c0_134] : memref<32x30xf32, #tpu.memory_space<vmem>>, vector<32x30xf32>
    %262 = arith.mulf %260, %261 : vector<32x30xf32>
    %c0_135 = arith.constant 0 : index
    %c0_136 = arith.constant 0 : index
    %263 = vector.load %arg25[%c0_135, %c0_136] : memref<32x30xf32, #tpu.memory_space<vmem>>, vector<32x30xf32>
    %264 = arith.addf %262, %263 : vector<32x30xf32>
    %cst_137 = arith.constant 0.000000e+00 : f32
    %265 = vector.broadcast %cst_137 : f32 to vector<32x30xf32>
    %266 = arith.cmpf ogt, %264, %265 : vector<32x30xf32>
    %cst_138 = arith.constant 1.000000e+00 : f32
    %267 = vector.broadcast %cst_138 : f32 to vector<32x30xf32>
    %268 = arith.cmpf ole, %264, %267 : vector<32x30xf32>
    %269 = arith.andi %266, %268 : vector<32x30xi1>
    %cst_139 = arith.constant 0.000000e+00 : f32
    %270 = vector.broadcast %cst_139 : f32 to vector<32x30xf32>
    %271 = arith.select %269, %264, %270 : vector<32x30xi1>, vector<32x30xf32>
    %c0_140 = arith.constant 0 : index
    %c0_141 = arith.constant 0 : index
    %c0_142 = arith.constant 0 : index
    %272 = vector.load %arg26[%c0_140, %c0_141, %c0_142] : memref<1x32x30xf32, #tpu.memory_space<vmem>>, vector<1x32x30xf32>
    %273 = vector.shape_cast %272 : vector<1x32x30xf32> to vector<32x30xf32>
    %274 = vector.shape_cast %271 : vector<32x30xf32> to vector<1x32x30xf32>
    tpu.vector_store %arg26[%c0_140, %c0_141, %c0_142], %274 {strides = array<i32>} : memref<1x32x30xf32, #tpu.memory_space<vmem>>, vector<1x32x30xf32>,
    return
  }
  func.func @transform_0(%arg0: i32) -> i32 {
    %c0_i32 = arith.constant 0 : i32
    %c0_i32_0 = arith.constant 0 : i32
    return %c0_i32 : i32
  }
  func.func @transform_1(%arg0: i32) -> i32 {
    %c0_i32 = arith.constant 0 : i32
    %c0_i32_0 = arith.constant 0 : i32
    return %c0_i32 : i32
  }
  func.func @transform_2(%arg0: i32) -> (i32, i32) {
    %c0_i32 = arith.constant 0 : i32
    %c0_i32_0 = arith.constant 0 : i32
    %c0_i32_1 = arith.constant 0 : i32
    return %c0_i32, %c0_i32_0 : i32, i32
  }
  func.func @transform_3(%arg0: i32) -> (i32, i32, i32) {
    %c0_i32 = arith.constant 0 : i32
    %c0_i32_0 = arith.constant 0 : i32
    %c0_i32_1 = arith.constant 0 : i32
    return %arg0, %c0_i32, %c0_i32_0 : i32, i32, i32
  }
  func.func @transform_4(%arg0: i32) -> (i32, i32) {
    %c0_i32 = arith.constant 0 : i32
    %c0_i32_0 = arith.constant 0 : i32
    %c0_i32_1 = arith.constant 0 : i32
    return %c0_i32, %c0_i32_0 : i32, i32
  }
  func.func @transform_5(%arg0: i32) -> (i32, i32) {
    %c0_i32 = arith.constant 0 : i32
    %c0_i32_0 = arith.constant 0 : i32
    %c0_i32_1 = arith.constant 0 : i32
    return %c0_i32, %c0_i32_0 : i32, i32
  }
  func.func @transform_6(%arg0: i32) -> (i32, i32) {
    %c0_i32 = arith.constant 0 : i32
    %c0_i32_0 = arith.constant 0 : i32
    %c0_i32_1 = arith.constant 0 : i32
    return %c0_i32, %c0_i32_0 : i32, i32
  }
  func.func @transform_7(%arg0: i32) -> (i32, i32) {
    %c0_i32 = arith.constant 0 : i32
    %c0_i32_0 = arith.constant 0 : i32
    %c0_i32_1 = arith.constant 0 : i32
    return %c0_i32, %c0_i32_0 : i32, i32
  }
  func.func @transform_8(%arg0: i32) -> (i32, i32) {
    %c0_i32 = arith.constant 0 : i32
    %c0_i32_0 = arith.constant 0 : i32
    %c0_i32_1 = arith.constant 0 : i32
    return %c0_i32, %c0_i32_0 : i32, i32
  }
  func.func @transform_9(%arg0: i32) -> (i32, i32) {
    %c0_i32 = arith.constant 0 : i32
    %c0_i32_0 = arith.constant 0 : i32
    %c0_i32_1 = arith.constant 0 : i32
    return %c0_i32, %c0_i32_0 : i32, i32
  }
  func.func @transform_10(%arg0: i32) -> (i32, i32) {
    %c0_i32 = arith.constant 0 : i32
    %c0_i32_0 = arith.constant 0 : i32
    %c0_i32_1 = arith.constant 0 : i32
    return %c0_i32, %c0_i32_0 : i32, i32
  }
  func.func @transform_11(%arg0: i32) -> (i32, i32) {
    %c0_i32 = arith.constant 0 : i32
    %c0_i32_0 = arith.constant 0 : i32
    %c0_i32_1 = arith.constant 0 : i32
    return %c0_i32, %c0_i32_0 : i32, i32
  }
  func.func @transform_12(%arg0: i32) -> (i32, i32) {
    %c0_i32 = arith.constant 0 : i32
    %c0_i32_0 = arith.constant 0 : i32
    %c0_i32_1 = arith.constant 0 : i32
    return %c0_i32, %c0_i32_0 : i32, i32
  }
  func.func @transform_13(%arg0: i32) -> (i32, i32) {
    %c0_i32 = arith.constant 0 : i32
    %c0_i32_0 = arith.constant 0 : i32
    %c0_i32_1 = arith.constant 0 : i32
    return %c0_i32, %c0_i32_0 : i32, i32
  }
  func.func @transform_14(%arg0: i32) -> (i32, i32) {
    %c0_i32 = arith.constant 0 : i32
    %c0_i32_0 = arith.constant 0 : i32
    %c0_i32_1 = arith.constant 0 : i32
    return %c0_i32, %c0_i32_0 : i32, i32
  }
  func.func @transform_15(%arg0: i32) -> (i32, i32) {
    %c0_i32 = arith.constant 0 : i32
    %c0_i32_0 = arith.constant 0 : i32
    %c0_i32_1 = arith.constant 0 : i32
    return %c0_i32, %c0_i32_0 : i32, i32
  }
  func.func @transform_16(%arg0: i32) -> (i32, i32) {
    %c0_i32 = arith.constant 0 : i32
    %c0_i32_0 = arith.constant 0 : i32
    %c0_i32_1 = arith.constant 0 : i32
    return %c0_i32, %c0_i32_0 : i32, i32
  }
  func.func @transform_17(%arg0: i32) -> (i32, i32) {
    %c0_i32 = arith.constant 0 : i32
    %c0_i32_0 = arith.constant 0 : i32
    %c0_i32_1 = arith.constant 0 : i32
    return %c0_i32, %c0_i32_0 : i32, i32
  }
  func.func @transform_18(%arg0: i32) -> (i32, i32) {
    %c0_i32 = arith.constant 0 : i32
    %c0_i32_0 = arith.constant 0 : i32
    %c0_i32_1 = arith.constant 0 : i32
    return %c0_i32, %c0_i32_0 : i32, i32
  }
  func.func @transform_19(%arg0: i32) -> (i32, i32) {
    %c0_i32 = arith.constant 0 : i32
    %c0_i32_0 = arith.constant 0 : i32
    %c0_i32_1 = arith.constant 0 : i32
    return %c0_i32, %c0_i32_0 : i32, i32
  }
  func.func @transform_20(%arg0: i32) -> (i32, i32) {
    %c0_i32 = arith.constant 0 : i32
    %c0_i32_0 = arith.constant 0 : i32
    %c0_i32_1 = arith.constant 0 : i32
    return %c0_i32, %c0_i32_0 : i32, i32
  }
  func.func @transform_21(%arg0: i32) -> (i32, i32) {
    %c0_i32 = arith.constant 0 : i32
    %c0_i32_0 = arith.constant 0 : i32
    %c0_i32_1 = arith.constant 0 : i32
    return %c0_i32, %c0_i32_0 : i32, i32
  }
  func.func @transform_22(%arg0: i32) -> (i32, i32, i32) {
    %c0_i32 = arith.constant 0 : i32
    %c0_i32_0 = arith.constant 0 : i32
    %c0_i32_1 = arith.constant 0 : i32
    %c0_i32_2 = arith.constant 0 : i32
    return %c0_i32, %c0_i32_0, %c0_i32_1 : i32, i32, i32
  }
  func.func @transform_23(%arg0: i32) -> (i32, i32) {
    %c0_i32 = arith.constant 0 : i32
    %c0_i32_0 = arith.constant 0 : i32
    %c0_i32_1 = arith.constant 0 : i32
    return %c0_i32, %c0_i32_0 : i32, i32
  }
  func.func @transform_24(%arg0: i32) -> (i32, i32) {
    %c0_i32 = arith.constant 0 : i32
    %c0_i32_0 = arith.constant 0 : i32
    %c0_i32_1 = arith.constant 0 : i32
    return %c0_i32, %c0_i32_0 : i32, i32
  }
  func.func @transform_25(%arg0: i32) -> (i32, i32, i32) {
    %c0_i32 = arith.constant 0 : i32
    %c0_i32_0 = arith.constant 0 : i32
    %c0_i32_1 = arith.constant 0 : i32
    return %arg0, %c0_i32, %c0_i32_0 : i32, i32, i32
  }
}

</mosaic_0001>

<bundles_post_ra>
// kernel: re_decoder_forward.1
= control target key start
LH: loop header
LB: loop body
LE: loop exit
PB: predicated region body
PF: predicated region fallthrough
CT: control target
= control target key end

     0   :  { %s10636_s0 = inlined_call_operand.vmem [shape: s32[4], index: 0, kind: input, shape index: {}]   ;;  %s10637_s1 = inlined_call_operand.vmem [shape: f32[2], index: 1, kind: input, shape index: {}]   ;;  %s10638_s2 = inlined_call_operand.vmem [shape: f32[2,32], index: 2, kind: input, shape index: {}]   ;;  %s10639_s3 = inlined_call_operand.vmem [shape: f32[2,32,30], index: 3, kind: input, shape index: {}]   ;;  %s10640_s4 = inlined_call_operand.vmem [shape: s32[32,1], index: 4, kind: input, shape index: {}]   ;;  %s10641_s5 = inlined_call_operand.vmem [shape: f32[90,30], index: 5, kind: input, shape index: {}]   ;;  %s10642_s6 = inlined_call_operand.vmem [shape: f32[150,360], index: 6, kind: input, shape index: {}]   ;;  %s10643_s7 = inlined_call_operand.vmem [shape: f32[1,360], index: 7, kind: input, shape index: {}]   ;;  %s10644_s8 = inlined_call_operand.vmem [shape: f32[32,360], index: 8, kind: input, shape index: {}]   ;;  %s10645_s9 = inlined_call_operand.vmem [shape: bf16[360,30], index: 9, kind: input, shape index: {}]   ;;  %s10646_s10 = inlined_call_operand.vmem [shape: f32[1,900], index: 10, kind: input, shape index: {}]   ;;  %s10647_s11 = inlined_call_operand.vmem [shape: bf16[30,900], index: 11, kind: input, shape index: {}]   ;;  %s10648_s12 = inlined_call_operand.vmem [shape: bf16[32,900], index: 12, kind: input, shape index: {}]   ;;  %s10649_s13 = inlined_call_operand.vmem [shape: bf16[900,30], index: 13, kind: input, shape index: {}]   ;;  %s10650_s14 = inlined_call_operand.vmem [shape: f32[900,32], index: 14, kind: input, shape index: {}]   ;;  %s10651_s15 = inlined_call_operand.vmem [shape: f32[1,32], index: 15, kind: input, shape index: {}]   ;;  %s10652_s16 = inlined_call_operand.vmem [shape: f32[32,64], index: 16, kind: input, shape index: {}]   ;;  %s10653_s17 = inlined_call_operand.vmem [shape: f32[1,64], index: 17, kind: input, shape index: {}]   ;;  %s10654_s18 = inlined_call_operand.vmem [shape: f32[64,900], index: 18, kind: input, shape index: {}]   ;;  %s10655_s19 = inlined_call_operand.vmem [shape: f32[1,900], index: 19, kind: input, shape index: {}]   ;;  %s10656_s20 = inlined_call_operand.vmem [shape: f32[90,300], index: 20, kind: input, shape index: {}]   ;;  %s10657_s21 = inlined_call_operand.vmem [shape: f32[1,300], index: 21, kind: input, shape index: {}]   ;;  %s10658_s22 = inlined_call_operand.vmem [shape: f32[3,300,30], index: 22, kind: input, shape index: {}]   ;;  %s10659_s23 = inlined_call_operand.vmem [shape: f32[32,30], index: 23, kind: input, shape index: {}]   ;;  %s10660_s24 = inlined_call_operand.vmem [shape: f32[32,30], index: 24, kind: input, shape index: {}]   ;;  %s10661_s25 = inlined_call_operand.vmem [shape: f32[2,32,30], index: 25, kind: output, shape index: {}]  }
   0x1   :  { %10746 = sst [smem:[#allocation23_spill]] %s10636_s0 }
   0x2   :  { %10747 = sst [smem:[#allocation24_spill]] %s10637_s1 }
   0x3   :  { %10748 = sst [smem:[#allocation25_spill]] %s10638_s2 }
   0x4   :  { %10749 = sst [smem:[#allocation26_spill]] %s10639_s3 }
   0x5   :  { %10750 = sst [smem:[#allocation27_spill]] %s10640_s4 }
   0x6   :  { %10751 = sst [smem:[#allocation28_spill]] %s10641_s5 }
   0x7   :  { %10752 = sst [smem:[#allocation29_spill]] %s10642_s6 }
   0x8   :  { %10753 = sst [smem:[#allocation30_spill]] %s10643_s7 }
   0x9   :  { %10754 = sst [smem:[#allocation31_spill]] %s10644_s8 }
   0xa   :  { %10755 = sst [smem:[#allocation32_spill]] %s10645_s9 }
   0xb   :  { %10756 = sst [smem:[#allocation33_spill]] %s10646_s10 }
   0xc   :  { %10757 = sst [smem:[#allocation34_spill]] %s10647_s11 }
   0xd   :  { %10758 = sst [smem:[#allocation35_spill]] %s10648_s12 }
   0xe   :  { %10759 = sst [smem:[#allocation36_spill]] %s10661_s25 }
   0xf   :  { %30 = vsyncpa [#allocation3], 0 }
  0x10   :  { %31 = vsyncpa [#allocation5], 0  ;;  %s7562_s29 = smov 0  }
  0x11 LB: > { %10760 = sst [smem:[#allocation8_spill]] %s7419_s29  ;;  %s7568_s2 = sadd.s32 4294967295, %s7419_s29   ;;  %s7419_s29 = sphi %s7562_s29, %s37_s29  }
  0x12   : > { %p5341_p0 = scmp.ge.s32.totalorder %s7419_s29, 1  ;;  %p598_p1 = scmp.lt.s32.totalorder %s7419_s29, 3 }
  0x13   : > { %s10761_s7 = sld [smem:[#allocation23_spill]]  ;;  %p10667_p3 = scmp.eq.s32.totalorder %s7568_s2, 0 }
  0x14   : > { %p7575_p2 = pnand %p5341_p0, %p598_p1  ;;  %s10763_s27 = sld [smem:[#allocation24_spill]] }
  0x16   : > { %s10762_s26 = scalar_select %p7575_p2, 1, 0 }
  0x17   : > { %p7319_p4 = pneg %p7575_p2 }
  0x19   : > { %s611_s3 = sshll.u32 %s10761_s7, 4  ;;  %p7587_p5 = pnand %p10667_p3, %p7319_p4  ;;  %s612_s3 = int_to_ptr.vmem [resolvable:$true] %s611_s3 }
  0x1a   : > { %s622_s4 = sshll.u32 %s10763_s27, 4  ;;  %s7375_s9 = scalar_lea.vmem %s612_s3, 16  ;;  %s623_s4 = int_to_ptr.vmem [resolvable:$true] %s622_s4 }
  0x1b   : > { %p7376_p6 = scmp.ne.s32.totalorder %s612_s3, %s7375_s9  ;;  %p7377_p7 = pneg %p7587_p5 }
  0x1c   : > { %p7383_p10 = scmp.lt.s32.totalorder %s612_s3, %s612_s3  ;;  %p7384_p11 = scmp.lt.s32.totalorder %s7375_s9, %s7375_s9 }
  0x1d   : > { %p7378_p8 = pnand %p7377_p7, %p7376_p6 }
  0x1e   : > { %p7385_p12 = por %p7384_p11, %p7383_p10 }
  0x1f   : > { %p7379_p9 = pneg %p7378_p8 }
  0x21   : > { %p7386_p13 = pnand %p7385_p12, %p7379_p9 }
  0x23   : > { %7389 = shalt.err (!%p7386_p13)
}
  0x24   : > { %s7421_s5 = smov [#allocation2]   ;;  %s7390_s0 = scalar_lea.vmem %s623_s4, 16 }
  0x25   : > { %7322 = dma.vmem_to_smem (!%p7587_p5), %s612_s3, 16, %s7421_s5, [#allocation3]  }
  0x26   : > { %p7391_p0 = scmp.ne.s32.totalorder %s623_s4, %s7390_s0  ;;  %p7398_p3 = scmp.lt.s32.totalorder %s623_s4, %s623_s4 }
  0x27   : > { %p7399_p2 = scmp.lt.s32.totalorder %s7390_s0, %s7390_s0 }
  0x28   : > { %p7393_p1 = pnand %p7391_p0, %p7377_p7 }
  0x29   : > { %p7400_p6 = por %p7399_p2, %p7398_p3 }
  0x2a   : > { %p7394_p4 = pneg %p7393_p1 }
  0x2c   : > { %p7401_p8 = pnand %p7400_p6, %p7394_p4 }
  0x2e   : > { %7404 = shalt.err (!%p7401_p8)
}
  0x2f   : > { %s7422_s6 = smov [#allocation4]   ;;  %p10765_p9 = scmp.ne.s32.totalorder %s10762_s26, 0 }
  0x30   : > { %7325 = dma.vmem_to_smem (!%p7587_p5), %s623_s4, 16, %s7422_s6, [#allocation5]  }
  0x31   : > { %709 = sbr.rel (%p10765_p9) target bundleno = 2969 (0xb99), region = 120 }
  0x38   : > { %p10766_p10 = scmp.eq.s32.totalorder %s7568_s2, 0 }
  0x3a   : > { %7410 = dma.done.wait (%p10766_p10), [#allocation3], 16   ;;  %p10767_p11 = pmov %p10766_p10 }
  0x3b   : > { %p10768_p7 = pmov %p10766_p10 }
  0x3c   : > { %7412 = vsyncadd (%p10767_p11), [#allocation3], 4294967280 }
  0x3d   : > { %7414 = dma.done.wait (%p10768_p7), [#allocation5], 16   ;;  %p10769_p2 = pmov %p10768_p7 }
  0x3f   : > { %7416 = vsyncadd (%p10769_p2), [#allocation5], 4294967280 }
  0x40   : > { %719 = sfence }
  0x41   : > { %s10770_s3 = sld [smem:[#allocation27_spill]]  ;;  %p782_p3 = scmp.lt.s32.totalorder %s7568_s2, 1  ;;  %v10686_v3 = vmov 0   ;;  %v852_v23 = vlaneseq }
  0x42   : > { %7350 = vset.pattern.permute.xlu1 %v10686_v3  ;;  %7349 = vset.pattern.permute.xlu0 %v10686_v3  ;;  %s10771_s30 = sld [smem:[#allocation26_spill]]  ;;  %s10670_s26 = smov 30  }
  0x43   : > { %s7638_s9 = scalar_select %p782_p3, %s7568_s2, 1  ;;  %v7661_v31 = vshrl.u32 %v852_v23, 7 }
  0x44   : > { %s10774_s27 = sld [smem:[#allocation28_spill]]  ;;  %s10680_s0 = smov 60  }
  0x45   : > { %s10669_s5 = sshll.u32 %s7638_s9, 5  ;;  %s10782_s6 = smov 60  }
  0x46   : > { %s7428_s29 = smov 120   ;;  %s10790_s8 = smov 30  }
  0x47   : > { %v7610_v0 = vld [vmem:[%s10770_s3 + $0x10] sm:$0xff]  ;;  %v7615_v1 = vld [vmem:[%s10770_s3] sm:$0xff]  ;;  %v7620_v2 = vld [vmem:[%s10770_s3 + $0x18] sm:$0xff]  ;;  %s10796_s11 = sld [smem:[#allocation34_spill]]  ;;  %s10797_s1 = sld [smem:[#allocation30_spill]] }
  0x48   : > { %v910_v4 = vadd.s32 1, %v7610_v0  ;;  %v908_v5 = vadd.s32 1, %v7615_v1  ;;  %v911_v6 = vadd.s32 1, %v7620_v2  ;;  %v7631_v7 = vld [vmem:[%s10770_s3 + $0x8] sm:$0xff]  ;;  %v859_v10 = vadd.s32 4294967295, %v7615_v1  ;;  %s786_s7 = scalar_lea.vmem %s10771_s30, %s10669_s5  ;;  %s1002_s30 = sld [smem:[#allocation4]] }
  0x49   : > { %v909_v8 = vadd.s32 1, %v7631_v7  ;;  %v860_v9 = vadd.s32 4294967295, %v7631_v7  ;;  %v862_v11 = vadd.s32 4294967295, %v7620_v2  ;;  %v861_v14 = vadd.s32 4294967295, %v7610_v0  ;;  %v845_v18 = vld [vmem:[%s786_s7 + $0x8] sm:$0xff]  ;;  %v844_v20 = vld [vmem:[%s786_s7] sm:$0xff] }
  0x4a   : > { %vm914_vm0 = vcmp.ge.s32.totalorder %v910_v4, 0  ;;  %vm918_vm1 = vcmp.lt.s32.totalorder %v910_v4, 30  ;;  %vm912_vm2 = vcmp.ge.s32.totalorder %v908_v5, 0  ;;  %vm916_vm3 = vcmp.lt.s32.totalorder %v908_v5, 30  ;;  %v847_v21 = vld [vmem:[%s786_s7 + $0x18] sm:$0xff]  ;;  %v846_v22 = vld [vmem:[%s786_s7 + $0x10] sm:$0xff] }
  0x4b   : > { %vm922_vm4 = vmand %vm914_vm0, %vm918_vm1  ;;  %vm915_vm5 = vcmp.ge.s32.totalorder %v911_v6, 0  ;;  %vm919_vm6 = vcmp.lt.s32.totalorder %v911_v6, 30  ;;  %vm913_vm7 = vcmp.ge.s32.totalorder %v909_v8, 0  ;;  %vm917_vm8 = vcmp.lt.s32.totalorder %v909_v8, 30  ;;  %v990_v44 = vld [vmem:[%s10774_s27] sm:$0xff]  ;;  %v991_v45 = vld [vmem:[%s10774_s27 + $0x8] sm:$0xff] }
  0x4c   : > { %v926_v12 = vsel %vm922_vm4, 1, %v10686_v3  ;;  %vm920_vm9 = vmand %vm912_vm2, %vm916_vm3  ;;  %vm864_vm10 = vcmp.ge.s32.totalorder %v860_v9, 0  ;;  %vm868_vm11 = vcmp.lt.s32.totalorder %v860_v9, 30  ;;  %vm863_vm13 = vcmp.ge.s32.totalorder %v859_v10, 0  ;;  %v992_v46 = vld [vmem:[%s10774_s27 + $0x10] sm:$0xff]  ;;  %v993_v48 = vld [vmem:[%s10774_s27 + $0x18] sm:$0xff] }
  0x4d   : > { %935 = vperm.xlu1 %7350, %v926_v12   ;;  %v924_v13 = vsel %vm920_vm9, 1, %v10686_v3  ;;  %vm923_vm12 = vmand %vm915_vm5, %vm919_vm6  ;;  %vm867_vm14 = vcmp.lt.s32.totalorder %v859_v10, 30  ;;  %vm866_vm1 = vcmp.ge.s32.totalorder %v862_v11, 0  ;;  %vm870_vm2 = vcmp.lt.s32.totalorder %v862_v11, 30  ;;  %v994_v50 = vld [vmem:[%s10774_s27 + $0x20] sm:$0xff]  ;;  %v995_v51 = vld [vmem:[%s10774_s27 + $0x28] sm:$0xff] }
  0x4e   : > { %929 = vperm.xlu0 %7349, %v924_v13   ;;  %v927_v15 = vsel %vm923_vm12, 1, %v10686_v3  ;;  %vm921_vm15 = vmand %vm913_vm7, %vm917_vm8  ;;  %vm865_vm4 = vcmp.ge.s32.totalorder %v861_v14, 0  ;;  %vm869_vm5 = vcmp.lt.s32.totalorder %v861_v14, 30  ;;  %v900_v19 = vrot.slane %v845_v18, 1  ;;  %v996_v53 = vld [vmem:[%s10774_s27 + $0x30] sm:$0xff]  ;;  %v997_v54 = vld [vmem:[%s10774_s27 + $0x38] sm:$0xff] }
  0x4f   : > { %v925_v16 = vsel %vm921_vm15, 1, %v10686_v3  ;;  %vm872_vm0 = vmand %vm864_vm10, %vm868_vm11  ;;  %v899_v25 = vrot.slane %v844_v20, 1  ;;  %v902_v26 = vrot.slane %v847_v21, 1  ;;  %v901_v27 = vrot.slane %v846_v22, 1  ;;  %v998_v56 = vld [vmem:[%s10774_s27 + $0x40] sm:$0xff]  ;;  %v999_v57 = vld [vmem:[%s10774_s27 + $0x48] sm:$0xff] }
  0x50   : > { %vm7653_vm3 = vmand %vm863_vm13, %vm867_vm14  ;;  %v876_v24 = vsel %vm872_vm0, 1, %v10686_v3  ;;  %v849_v29 = vrot.slane %v845_v18, 7  ;;  %v848_v30 = vrot.slane %v844_v20, 7  ;;  %v851_v32 = vrot.slane %v847_v21, 7  ;;  %v1000_v59 = vld [vmem:[%s10774_s27 + $0x50] sm:$0xff]  ;;  %s7429_s7 = smov 90  }
  0x51   : > { %938 = vperm.xlu1 %7350, %v927_v15   ;;  %vm874_vm6 = vmand %vm866_vm1, %vm870_vm2  ;;  %v875_v28 = vsel %vm7653_vm3, 1, %v10686_v3  ;;  %v850_v34 = vrot.slane %v846_v22, 7  ;;  %vm10678_vm8 = vcmp.lt.s32.totalorder %v7661_v31, 7  ;;  %vm10679_vm9 = vcmp.lt.s32.totalorder %v7661_v31, 1  ;;  %v1001_v60 = vld [vmem:[%s10774_s27 + $0x58] sm:$0x3] }
  0x52   : > { %932 = vperm.xlu0 %7349, %v925_v16   ;;  %vm873_vm7 = vmand %vm865_vm4, %vm869_vm5  ;;  %v878_v33 = vsel %vm874_vm6, 1, %v10686_v3  ;;  %v906_v35 = vsel %vm10678_vm8, %v899_v25, %v900_v19  ;;  %v7672_v36 = vsel %vm10678_vm8, %v900_v19, %v901_v27  ;;  %v904_v37 = vsel %vm10678_vm8, %v901_v27, %v902_v26  ;;  %s10802_s12 = sld [smem:[#allocation35_spill]]  ;;  %s10803_s10 = sld [smem:[#allocation33_spill]] }
  0x53   : > { %v7678_v38 = vsel %vm10678_vm8, %v902_v26, %v899_v25  ;;  %v877_v39 = vsel %vm873_vm7, 1, %v10686_v3  ;;  %v7683_v40 = vsel %vm10679_vm9, %v848_v30, %v849_v29  ;;  %v7687_v41 = vsel %vm10679_vm9, %v851_v32, %v848_v30  ;;  %s9558_s4 = sld [smem:[#allocation2 + $0x2]] }
  0x54   : > { %v7691_v42 = vsel %vm10679_vm9, %v850_v34, %v851_v32  ;;  %v7695_v43 = vsel %vm10679_vm9, %v849_v29, %v850_v34  ;;  %v6584_v47 = vpack.c.bf16 %v991_v45, %v990_v44  ;;  %v6588_v49 = vpack.c.bf16 %v993_v48, %v992_v46 }
  0x55   : > { %883 = vperm.xlu1 %7350, %v876_v24   ;;  %v6592_v52 = vpack.c.bf16 %v995_v51, %v994_v50  ;;  %v6596_v55 = vpack.c.bf16 %v997_v54, %v996_v53  ;;  %v6600_v58 = vpack.c.bf16 %v999_v57, %v998_v56  ;;  %vm1017_vm10 = vcmask 1041408  }
  0x56   : > { %880 = vperm.xlu0 %7349, %v875_v28   ;;  %6585 = vmatprep.subr.bf16.mxu0 %v6584_v47  ;;  %v6604_v61 = vpack.c.bf16 %v1001_v60, %v1000_v59  ;;  %vm10672_vm11 = vmmov 1   ;;  %v1192_v63 = vadd.s32 2, %v7615_v1  ;;  %v1193_v6 = vadd.s32 2, %v7631_v7 }
  0x57   : > { %6587 = vmatpush3.bf16.msra.mxu0 %v6584_v47  ;;  %vm7738_vm12 = vmpackc.low %vm1017_vm10, %vm10672_vm11  ;;  %v1194_v9 = vadd.s32 2, %v7610_v0  ;;  %v1195_v13 = vadd.s32 2, %v7620_v2  ;;  %v1119_v15 = vadd.s32 4294967294, %v7615_v1  ;;  %v1120_v17 = vadd.s32 4294967294, %v7631_v7 }
  0x58   : > { %6589 = vmatprep.subr.bf16.mxu0 %v6588_v49  ;;  %vm1196_vm15 = vcmp.ge.s32.totalorder %v1192_v63, 0  ;;  %vm1200_vm0 = vcmp.lt.s32.totalorder %v1192_v63, 30  ;;  %vm1197_vm3 = vcmp.ge.s32.totalorder %v1193_v6, 0  ;;  %vm1201_vm4 = vcmp.lt.s32.totalorder %v1193_v6, 30 }
  0x59   : > { %889 = vperm.xlu1 %7350, %v878_v33   ;;  %vm1204_vm2 = vmand %vm1196_vm15, %vm1200_vm0  ;;  %vm1198_vm5 = vcmp.ge.s32.totalorder %v1194_v9, 0  ;;  %vm1202_vm6 = vcmp.lt.s32.totalorder %v1194_v9, 30  ;;  %vm1199_vm0 = vcmp.ge.s32.totalorder %v1195_v13, 0  ;;  %vm1203_vm11 = vcmp.lt.s32.totalorder %v1195_v13, 30  ;;  %p5177_p12 = scmp.gt.s32.totalorder %s9558_s4, 0 }
  0x5a   : > { %886 = vperm.xlu0 %7349, %v877_v39   ;;  %v1208_v16 = vsel %vm1204_vm2, 1, %v10686_v3  ;;  %vm1205_vm10 = vmand %vm1197_vm3, %vm1201_vm4  ;;  %v1121_v1 = vadd.s32 4294967294, %v7610_v0  ;;  %vm1124_vm4 = vcmp.ge.s32.totalorder %v1120_v17, 0  ;;  %v1122_v7 = vadd.s32 4294967294, %v7620_v2 }
  0x5b   : > { %6591 = vmatpush3.bf16.msra.mxu0 %v6588_v49  ;;  %vm1206_vm15 = vmand %vm1198_vm5, %vm1202_vm6  ;;  %v1209_v19 = vsel %vm1205_vm10, 1, %v10686_v3  ;;  %vm1128_vm5 = vcmp.lt.s32.totalorder %v1120_v17, 30  ;;  %v10704_v53 = vmov 0.0|0.0  }
  0x5c   : > { %6593 = vmatprep.subr.bf16.mxu0 %v6592_v52  ;;  %vm1207_vm2 = vmand %vm1199_vm0, %vm1203_vm11  ;;  %vm1125_vm6 = vcmp.ge.s32.totalorder %v1121_v1, 0  ;;  %vm1126_vm9 = vcmp.ge.s32.totalorder %v1122_v7, 0  ;;  %vm1130_vm10 = vcmp.lt.s32.totalorder %v1122_v7, 30 }
  0x5d   : > { %954 = vrot.lane.b32.xlu1 %v845_v18, %s10670_s26  ;;  %vm1134_vm11 = vmand %vm1126_vm9, %vm1130_vm10  ;;  %vm10724_vm9 = vcmask 490496   ;;  %vm10785_vm10 = vcmp.lt.s32.totalorder %v7661_v31, 7 }
  0x5e   : > { %952 = vrot.lane.b32.xlu0 %v844_v20, %s10670_s26  ;;  %v1210_v20 = vsel %vm1206_vm15, 1, %v10686_v3  ;;  %v1138_v2 = vsel %vm1134_vm11, 1, %v10686_v3  ;;  %vm10786_vm11 = vmmov %vm10785_vm10 }
  0x5f   : > { %6595 = vmatpush3.bf16.msra.mxu0 %v6592_v52 }
  0x60   : > { %6597 = vmatprep.subr.bf16.mxu0 %v6596_v55 }
  0x61   : > { %958 = vrot.lane.b32.xlu1 %v847_v21, %s10670_s26  ;;  %v1211_v21 = vsel %vm1207_vm2, 1, %v10686_v3  ;;  %vm1187_vm2 = vcmp.lt.s32.totalorder %v7661_v31, 6 }
  0x62   : > { %956 = vrot.lane.b32.xlu0 %v846_v22, %s10670_s26  ;;  %s10781_s26 = sld [smem:[#allocation29_spill]] }
  0x63   : > { %6599 = vmatpush3.bf16.msra.mxu0 %v6596_v55 }
  0x64   : > { %6601 = vmatprep.subr.bf16.mxu0 %v6600_v58 }
  0x67   : > { %6603 = vmatpush3.bf16.msra.mxu0 %v6600_v58 }
  0x68   : > { %6606 = vmatprep.subr.msk.bf16.mxu0 %vm7738_vm12, %v6604_v61  ;;  %v1314_v50 = vld [vmem:[%s10781_s26 + $0x8] sm:$0xff]  ;;  %v1317_v51 = vld [vmem:[%s10781_s26 + $0x20] sm:$0xff]  ;;  %v1316_v54 = vld [vmem:[%s10781_s26 + $0x18] sm:$0xff] }
  0x69   : > { %v6610_v52 = vpack.c.bf16 %v1317_v51, %v1314_v50  ;;  %v1315_v55 = vld [vmem:[%s10781_s26 + $0x10] sm:$0xff]  ;;  %v1318_v56 = vld [vmem:[%s10781_s26 + $0x28] sm:$0xff]  ;;  %v1320_v59 = vld [vmem:[%s10781_s26 + $0x38] sm:$0xff] }
  0x6a   : > { %v6647_v58 = vpack.c.bf16 %v1318_v56, %v1315_v55  ;;  %v1323_v60 = vld [vmem:[%s10781_s26 + $0x50] sm:$0xff]  ;;  %v1322_v6 = vld [vmem:[%s10781_s26 + $0x48] sm:$0xff]  ;;  %v1324_v9 = vld [vmem:[%s10781_s26 + $0x58] sm:$0xff] }
  0x6b   : > { %6609 = vmatpush3.bf16.msk.msra.mxu0 %vm7738_vm12, %v6604_v61  ;;  %v1319_v61 = vld [vmem:[%s10781_s26 + $0x30] sm:$0xff]  ;;  %6611 = vmatprep.subr.bf16.mxu1 %v6610_v52  ;;  %v6614_v63 = vpack.c.bf16 %v1323_v60, %v1320_v59  ;;  %v1353_v52 = vld [vmem:[%s10781_s26 + $0x140] sm:$0xff]  ;;  %v1352_v56 = vld [vmem:[%s10781_s26 + $0x138] sm:$0xff]  ;;  %v1003_v60 = vstv %s1002_s30  ;;  %s10794_s30 = sld [smem:[#allocation32_spill]] }
  0x6c   : > { %6646 = vmatprep.subr.bf16.mxu0 %v10704_v53  ;;  %v1335_v7 = vld [vmem:[%s10781_s26 + $0xb0] sm:$0xff]  ;;  %v1349_v55 = vld [vmem:[%s10781_s26 + $0x120] sm:$0xff]  ;;  %v1354_v59 = vld [vmem:[%s10781_s26 + $0x148] sm:$0xff] }
  0xcc   : > { %v7747_v4 = vpop.permute.xlu1 %935 }
  0xcd   : > { %10777 = vst [vmem:[#allocation9_spill] sm:$0xff] %v7747_v4  ;;  %v7749_v5 = vpop.permute.xlu0 %929  ;;  %vm10674_vm13 = vcmp.eq.s32.totalorder %v7747_v4, 1 }
  0xce   : > { %vm10676_vm14 = vcmp.eq.s32.totalorder %v7749_v5, 1  ;;  %v946_v12 = vsel %vm10674_vm13, %v904_v37, 0.0  ;;  %vm1123_vm13 = vcmp.ge.s32.totalorder %v1119_v15, 0 }
  0xcf   : > { %v944_v8 = vsel %vm10676_vm14, %v906_v35, 0.0  ;;  %vm1129_vm14 = vcmp.lt.s32.totalorder %v1121_v1, 30  ;;  %v1327_v1 = vld [vmem:[%s10781_s26 + $0x70] sm:$0xff] }
  0xd0   : > { %968 = vrot.lane.b32.xlu0 %v944_v8, %s10680_s0  ;;  %v7758_v10 = vpop.permute.xlu1 %938  ;;  %vm1133_vm8 = vmand %vm1125_vm6, %vm1129_vm14  ;;  %vm10723_vm14 = vcmask 736256   ;;  %v1321_v8 = vld [vmem:[%s10781_s26 + $0x40] sm:$0xff] }
  0xd1   : > { %10778 = vst [vmem:[#allocation10_spill] sm:$0xff] %v7758_v10  ;;  %v7760_v11 = vpop.permute.xlu0 %932  ;;  %vm10677_vm7 = vcmp.eq.s32.totalorder %v7758_v10, 1  ;;  %v1137_v23 = vsel %vm1133_vm8, 1, %v10686_v3  ;;  %vm10725_vm8 = vcmask 244736   ;;  %v6650_v13 = vpack.c.bf16 %v1324_v9, %v1321_v8  ;;  %v1355_v8 = vld [vmem:[%s10781_s26 + $0x150] sm:$0xff] }
  0xd2   : > { %vm10675_vm1 = vcmp.eq.s32.totalorder %v7760_v11, 1  ;;  %v947_v18 = vsel %vm10677_vm7, %v7678_v38, 0.0  ;;  %vm1132_vm7 = vmand %vm1124_vm4, %vm1128_vm5  ;;  %vm10783_vm5 = vcmp.lt.s32.totalorder %v7661_v31, 1 }
  0xd3   : > { %v945_v14 = vsel %vm10675_vm1, %v7672_v36, 0.0  ;;  %vm1127_vm1 = vcmp.lt.s32.totalorder %v1119_v15, 30  ;;  %v1136_v22 = vsel %vm1132_vm7, 1, %v10686_v3  ;;  %v1329_v15 = vld [vmem:[%s10781_s26 + $0x80] sm:$0xff]  ;;  %vm10784_vm6 = vmmov %vm10783_vm5 }
  0xd4   : > { %970 = vrot.lane.b32.xlu1 %v945_v14, %s10680_s0  ;;  %972 = vrot.lane.b32.xlu0 %v946_v12, %s10680_s0  ;;  %vm1131_vm3 = vmand %vm1123_vm13, %vm1127_vm1  ;;  %v7790_v25 = vpop.permute.xlu1 %883  ;;  %v6616_v12 = vpack.c.bf16 %v1322_v6, %v1319_v61  ;;  %v1326_v14 = vld [vmem:[%s10781_s26 + $0x68] sm:$0xff]  ;;  %v1359_v6 = vld [vmem:[%s10781_s26 + $0x170] sm:$0xff] }
  0xd5   : > { %v1135_v0 = vsel %vm1131_vm3, 1, %v10686_v3  ;;  %v7788_v24 = vpop.permute.xlu0 %880  ;;  %vm10722_vm1 = vcmp.eq.s32.totalorder %v7790_v25, 1  ;;  %v6618_v17 = vpack.c.bf16 %v1329_v15, %v1326_v14  ;;  %v1360_v14 = vld [vmem:[%s10781_s26 + $0x178] sm:$0xff]  ;;  %vm1114_vm3 = vcmp.lt.s32.totalorder %v7661_v31, 2 }
  0xd6   : > { %vm10726_vm13 = vcmp.eq.s32.totalorder %v7788_v24, 1  ;;  %v896_v37 = vsel %vm10722_vm1, %v7683_v40, 0.0 }
  0xd7   : > { %v895_v32 = vsel %vm10726_vm13, %v7687_v41, 0.0 }
  0xd8   : > { %974 = vrot.lane.b32.xlu1 %v947_v18, %s10680_s0  ;;  %1213 = vperm.xlu0 %7349, %v1208_v16   ;;  %v7794_v27 = vpop.permute.xlu1 %889  ;;  %v1325_v16 = vld [vmem:[%s10781_s26 + $0x60] sm:$0xff]  ;;  %v1328_v18 = vld [vmem:[%s10781_s26 + $0x78] sm:$0xff] }
  0xd9   : > { %v7792_v26 = vpop.permute.xlu0 %886  ;;  %10780 = vst [vmem:[#allocation12_spill] sm:$0xff] %v7794_v27  ;;  %vm10720_vm15 = vcmp.eq.s32.totalorder %v7794_v27, 1 }
  0xda   : > { %10779 = vst [vmem:[#allocation11_spill] sm:$0xff] %v7792_v26  ;;  %vm10721_vm7 = vcmp.eq.s32.totalorder %v7792_v26, 1  ;;  %v898_v40 = vsel %vm10720_vm15, %v7691_v42, 0.0  ;;  %v1313_v42 = vld [vmem:[%s10781_s26] sm:$0xff] }
  0xdb   : > { %v897_v38 = vsel %vm10721_vm7, %v7695_v43, 0.0  ;;  %v6612_v57 = vpack.c.bf16 %v1316_v54, %v1313_v42  ;;  %v1350_v42 = vld [vmem:[%s10781_s26 + $0x128] sm:$0xff] }
  0xdc   : > { %1216 = vperm.xlu1 %7350, %v1209_v19   ;;  %1219 = vperm.xlu0 %7349, %v1210_v20   ;;  %v955_v29 = vpop.permute.xlu1 %954  ;;  %v1330_v19 = vld [vmem:[%s10781_s26 + $0x88] sm:$0xff]  ;;  %v1332_v20 = vld [vmem:[%s10781_s26 + $0x98] sm:$0xff]  ;;  %v6634_v54 = vpack.c.bf16 %v1353_v52, %v1350_v42 }
  0xdd   : > { %v953_v28 = vpop.permute.xlu0 %952  ;;  %v982_v39 = vsel %vm10725_vm8, %v896_v37, %v955_v29  ;;  %6613 = vmatpush1.bf16.msra.mxu1 %v6612_v57  ;;  %v1336_v29 = vld [vmem:[%s10781_s26 + $0xb8] sm:$0xff]  ;;  %v6636_v57 = vpack.c.bf16 %v1352_v56, %v1349_v55 }
  0xde   : > { %v981_v33 = vsel %vm10725_vm8, %v895_v32, %v953_v28  ;;  %6615 = vmatprep.subr.bf16.mxu1 %v6614_v63  ;;  %v1333_v28 = vld [vmem:[%s10781_s26 + $0xa0] sm:$0xff]  ;;  %v1340_v37 = vld [vmem:[%s10781_s26 + $0xd8] sm:$0xff] }
  0xdf   : > { %v1341_v32 = vld [vmem:[%s10781_s26 + $0xe0] sm:$0xff]  ;;  %v1356_v63 = vld [vmem:[%s10781_s26 + $0x158] sm:$0xff] }
  0xe0   : > { %1222 = vperm.xlu1 %7350, %v1211_v21   ;;  %1140 = vperm.xlu0 %7349, %v1135_v0   ;;  %v959_v34 = vpop.permute.xlu1 %958  ;;  %v6620_v21 = vpack.c.bf16 %v1328_v18, %v1325_v16  ;;  %v6653_v0 = vpack.c.bf16 %v1330_v19, %v1327_v1  ;;  %v6638_v9 = vpack.c.bf16 %v1359_v6, %v1356_v63 }
  0xe1   : > { %v957_v30 = vpop.permute.xlu0 %956  ;;  %v984_v43 = vsel %vm10725_vm8, %v898_v40, %v959_v34  ;;  %6617 = vmatpush1.bf16.msra.mxu1 %v6616_v12  ;;  %v6656_v34 = vpack.c.bf16 %v1336_v29, %v1333_v28  ;;  %v1358_v12 = vld [vmem:[%s10781_s26 + $0x168] sm:$0xff] }
  0xe2   : > { %v983_v41 = vsel %vm10725_vm8, %v897_v38, %v957_v30  ;;  %6619 = vmatprep.subr.bf16.mxu1 %v6618_v17  ;;  %v1338_v30 = vld [vmem:[%s10781_s26 + $0xc8] sm:$0xff]  ;;  %v1339_v38 = vld [vmem:[%s10781_s26 + $0xd0] sm:$0xff]  ;;  %v6640_v16 = vpack.c.bf16 %v1358_v12, %v1355_v8 }
  0xe4   : > { %1143 = vperm.xlu1 %7350, %v1136_v22   ;;  %1146 = vperm.xlu0 %7349, %v1137_v23   ;;  %v1331_v22 = vld [vmem:[%s10781_s26 + $0x90] sm:$0xff]  ;;  %v6622_v23 = vpack.c.bf16 %v1335_v7, %v1332_v20 }
  0xe5   : > { %6621 = vmatpush1.bf16.msra.mxu1 %v6620_v21 }
  0xe6   : > { %6623 = vmatprep.subr.bf16.mxu1 %v6622_v23 }
  0xe8   : > { %1149 = vperm.xlu0 %7349, %v1138_v2   ;;  %v1334_v2 = vld [vmem:[%s10781_s26 + $0xa8] sm:$0xff] }
 0x142   : > { %v969_v35 = vpop.permute.xlu0 %968 }
 0x143   : > { %v986_v36 = vsel %vm10724_vm9, %v981_v33, %v969_v35  ;;  %v6624_v33 = vpack.c.bf16 %v1334_v2, %v1331_v22  ;;  %v1337_v35 = vld [vmem:[%s10781_s26 + $0xc0] sm:$0xff] }
 0x144   : > { %6451 = vmatprep.mubr.msk.f32.mxu0 %vm10723_vm14, %v986_v36  ;;  %v6626_v36 = vpack.c.bf16 %v1341_v32, %v1338_v30  ;;  %v1362_v30 = vld [vmem:[%s10781_s26 + $0x188] sm:$0xff]  ;;  %v1365_v32 = vld [vmem:[%s10781_s26 + $0x1a0] sm:$0xff] }
 0x145   : > { %6625 = vmatpush1.bf16.msra.mxu1 %v6624_v33 }
 0x146   : > { %v971_v44 = vpop.permute.xlu1 %970  ;;  %v973_v45 = vpop.permute.xlu0 %972  ;;  %6627 = vmatprep.subr.bf16.mxu1 %v6626_v36 }
 0x147   : > { %v987_v46 = vsel %vm10724_vm9, %v982_v39, %v971_v44  ;;  %v988_v47 = vsel %vm10724_vm9, %v983_v41, %v973_v45  ;;  %v1342_v39 = vld [vmem:[%s10781_s26 + $0xe8] sm:$0xff]  ;;  %v1344_v41 = vld [vmem:[%s10781_s26 + $0xf8] sm:$0xff]  ;;  %v1347_v44 = vld [vmem:[%s10781_s26 + $0x110] sm:$0xff]  ;;  %v6628_v45 = vpack.c.bf16 %v1340_v37, %v1337_v35 }
 0x148   : > { %6452 = vmatmul.mubr.msk.f32.vlgmr.msra.gmra.mrb[0].mxu0 %vm10723_vm14, %v987_v46  ;;  %v6659_v46 = vpack.c.bf16 %v1342_v39, %v1339_v38  ;;  %v6630_v40 = vpack.c.bf16 %v1347_v44, %v1344_v41 }
 0x149   : > { %6454 = vmatprep.mubr.msk.f32.mxu0 %vm10723_vm14, %v988_v47  ;;  %6648 = vmatpush1.bf16.msra.mxu0 %v6647_v58  ;;  %v1343_v47 = vld [vmem:[%s10781_s26 + $0xf0] sm:$0xff] }
 0x14a   : > { %v975_v48 = vpop.permute.xlu1 %974  ;;  %6649 = vmatprep.subr.bf16.mxu0 %v10704_v53  ;;  %6629 = vmatpush1.bf16.msra.mxu1 %v6628_v45  ;;  %v1351_v58 = vld [vmem:[%s10781_s26 + $0x130] sm:$0xff] }
 0x14b   : > { %v989_v49 = vsel %vm10724_vm9, %v984_v43, %v975_v48  ;;  %v1346_v43 = vld [vmem:[%s10781_s26 + $0x108] sm:$0xff]  ;;  %v1345_v48 = vld [vmem:[%s10781_s26 + $0x100] sm:$0xff]  ;;  %6631 = vmatprep.subr.bf16.mxu1 %v6630_v40  ;;  %v6665_v61 = vpack.c.bf16 %v1354_v59, %v1351_v58  ;;  %v6642_v40 = vpack.c.bf16 %v1365_v32, %v1362_v30 }
 0x14c   : > { %6455 = vmatmul.mubr.msk.f32.gmra.mrb[2].mxu0 %vm10723_vm14, %v989_v49  ;;  %v1348_v49 = vld [vmem:[%s10781_s26 + $0x118] sm:$0xff]  ;;  %v6632_v50 = vpack.c.bf16 %v1346_v43, %v1343_v47 }
 0x14d   : > { %6651 = vmatpush1.bf16.msra.mxu0 %v6650_v13  ;;  %v6662_v51 = vpack.c.bf16 %v1348_v49, %v1345_v48  ;;  %v1357_v13 = vld [vmem:[%s10781_s26 + $0x160] sm:$0xff] }
 0x14e   : > { %6652 = vmatprep.subr.bf16.mxu0 %v10704_v53  ;;  %6633 = vmatpush1.bf16.msra.mxu1 %v6632_v50  ;;  %v6668_v17 = vpack.c.bf16 %v1360_v14, %v1357_v13 }
 0x14f   : > { %6635 = vmatprep.subr.bf16.mxu1 %v6634_v54 }
 0x151   : > { %6654 = vmatpush1.bf16.msra.mxu0 %v6653_v0 }
 0x152   : > { %6655 = vmatprep.subr.bf16.mxu0 %v10704_v53  ;;  %6637 = vmatpush1.bf16.msra.mxu1 %v6636_v57 }
 0x153   : > { %6639 = vmatprep.subr.bf16.mxu1 %v6638_v9 }
 0x155   : > { %6657 = vmatpush1.bf16.msra.mxu0 %v6656_v34 }
 0x156   : > { %6658 = vmatprep.subr.bf16.mxu0 %v10704_v53  ;;  %6641 = vmatpush1.bf16.msra.mxu1 %v6640_v16  ;;  %v1361_v16 = vld [vmem:[%s10781_s26 + $0x180] sm:$0xff] }
 0x157   : > { %v1214_v18 = vpop.permute.xlu0 %1213  ;;  %6643 = vmatprep.subr.bf16.mxu1 %v6642_v40 }
 0x158   : > { %vm1224_vm0 = vcmp.eq.s32.totalorder %v1214_v18, 1 }
 0x159   : > { %6660 = vmatpush1.bf16.msra.mxu0 %v6659_v46 }
 0x15a   : > { %6661 = vmatprep.subr.bf16.mxu0 %v10704_v53 }
 0x15b   : > { %v1217_v33 = vpop.permute.xlu1 %1216  ;;  %v1220_v18 = vpop.permute.xlu0 %1219 }
 0x15c   : > { %vm1225_vm4 = vcmp.eq.s32.totalorder %v1217_v33, 1 }
 0x15d   : > { %6663 = vmatpush1.bf16.msra.mxu0 %v6662_v51 }
 0x15e   : > { %6664 = vmatprep.subr.bf16.mxu0 %v10704_v53 }
 0x15f   : > { %v1223_v40 = vpop.permute.xlu1 %1222 }
 0x161   : > { %6666 = vmatpush1.bf16.msra.mxu0 %v6665_v61 }
 0x162   : > { %6667 = vmatprep.subr.bf16.mxu0 %v10704_v53 }
 0x165   : > { %6669 = vmatpush1.bf16.msra.mxu0 %v6668_v17  ;;  %v1364_v17 = vld [vmem:[%s10781_s26 + $0x198] sm:$0xff] }
 0x166   : > { %6670 = vmatprep.subr.bf16.mxu0 %v10704_v53  ;;  %v6644_v32 = vpack.c.bf16 %v1364_v17, %v1361_v16 }
 0x168   : > { %6645 = vmatpush1.bf16.msra.mxu1 %v6644_v32 }
 0x21b   : > { %v6453_v15 = vpop.f32.mrb[0].mxu0 }
 0x21c   : > { %v1093_v1 = vadd.f32 %v6453_v15, %v1003_v60  ;;  %v1087_v19 = vpop.f32.mrb[1].mxu0 }
 0x21d   : > { %v1088_v20 = vadd.f32 %v1087_v19, %v1003_v60 }
 0x21e   : > { %v7976_v7 = vmax.f32 %v1093_v1, 0.0 }
 0x21f   : > { %v7978_v21 = vmax.f32 %v1088_v20, 0.0  ;;  %v6456_v0 = vpop.f32.mrb[2].mxu0 }
 0x220   : > { %v1111_v22 = vrot.slane %v7976_v7, 6  ;;  %v1103_v23 = vadd.f32 %v6456_v0, %v1003_v60  ;;  %v1097_v2 = vpop.f32.mrb[3].mxu0  ;;  %v1184_v28 = vrot.slane %v7976_v7, 2  ;;  %v1160_v29 = vrot.slane %v7976_v7, 7  ;;  %v1363_v0 = vld [vmem:[%s10781_s26 + $0x190] sm:$0xff] }
 0x221   : > { %v1110_v34 = vrot.slane %v7978_v21, 6  ;;  %v1098_v35 = vadd.f32 %v1097_v2, %v1003_v60  ;;  %v7351_v36 = vpack.i.bf16 %v7976_v7, %v7978_v21  ;;  %v1183_v37 = vrot.slane %v7978_v21, 2 }
 0x222   : > { %v7996_v38 = vmax.f32 %v1103_v23, 0.0  ;;  %v1159_v39 = vrot.slane %v7978_v21, 7  ;;  %v1171_v41 = vrot.slane %v7978_v21, 1  ;;  %v1172_v44 = vrot.slane %v7976_v7, 1  ;;  %v1366_v23 = vld [vmem:[%s10781_s26 + $0x1a8] sm:$0xff] }
 0x223   : > { %v1108_v45 = vmax.f32 %v1098_v35, 0.0  ;;  %7352 = vrot.lane.b32.xlu0 %v7351_v36, %s10782_s6  ;;  %v1190_v46 = vsel %vm1187_vm2, %v1183_v37, %v1184_v28  ;;  %v8008_v47 = vsel %vm1114_vm3, %v1110_v34, %v1111_v22  ;;  %v6671_v33 = vpack.c.bf16 %v1366_v23, %v1363_v0  ;;  %v1368_v35 = vld [vmem:[%s10781_s26 + $0x1b8] sm:$0x3f]  ;;  %v1369_v7 = vld [vmem:[%s10781_s26 + $0x1c0] sm:$0x3f] }
 0x224   : > { %v1228_v43 = vsel %vm1224_vm0, %v1190_v46, 0.0  ;;  %v1162_v48 = vrot.slane %v7996_v38, 7  ;;  %v1165_v49 = vsel %vm10783_vm5, %v1159_v39, %v1160_v29  ;;  %v1113_v50 = vrot.slane %v7996_v38, 6 }
 0x225   : > { %v1112_v51 = vrot.slane %v1108_v45, 6  ;;  %1284 = vrot.lane.b32.xlu1 %v1228_v43, %s7428_s29  ;;  %v1185_v42 = vrot.slane %v1108_v45, 2  ;;  %v1173_v52 = vrot.slane %v1108_v45, 1  ;;  %v1177_v55 = vsel %vm10785_vm10, %v1171_v41, %v1172_v44  ;;  %vm10789_vm10 = vmmov %vm10784_vm6  ;;  %6672 = vmatpush1.bf16.msra.mxu0 %v6671_v33 }
 0x226   : > { %v1166_v54 = vsel %vm10784_vm6, %v1162_v48, %v1159_v39  ;;  %v1186_v56 = vrot.slane %v7996_v38, 2  ;;  %v1161_v57 = vrot.slane %v1108_v45, 7  ;;  %v1168_v59 = vsel %vm10722_vm1, %v1165_v49, 0.0  ;;  %v1367_v39 = vld [vmem:[%s10781_s26 + $0x1b0] sm:$0x3f]  ;;  %s10817_s26 = sld [smem:[#allocation25_spill]] }
 0x227   : > { %1256 = vrot.lane.b32.xlu0 %v1108_v45, %s10782_s6  ;;  %v1167_v58 = vsel %vm10726_vm13, %v1166_v54, 0.0  ;;  %v1189_v60 = vsel %vm1187_vm2, %v1184_v28, %v1185_v42  ;;  %v1176_v61 = vsel %vm10786_vm11, %v1172_v44, %v1173_v52  ;;  %vm10787_vm0 = vcmp.eq.s32.totalorder %v7749_v5, 1  ;;  %v5861_v44 = vld [vmem:[%s10794_s30 + $0x40] sm:$0xff]  }
 0x228   : > { %v7356_v63 = vpack.i.bf16 %v1168_v59, %v1167_v58  ;;  %v1179_v6 = vsel %vm10787_vm0, %v1177_v55, 0.0  ;;  %vm10788_vm5 = vcmp.eq.s32.totalorder %v7760_v11, 1  ;;  %v1188_v9 = vsel %vm1187_vm2, %v1185_v42, %v1186_v56  ;;  %v5869_v45 = vld [vmem:[%s10794_s30 + $0x80] sm:$0xff]  }
 0x229   : > { %v1180_v8 = vsel %vm10788_vm5, %v1176_v61, 0.0  ;;  %v1229_v12 = vsel %vm1225_vm4, %v1189_v60, 0.0  ;;  %v1163_v14 = vsel %vm10784_vm6, %v1161_v57, %v1162_v48  ;;  %v1164_v15 = vsel %vm10789_vm10, %v1160_v29, %v1161_v57  ;;  %vm10791_vm4 = vmmov %vm10786_vm11  ;;  %v1141_v48 = vpop.permute.xlu0 %1140 }
 0x22a   : > { %v7361_v13 = vpack.i.bf16 %v1180_v8, %v1179_v6  ;;  %7357 = vrot.lane.b32.xlu1 %v7356_v63, %s10790_s8  ;;  %v1169_v1 = vsel %vm10721_vm7, %v1164_v15, 0.0  ;;  %v1170_v19 = vsel %vm10720_vm15, %v1163_v14, 0.0  ;;  %v1174_v20 = vrot.slane %v7996_v38, 1  ;;  %vm10792_vm11 = vmmov %vm10791_vm4 }
 0x22b   : > { %v1191_v21 = vsel %vm1187_vm2, %v1186_v56, %v1183_v37  ;;  %1286 = vrot.lane.b32.xlu0 %v1229_v12, %s7428_s29  ;;  %v7366_v2 = vpack.i.bf16 %v1170_v19, %v1169_v1  ;;  %v1118_v28 = vsel %vm1114_vm3, %v1113_v50, %v1110_v34  ;;  %vm1226_vm2 = vcmp.eq.s32.totalorder %v1220_v18, 1  ;;  %v5862_v19 = vld [vmem:[%s10794_s30 + $0x48] sm:$0xff]  }
 0x22c   : > { %v1178_v29 = vsel %vm10791_vm4, %v1174_v20, %v1171_v41  ;;  %v1175_v30 = vsel %vm10792_vm11, %v1173_v52, %v1174_v20  ;;  %vm1396_vm0 = vcmask 1045504   ;;  %v1230_v36 = vsel %vm1226_vm2, %v1188_v9, 0.0  ;;  %v5870_v20 = vld [vmem:[%s10794_s30 + $0x88] sm:$0xff]  }
 0x22d   : > { %v8075_v34 = vsel %vm1114_vm3, %v1111_v22, %v1112_v51  ;;  %v8079_v37 = vsel %vm1114_vm3, %v1112_v51, %v1113_v50  ;;  %5357 = vmatprep.subr.msk.mxu1 %vm1396_vm0, %v1368_v35  ;;  %v10702_v41 = vmov 0.0   ;;  %vm10793_vm3 = vcmp.eq.s32.totalorder %v7758_v10, 1  ;;  %v1147_v49 = vpop.permute.xlu0 %1146  ;;  %v1144_v50 = vpop.permute.xlu1 %1143  ;;  %v5863_v35 = vld [vmem:[%s10794_s30 + $0x50] sm:$0xff]  }
 0x22e   : > { %7362 = vrot.lane.b32.xlu1 %v7361_v13, %s7429_s7  ;;  %1531 = vmatprep.subr.mxu0 %v10702_v41  ;;  %v1182_v22 = vsel %vm10793_vm3, %v1178_v29, 0.0  ;;  %vm10795_vm5 = vcmp.eq.s32.totalorder %v7747_v4, 1  ;;  %vm1227_vm6 = vcmp.eq.s32.totalorder %v1223_v40, 1  ;;  %vm1387_vm10 = vcmask 179200  }
 0x22f   : > { %1288 = vrot.lane.b32.xlu0 %v1230_v36, %s7428_s29  ;;  %5358 = vmatpush1.msk.msra.mxu1 %vm1396_vm0, %v1367_v39  ;;  %v1181_v46 = vsel %vm10795_vm5, %v1175_v30, 0.0  ;;  %v1231_v43 = vsel %vm1227_vm6, %v1191_v21, 0.0  ;;  %vm1151_vm4 = vcmp.eq.s32.totalorder %v1141_v48, 1  ;;  %vm1152_vm11 = vcmp.eq.s32.totalorder %v1144_v50, 1  ;;  %v5854_v30 = vld [vmem:[%s10794_s30 + $0x8] sm:$0xff]   ;;  %v5871_v36 = vld [vmem:[%s10794_s30 + $0x90] sm:$0xff]  }
 0x230   : > { %5363 = vmatpush1.msk.msra.mxu0 %vm1396_vm0, %v1369_v7  ;;  %6674 = vmatprep.subr.bf16.mxu1 %v5861_v44  ;;  %v1155_v57 = vsel %vm1151_vm4, %v1118_v28, 0.0  ;;  %v1156_v60 = vsel %vm1152_vm11, %v8008_v47, 0.0  ;;  %vm1308_vm2 = vcmask 982016   ;;  %v5543_v47 = vld [vmem:[%s10794_s30] sm:$0xff]   ;;  %vm1153_vm3 = vcmp.eq.s32.totalorder %v1147_v49, 1  ;;  %v5855_v44 = vld [vmem:[%s10794_s30 + $0x10] sm:$0xff]  }
 0x231   : > { %6706 = vmatprep.subr.bf16.mxu0 %v5869_v45  ;;  %v1150_v51 = vpop.permute.xlu0 %1149  ;;  %v1157_v21 = vsel %vm1153_vm3, %v8075_v34, 0.0  ;;  %v5856_v49 = vld [vmem:[%s10794_s30 + $0x18] sm:$0xff]   ;;  %vm1706_vm6 = vcmask 850944   ;;  %vm10719_vm11 = vcmask 1043456   ;;  %vm2907_vm3 = vcmask 261120  }
 0x232   : > { %7367 = vrot.lane.b32.xlu1 %v7366_v2, %s10790_s8  ;;  %vm1154_vm5 = vcmp.eq.s32.totalorder %v1150_v51, 1  ;;  %v5865_v51 = vld [vmem:[%s10794_s30 + $0x60] sm:$0xff]   ;;  %vm10858_vm15 = vcmp.eq.s32.totalorder %v7749_v5, 1  ;;  %vm10874_vm13 = vcmp.lt.s32.totalorder %v7661_v31, 1 }
 0x233   : > { %1274 = vrot.lane.b32.xlu0 %v1182_v22, %s7429_s7  ;;  %v1158_v34 = vsel %vm1154_vm5, %v8079_v37, 0.0  ;;  %v5864_v37 = vld [vmem:[%s10794_s30 + $0x58] sm:$0xff]   ;;  %vm3088_vm5 = vcmask 523264  }
 0x236   : > { %1272 = vrot.lane.b32.xlu1 %v1181_v46, %s7429_s7  ;;  %v5872_v46 = vld [vmem:[%s10794_s30 + $0x98] sm:$0xff]   ;;  %s10798_s7 = sld [smem:[#allocation31_spill]] }
 0x23a   : > { %1258 = vrot.lane.b32.xlu1 %v7996_v38, %s10782_s6 }
 0x23e   : > { %1290 = vrot.lane.b32.xlu1 %v1231_v43, %s7428_s29  ;;  %s9560_s29 = sld [smem:[#allocation2 + $0x3]] }
 0x295   : > { %v7353_v42 = vpop.permute.xlu0 %7352 }
 0x296   : > { %v7354_v59 = vunpack.i.l.bf16 %v7353_v42  ;;  %v7355_v9 = vunpack.i.h.bf16 %v7353_v42  ;;  %v5857_v42 = vld [vmem:[%s10794_s30 + $0x20] sm:$0xff]  }
 0x297   : > { %v1285_v52 = vpop.permute.xlu1 %1284 }
 0x298   : > { %5359 = vmatprep.mubr.msk.f32.mxu1 %vm1387_vm10, %v1285_v52  ;;  %5364 = vmatprep.mubr.msk.f32.mxu0 %vm1387_vm10, %v1285_v52 }
 0x299   : > { %v1257_v55 = vpop.permute.xlu0 %1256 }
 0x29c   : > { %v7358_v54 = vpop.permute.xlu1 %7357 }
 0x29d   : > { %v7360_v56 = vunpack.i.h.bf16 %v7358_v54  ;;  %v7359_v38 = vunpack.i.l.bf16 %v7358_v54  ;;  %v1287_v13 = vpop.permute.xlu0 %1286  ;;  %v5858_v54 = vld [vmem:[%s10794_s30 + $0x28] sm:$0xff]  }
 0x29f   : > { %v1296_v58 = vsel %vm10725_vm8, %v1155_v57, %v7359_v38  ;;  %v1297_v63 = vsel %vm10725_vm8, %v1156_v60, %v7360_v56  ;;  %v5873_v56 = vld [vmem:[%s10794_s30 + $0xa0] sm:$0xff]   ;;  %v5859_v38 = vld [vmem:[%s10794_s30 + $0x30] sm:$0xff]   ;;  %v5868_v57 = vld [vmem:[%s10794_s30 + $0x78] sm:$0xff]  }
 0x2a0   : > { %v7363_v61 = vpop.permute.xlu1 %7362  ;;  %v1300_v12 = vsel %vm10724_vm9, %v1296_v58, %v7354_v59  ;;  %v1301_v17 = vsel %vm10724_vm9, %v1297_v63, %v7355_v9  ;;  %v5874_v58 = vld [vmem:[%s10794_s30 + $0xa8] sm:$0xff]   ;;  %v5860_v59 = vld [vmem:[%s10794_s30 + $0x38] sm:$0xff]   ;;  %v1660_v60 = vld [vmem:[%s10794_s30 + $0xb0] sm:$0xf] }
 0x2a1   : > { %v7365_v6 = vunpack.i.h.bf16 %v7363_v61  ;;  %v7364_v8 = vunpack.i.l.bf16 %v7363_v61  ;;  %v1289_v32 = vpop.permute.xlu0 %1288  ;;  %v1705_v61 = vunpack.c.l.bf16 %v1660_v60  ;;  %v8199_v63 = vld [vmem:[%s10796_s11] sm:$0xff] }
 0x2a3   : > { %v1304_v14 = vsel %vm10723_vm14, %v1300_v12, %v7364_v8  ;;  %v1305_v1 = vsel %vm10723_vm14, %v1301_v17, %v7365_v6  ;;  %v8204_v6 = vld [vmem:[%s10796_s11 + $0x20] sm:$0xff]  ;;  %v8209_v8 = vld [vmem:[%s10796_s11 + $0x8] sm:$0xff]  ;;  %v8228_v17 = vsub.s32 2, %v7661_v31 }
 0x2a4   : > { %v7368_v15 = vpop.permute.xlu1 %7367  ;;  %v1309_v16 = vsel %vm1308_vm2, %v1304_v14, %v1285_v52  ;;  %v1310_v29 = vsel %vm1308_vm2, %v1305_v1, %v1287_v13  ;;  %v5866_v52 = vld [vmem:[%s10794_s30 + $0x68] sm:$0xff]   ;;  %v7295_v9 = vcombine.high %v8199_v63, %v8204_v6  ;;  %v7296_v12 = vcombine.low %v8199_v63, %v8204_v6 }
 0x2a5   : > { %v7369_v18 = vunpack.i.l.bf16 %v7368_v15  ;;  %1471 = vmatmul.mubr.f32.vlgmr.msra.gmra.mrb[0].mxu1 %v1309_v16  ;;  %1560 = vmatmul.mubr.f32.vlgmr.msra.gmra.mrb[4].mxu0 %v1309_v16  ;;  %v7370_v23 = vunpack.i.h.bf16 %v7368_v15  ;;  %v1275_v40 = vpop.permute.xlu0 %1274  ;;  %v8225_v16 = vsub.s32 0, %v7661_v31 }
 0x2a6   : > { %5360 = vmatprep.mubr.msk.f32.mxu1 %vm1387_vm10, %v1287_v13  ;;  %5365 = vmatprep.mubr.msk.f32.mxu0 %vm1387_vm10, %v1287_v13  ;;  %v8218_v13 = vld [vmem:[%s10796_s11 + $0x28] sm:$0xff] }
 0x2a7   : > { %v1298_v0 = vsel %vm10725_vm8, %v1157_v21, %v7369_v18  ;;  %6676 = vmatpush3.bf16.msra.mxu1 %v5543_v47  ;;  %6708 = vmatpush3.bf16.msra.mxu0 %v5869_v45  ;;  %v1299_v7 = vsel %vm10725_vm8, %v1158_v34, %v7370_v23  ;;  %v7299_v14 = vcombine.high %v8209_v8, %v8218_v13  ;;  %v1370_v47 = vld [vmem:[%s10797_s1] sm:$0x7]  ;;  %v8234_v18 = vsub.s32 1, %v7661_v31  ;;  %v1593_v34 = vld [vmem:[%s10798_s7 + $0x8] sm:$0xff]  ;;  %s2496_s1 = scalar_lea.vmem %s10817_s26, %s7568_s2  ;;  %s9554_s26 = sld [smem:[#allocation2]] }
 0x2a8   : > { %v1273_v2 = vpop.permute.xlu1 %1272  ;;  %v1302_v28 = vsel %vm10724_vm9, %v1298_v0, %v1257_v55  ;;  %6678 = vmatprep.subr.bf16.mxu1 %v5862_v19  ;;  %6710 = vmatprep.subr.bf16.mxu0 %v5870_v20  ;;  %v5867_v55 = vld [vmem:[%s10794_s30 + $0x70] sm:$0xff]   ;;  %v7300_v15 = vcombine.low %v8209_v8, %v8218_v13  ;;  %v8237_v1 = vrot.slane %v1370_v47, %v8225_v16  ;;  %v1603_v8 = vld [vmem:[%s10798_s7 + $0x58] sm:$0xff] }
 0x2a9   : > { %v1306_v33 = vsel %vm10723_vm14, %v1302_v28, %v1273_v2  ;;  %1477 = vmatmul.mubr.f32.gmra.mrb[2].mxu1 %v1310_v29  ;;  %1565 = vmatmul.mubr.f32.gmra.mrb[6].mxu0 %v1310_v29  ;;  %v8240_v19 = vrot.slane %v1370_v47, %v8228_v17 }
 0x2aa   : > { %5361 = vmatprep.mubr.msk.f32.mxu1 %vm1387_vm10, %v1289_v32  ;;  %5366 = vmatprep.mubr.msk.f32.mxu0 %vm1387_vm10, %v1289_v32  ;;  %v1311_v22 = vsel %vm1308_vm2, %v1306_v33, %v1289_v32 }
 0x2ab   : > { %6680 = vmatpush3.bf16.msra.mxu1 %v5854_v30  ;;  %6712 = vmatpush3.bf16.msra.mxu0 %v5870_v20  ;;  %v8243_v20 = vrot.slane %v1370_v47, %v8234_v18  ;;  %v1594_v30 = vld [vmem:[%s10798_s7 + $0x10] sm:$0xff] }
 0x2ac   : > { %v1259_v39 = vpop.permute.xlu1 %1258  ;;  %6682 = vmatprep.subr.bf16.mxu1 %v5863_v35  ;;  %6714 = vmatprep.subr.bf16.mxu0 %v5871_v36  ;;  %v1592_v35 = vld [vmem:[%s10798_s7] sm:$0xff] }
 0x2ad   : > { %v1303_v45 = vsel %vm10724_vm9, %v1299_v7, %v1259_v39  ;;  %1483 = vmatmul.mubr.f32.gmra.mrb[4].mxu1 %v1311_v22  ;;  %1570 = vmatmul.mubr.f32.gmra.mrb[8].mxu0 %v1311_v22  ;;  %p5169_p5 = scmp.le.s32.totalorder %s9554_s26, 0  ;;  %vm10863_vm9 = vcmp.lt.s32.totalorder %v7661_v31, 7 }
 0x2ae   : > { %v1307_v48 = vsel %vm10723_vm14, %v1303_v45, %v1275_v40  ;;  %v1901_v45 = vld [vmem:[%s10796_s11 + $0x60] sm:$0x77]  ;;  %s9627_s26 = scalar_select %p5177_p12, 1, 0 }
 0x2af   : > { %6684 = vmatpush3.bf16.msra.mxu1 %v5855_v44  ;;  %6716 = vmatpush3.bf16.msra.mxu0 %v5871_v36  ;;  %v1897_v44 = vld [vmem:[%s10796_s11 + $0x40] sm:$0xff]  ;;  %s5170_s0 = scalar_select %p5169_p5, 1, 0 }
 0x2b0   : > { %v1291_v43 = vpop.permute.xlu1 %1290  ;;  %6686 = vmatprep.subr.bf16.mxu1 %v5864_v37  ;;  %6718 = vmatprep.subr.bf16.mxu0 %v5872_v46 }
 0x2b1   : > { %5362 = vmatprep.mubr.msk.f32.mxu1 %vm1387_vm10, %v1291_v43  ;;  %5367 = vmatprep.mubr.msk.f32.mxu0 %vm1387_vm10, %v1291_v43  ;;  %v1312_v50 = vsel %vm1308_vm2, %v1307_v48, %v1291_v43  ;;  %vm10799_vm10 = vmmov 1   ;;  %vm7431_vm2 = vmmov 0  }
 0x2b2   : > { %1489 = vmatmul.mubr.f32.gmra.mrb[6].mxu1 %v1312_v50  ;;  %1575 = vmatmul.mubr.f32.gmra.mrb[10].mxu0 %v1312_v50  ;;  %v1597_v50 = vld [vmem:[%s10798_s7 + $0x28] sm:$0xff]  ;;  %vm8275_vm4 = vmpackc.low %vm1396_vm0, %vm10799_vm10  ;;  %vm2424_vm0 = vcmask 31744  }
 0x2b3   : > { %6688 = vmatpush3.bf16.msra.mxu1 %v5856_v49  ;;  %6720 = vmatpush3.bf16.msra.mxu0 %v5872_v46 }
 0x2b4   : > { %6690 = vmatprep.subr.bf16.mxu1 %v5865_v51  ;;  %6722 = vmatprep.subr.bf16.mxu0 %v5873_v56 }
 0x2b7   : > { %6692 = vmatpush3.bf16.msra.mxu1 %v5857_v42  ;;  %6724 = vmatpush3.bf16.msra.mxu0 %v5873_v56  ;;  %v7297_v56 = vcombine.high %v1897_v44, %v1901_v45 }
 0x2b8   : > { %6694 = vmatprep.subr.bf16.mxu1 %v5866_v52  ;;  %6726 = vmatprep.subr.bf16.mxu0 %v5874_v58 }
 0x2bb   : > { %6696 = vmatpush3.bf16.msra.mxu1 %v5858_v54  ;;  %6728 = vmatpush3.bf16.msra.mxu0 %v5874_v58 }
 0x2bc   : > { %6698 = vmatprep.subr.bf16.mxu1 %v5867_v55  ;;  %6481 = vmatprep.subr.mxu0 %v1705_v61  ;;  %v1596_v55 = vld [vmem:[%s10798_s7 + $0x20] sm:$0xff] }
 0x2bf   : > { %6700 = vmatpush3.bf16.msra.mxu1 %v5859_v38  ;;  %6482 = vmatpush3.msra.mxu0 %v1705_v61  ;;  %v2514_v38 = vld [vmem:[%s10650_s14 + $0x80] sm:$0xff] }
 0x2c0   : > { %6702 = vmatprep.subr.bf16.mxu1 %v5868_v57  ;;  %6740 = vmatprep.subr.bf16.mxu0 %v7299_v14  ;;  %v1595_v57 = vld [vmem:[%s10798_s7 + $0x18] sm:$0xff] }
 0x2c3   : > { %6704 = vmatpush3.bf16.msra.mxu1 %v5860_v59 }
 0x2c4   : > { %6730 = vmatprep.subr.bf16.mxu1 %v7295_v9 }
 0x378   : > { %v1472_v21 = vpop.f32.mrb[0].mxu1  ;;  %v1561_v0 = vpop.f32.mrb[4].mxu0 }
 0x379   : > { %v1473_v23 = vadd.f32 %v1472_v21, %v8237_v1  ;;  %v1562_v2 = vadd.f32 %v1561_v0, %v8240_v19  ;;  %v1474_v28 = vpop.f32.mrb[1].mxu1  ;;  %v1563_v29 = vpop.f32.mrb[5].mxu0  ;;  %v1600_v21 = vld [vmem:[%s10798_s7 + $0x40] sm:$0xff] }
 0x37a   : > { %v1475_v32 = vadd.f32 %v1474_v28, %v8243_v20 }
 0x37b   : > { %v1580_v33 = vmax.f32 %v1473_v23, 0.0  ;;  %v1582_v36 = vmax.f32 %v1562_v2, 0.0  ;;  %v7298_v23 = vcombine.low %v1897_v44, %v1901_v45 }
 0x37c   : > { %v1581_v39 = vmax.f32 %v1475_v32, 0.0  ;;  %v1478_v7 = vpop.f32.mrb[2].mxu1  ;;  %v1566_v22 = vpop.f32.mrb[6].mxu0  ;;  %v1598_v32 = vld [vmem:[%s10798_s7 + $0x30] sm:$0xff] }
 0x37d   : > { %v1606_v37 = vmul.f32 %v1594_v30, %v1582_v36  ;;  %v1479_v46 = vadd.f32 %v1478_v7, %v8237_v1  ;;  %v1567_v40 = vadd.f32 %v1566_v22, %v8240_v19  ;;  %v1480_v43 = vpop.f32.mrb[3].mxu1  ;;  %v1568_v48 = vpop.f32.mrb[7].mxu0  ;;  %v1604_v42 = vmul.f32 %v1592_v35, %v1580_v33  ;;  %v1599_v30 = vld [vmem:[%s10798_s7 + $0x38] sm:$0xff] }
 0x37e   : > { %v1605_v49 = vmul.f32 %v1593_v34, %v1581_v39  ;;  %v1481_v51 = vadd.f32 %v1480_v43, %v8243_v20 }
 0x37f   : > { %v1583_v52 = vmax.f32 %v1479_v46, 0.0  ;;  %v1585_v54 = vmax.f32 %v1567_v40, 0.0  ;;  %6483 = vmatprep.mubr.msk.f32.mxu0 %vm1706_vm6, %v1606_v37 }
 0x380   : > { %v1584_v58 = vmax.f32 %v1481_v51, 0.0  ;;  %v1484_v59 = vpop.f32.mrb[4].mxu1  ;;  %v1571_v60 = vpop.f32.mrb[8].mxu0  ;;  %1783 = vmatprep.mubr.f32.mxu1 %v1605_v49  ;;  %v1902_v49 = vld [vmem:[%s10796_s11 + $0x68] sm:$0x77] }
 0x381   : > { %v1609_v61 = vmul.f32 %v1597_v50, %v1585_v54  ;;  %v1485_v63 = vadd.f32 %v1484_v59, %v8237_v1  ;;  %v1572_v6 = vadd.f32 %v1571_v60, %v8240_v19  ;;  %v1486_v9 = vpop.f32.mrb[5].mxu1  ;;  %v1573_v14 = vpop.f32.mrb[9].mxu0  ;;  %1784 = vmatmul.mubr.f32.vlgmr.msra.gmra.mrb[8].mxu1 %v1604_v42  ;;  %v1607_v2 = vmul.f32 %v1595_v57, %v1583_v52  ;;  %v1891_v42 = vld [vmem:[%s10796_s11 + $0x10] sm:$0xff]  ;;  %v1892_v54 = vld [vmem:[%s10796_s11 + $0x18] sm:$0xff] }
 0x382   : > { %v1608_v47 = vmul.f32 %v1596_v55, %v1584_v58  ;;  %v1487_v0 = vadd.f32 %v1486_v9, %v8243_v20  ;;  %6732 = vmatpush1.bf16.msra.mxu1 %v7296_v12  ;;  %v1895_v52 = vld [vmem:[%s10796_s11 + $0x30] sm:$0xff]  ;;  %v1896_v57 = vld [vmem:[%s10796_s11 + $0x38] sm:$0xff] }
 0x383   : > { %v1586_v28 = vmax.f32 %v1485_v63, 0.0  ;;  %v1588_v29 = vmax.f32 %v1572_v6, 0.0  ;;  %6484 = vmatmul.mubr.msk.f32.vlgmr.msra.gmra.mrb[12].mxu0 %vm1706_vm6, %v1609_v61  ;;  %6735 = vmatprep.subr.msk.bf16.mxu1 %vm8275_vm4, %v7297_v56  ;;  %v7303_v55 = vcombine.high %v1891_v42, %v1895_v52  ;;  %v7304_v56 = vcombine.low %v1891_v42, %v1895_v52  ;;  %v1899_v63 = vld [vmem:[%s10796_s11 + $0x50] sm:$0xff]  ;;  %v2517_v52 = vld [vmem:[%s10650_s14 + $0x98] sm:$0xff] }
 0x384   : > { %v1587_v33 = vmax.f32 %v1487_v0, 0.0  ;;  %1788 = vmatprep.mubr.f32.mxu1 %v1608_v47  ;;  %6742 = vmatpush1.bf16.msra.mxu0 %v7300_v15  ;;  %v7307_v58 = vcombine.high %v1892_v54, %v1896_v57  ;;  %v7308_v59 = vcombine.low %v1892_v54, %v1896_v57  ;;  %v1903_v14 = vld [vmem:[%s10796_s11 + $0x70] sm:$0x77]  ;;  %v1900_v47 = vld [vmem:[%s10796_s11 + $0x58] sm:$0xff] }
 0x385   : > { %v1612_v12 = vmul.f32 %v1600_v21, %v1588_v29  ;;  %v1490_v35 = vpop.f32.mrb[6].mxu1  ;;  %v1576_v36 = vpop.f32.mrb[10].mxu0  ;;  %1789 = vmatmul.mubr.f32.gmra.mrb[10].mxu1 %v1607_v2  ;;  %v1610_v45 = vmul.f32 %v1598_v32, %v1586_v28  ;;  %v1904_v21 = vld [vmem:[%s10796_s11 + $0x78] sm:$0x77]  ;;  %v7305_v29 = vcombine.high %v1899_v63, %v1903_v14  ;;  %v2548_v54 = vld [vmem:[%s10650_s14 + $0x190] sm:$0xff] }
 0x386   : > { %v1611_v34 = vmul.f32 %v1599_v30, %v1587_v33  ;;  %v1491_v39 = vadd.f32 %v1490_v35, %v8237_v1  ;;  %v1577_v7 = vadd.f32 %v1576_v36, %v8240_v19  ;;  %v1492_v22 = vpop.f32.mrb[7].mxu1  ;;  %v1578_v44 = vpop.f32.mrb[11].mxu0  ;;  %6738 = vmatpush1.bf16.msk.msra.mxu1 %vm8275_vm4, %v7298_v23  ;;  %v1602_v1 = vld [vmem:[%s10798_s7 + $0x50] sm:$0xff]  ;;  %v1601_v19 = vld [vmem:[%s10798_s7 + $0x48] sm:$0xff]  ;;  %v7309_v30 = vcombine.high %v1900_v47, %v1904_v21 }
 0x387   : > { %v1493_v13 = vadd.f32 %v1492_v22, %v8243_v20  ;;  %6486 = vmatprep.mubr.msk.f32.mxu0 %vm1706_vm6, %v1612_v12  ;;  %v1898_v20 = vld [vmem:[%s10796_s11 + $0x48] sm:$0xff]  ;;  %6750 = vmatprep.subr.bf16.mxu1 %v7303_v55  ;;  %v7306_v35 = vcombine.low %v1899_v63, %v1903_v14  ;;  %v7310_v36 = vcombine.low %v1900_v47, %v1904_v21  ;;  %v2549_v55 = vld [vmem:[%s10650_s14 + $0x198] sm:$0xff]  ;;  %v2550_v47 = vld [vmem:[%s10650_s14 + $0x1a0] sm:$0xff] }
 0x388   : > { %v1589_v15 = vmax.f32 %v1491_v39, 0.0  ;;  %v1591_v37 = vmax.f32 %v1577_v7, 0.0  ;;  %1793 = vmatprep.mubr.f32.mxu1 %v1611_v34  ;;  %v7301_v50 = vcombine.high %v1898_v20, %v1902_v49  ;;  %v7302_v51 = vcombine.low %v1898_v20, %v1902_v49  ;;  %v2530_v49 = vld [vmem:[%s10650_s14 + $0x100] sm:$0xff]  ;;  %v2533_v63 = vld [vmem:[%s10650_s14 + $0x118] sm:$0xff]  ;;  %v2519_v14 = vld [vmem:[%s10650_s14 + $0xa8] sm:$0xff] }
 0x389   : > { %v1590_v46 = vmax.f32 %v1493_v13, 0.0  ;;  %1794 = vmatmul.mubr.f32.gmra.mrb[12].mxu1 %v1610_v45  ;;  %v6805_v57 = vpack.c.bf16 %v2549_v55, %v2548_v54  ;;  %v2556_v54 = vld [vmem:[%s10650_s14 + $0x1d0] sm:$0xff] }
 0x38a   : > { %v1615_v40 = vmul.f32 %v1603_v8, %v1591_v37  ;;  %v1613_v48 = vmul.f32 %v1601_v19, %v1589_v15  ;;  %6745 = vmatprep.subr.msk.bf16.mxu0 %vm8275_vm4, %v7301_v50  ;;  %v2515_v37 = vld [vmem:[%s10650_s14 + $0x88] sm:$0xff] }
 0x38b   : > { %v1614_v43 = vmul.f32 %v1602_v1, %v1590_v46  ;;  %6748 = vmatpush1.bf16.msk.msra.mxu0 %vm8275_vm4, %v7302_v51  ;;  %v2546_v1 = vld [vmem:[%s10650_s14 + $0x180] sm:$0xff]  ;;  %v6769_v19 = vpack.c.bf16 %v2515_v37, %v2514_v38  ;;  %v2547_v46 = vld [vmem:[%s10650_s14 + $0x188] sm:$0xff]  ;;  %v2516_v51 = vld [vmem:[%s10650_s14 + $0x90] sm:$0xff] }
 0x38c   : > { %6487 = vmatmul.mubr.msk.f32.gmra.mrb[14].mxu0 %vm1706_vm6, %v1615_v40  ;;  %6760 = vmatprep.subr.bf16.mxu0 %v7307_v58  ;;  %v6801_v40 = vpack.c.bf16 %v2547_v46, %v2546_v1  ;;  %v2531_v50 = vld [vmem:[%s10650_s14 + $0x108] sm:$0xff]  ;;  %v2500_v58 = vld [vmem:[%s10650_s14 + $0x10] sm:$0xff]  ;;  %v2522_v38 = vld [vmem:[%s10650_s14 + $0xc0] sm:$0xff] }
 0x38d   : > { %1798 = vmatprep.mubr.f32.mxu1 %v1614_v43  ;;  %2126 = vmatprep.mubr.f32.mxu0 %v10702_v41  ;;  %v2498_v43 = vld [vmem:[%s10650_s14] sm:$0xff]  ;;  %v6803_v42 = vpack.c.bf16 %v2531_v50, %v2530_v49  ;;  %v2523_v37 = vld [vmem:[%s10650_s14 + $0xc8] sm:$0xff] }
 0x38e   : > { %1799 = vmatmul.mubr.f32.gmra.mrb[14].mxu1 %v1613_v48  ;;  %v2499_v48 = vld [vmem:[%s10650_s14 + $0x8] sm:$0xff]  ;;  %v2554_v1 = vld [vmem:[%s10650_s14 + $0x1c0] sm:$0xff] }
 0x38f   : > { %2037 = vmatprep.mubr.f32.mxu1 %v10702_v41  ;;  %v6771_v20 = vpack.c.bf16 %v2499_v48, %v2498_v43  ;;  %v2555_v46 = vld [vmem:[%s10650_s14 + $0x1c8] sm:$0xff]  ;;  %v2538_v49 = vld [vmem:[%s10650_s14 + $0x140] sm:$0xff] }
 0x390   : > { %v2507_v43 = vld [vmem:[%s10650_s14 + $0x48] sm:$0xff]  ;;  %v6817_v48 = vpack.c.bf16 %v2555_v46, %v2554_v1 }
 0x391   : > { %v2539_v50 = vld [vmem:[%s10650_s14 + $0x148] sm:$0xff] }
 0x392   : > { %v8597_v46 = vld [vmem:[%s10802_s12 + $0x8] sm:$0xff] }
 0x454   : > { %v5978_v60 = vpop.f32.mrb[8].mxu1 }
 0x455   : > { %v5979_v61 = vpop.f32.mrb[9].mxu1 }
 0x456   : > { %v5980_v6 = vadd.f32 %v5979_v61, %v5978_v60  ;;  %v6485_v9 = vpop.f32.mrb[12].mxu0  ;;  %v2532_v60 = vld [vmem:[%s10650_s14 + $0x110] sm:$0xff] }
 0x457   : > { %v1870_v0 = vpop.f32.mrb[13].mxu0 }
 0x458   : > { %v1871_v23 = vadd.f32 %v5980_v6, %v1870_v0  ;;  %v5981_v2 = vpop.f32.mrb[10].mxu1  ;;  %v6807_v6 = vpack.c.bf16 %v2533_v63, %v2532_v60  ;;  %v2551_v0 = vld [vmem:[%s10650_s14 + $0x1a8] sm:$0xff]  ;;  %v2540_v60 = vld [vmem:[%s10650_s14 + $0x150] sm:$0xff] }
 0x459   : > { %v5982_v28 = vpop.f32.mrb[11].mxu1 }
 0x45a   : > { %v5983_v32 = vadd.f32 %v5982_v28, %v5981_v2  ;;  %5374 = vmatmul.mubr.msk.f32.vlgmr.msra.gmra.mrb[16].mxu1 %vm10725_vm8, %v1871_v23  ;;  %5380 = vmatmul.mubr.msk.f32.vlgmr.msra.gmra.mrb[16].mxu0 %vm10725_vm8, %v1871_v23  ;;  %v2503_v2 = vld [vmem:[%s10650_s14 + $0x28] sm:$0xff]  ;;  %v6809_v28 = vpack.c.bf16 %v2551_v0, %v2550_v47  ;;  %v2558_v47 = vld [vmem:[%s10650_s14 + $0x1e0] sm:$0xff] }
 0x45b   : > { %2043 = vmatprep.mubr.f32.mxu1 %v10702_v41  ;;  %2132 = vmatprep.mubr.f32.mxu0 %v10702_v41  ;;  %v2559_v0 = vld [vmem:[%s10650_s14 + $0x1e8] sm:$0xff] }
 0x45c   : > { %v1876_v33 = vadd.f32 %v6485_v9, %v5983_v32  ;;  %v5984_v12 = vpop.f32.mrb[12].mxu1  ;;  %6752 = vmatpush1.bf16.msra.mxu1 %v7304_v56  ;;  %6762 = vmatpush1.bf16.msra.mxu0 %v7308_v59  ;;  %v6773_v56 = vpack.c.bf16 %v2517_v52, %v2516_v51  ;;  %v2501_v59 = vld [vmem:[%s10650_s14 + $0x18] sm:$0xff]  ;;  %v2518_v9 = vld [vmem:[%s10650_s14 + $0xa0] sm:$0xff]  ;;  %v2535_v32 = vld [vmem:[%s10650_s14 + $0x128] sm:$0xff]  ;;  %v6819_v51 = vpack.c.bf16 %v2539_v50, %v2538_v49  ;;  %v10698_v50 = vunpack.c.l.bf16 %v8597_v46 }
 0x45d   : > { %v5985_v34 = vpop.f32.mrb[13].mxu1  ;;  %6755 = vmatprep.subr.msk.bf16.mxu1 %vm8275_vm4, %v7305_v29  ;;  %6765 = vmatprep.subr.msk.bf16.mxu0 %vm8275_vm4, %v7309_v30  ;;  %v6775_v61 = vpack.c.bf16 %v2501_v59, %v2500_v58  ;;  %v6777_v21 = vpack.c.bf16 %v2519_v14, %v2518_v9  ;;  %v2534_v30 = vld [vmem:[%s10650_s14 + $0x120] sm:$0xff]  ;;  %v2525_v52 = vld [vmem:[%s10650_s14 + $0xd8] sm:$0xff]  ;;  %v2527_v14 = vld [vmem:[%s10650_s14 + $0xe8] sm:$0xff] }
 0x45e   : > { %v5986_v39 = vadd.f32 %v5985_v34, %v5984_v12  ;;  %5375 = vmatmul.mubr.msk.f32.gmra.mrb[18].mxu1 %vm10725_vm8, %v1876_v33  ;;  %5381 = vmatmul.mubr.msk.f32.gmra.mrb[18].mxu0 %vm10725_vm8, %v1876_v33  ;;  %v2520_v12 = vld [vmem:[%s10650_s14 + $0xb0] sm:$0xff]  ;;  %v2509_v59 = vld [vmem:[%s10650_s14 + $0x58] sm:$0xff]  ;;  %v2526_v9 = vld [vmem:[%s10650_s14 + $0xe0] sm:$0xff] }
 0x45f   : > { %v6488_v7 = vpop.f32.mrb[14].mxu0  ;;  %2049 = vmatprep.mubr.f32.mxu1 %v10702_v41  ;;  %2138 = vmatprep.mubr.f32.mxu0 %v10702_v41 }
 0x460   : > { %v1880_v22 = vpop.f32.mrb[15].mxu0  ;;  %6758 = vmatpush1.bf16.msk.msra.mxu1 %vm8275_vm4, %v7306_v35  ;;  %6768 = vmatpush1.bf16.msk.msra.mxu0 %vm8275_vm4, %v7310_v36  ;;  %v2521_v35 = vld [vmem:[%s10650_s14 + $0xb8] sm:$0xff]  ;;  %v2552_v36 = vld [vmem:[%s10650_s14 + $0x1b0] sm:$0xff] }
 0x461   : > { %v1881_v44 = vadd.f32 %v5986_v39, %v1880_v22  ;;  %v5987_v45 = vpop.f32.mrb[14].mxu1  ;;  %6770 = vmatprep.subr.bf16.mxu1 %v6769_v19  ;;  %6802 = vmatprep.subr.bf16.mxu0 %v6801_v40  ;;  %v6781_v34 = vpack.c.bf16 %v2521_v35, %v2520_v12  ;;  %v2553_v39 = vld [vmem:[%s10650_s14 + $0x1b8] sm:$0xff]  ;;  %v6785_v19 = vpack.c.bf16 %v2523_v37, %v2522_v38  ;;  %v2506_v40 = vld [vmem:[%s10650_s14 + $0x40] sm:$0xff]  ;;  %v2528_v12 = vld [vmem:[%s10650_s14 + $0xf0] sm:$0xff] }
 0x462   : > { %v5988_v8 = vpop.f32.mrb[15].mxu1  ;;  %v2505_v22 = vld [vmem:[%s10650_s14 + $0x38] sm:$0xff]  ;;  %v2578_v38 = vld [vmem:[%s10650_s14 + $0x280] sm:$0xff]  ;;  %v2579_v37 = vld [vmem:[%s10650_s14 + $0x288] sm:$0xff] }
 0x463   : > { %v5989_v13 = vadd.f32 %v5988_v8, %v5987_v45  ;;  %5376 = vmatmul.mubr.msk.f32.gmra.mrb[20].mxu1 %vm10725_vm8, %v1881_v44  ;;  %5382 = vmatmul.mubr.msk.f32.gmra.mrb[20].mxu0 %vm10725_vm8, %v1881_v44  ;;  %v2536_v8 = vld [vmem:[%s10650_s14 + $0x130] sm:$0xff]  ;;  %v2529_v35 = vld [vmem:[%s10650_s14 + $0xf8] sm:$0xff]  ;;  %v6833_v1 = vpack.c.bf16 %v2579_v37, %v2578_v38 }
 0x464   : > { %2055 = vmatprep.mubr.f32.mxu1 %v10702_v41  ;;  %2144 = vmatprep.mubr.f32.mxu0 %v10702_v41 }
 0x465   : > { %v1886_v15 = vadd.f32 %v6488_v7, %v5989_v13  ;;  %v2504_v7 = vld [vmem:[%s10650_s14 + $0x30] sm:$0xff]  ;;  %v2537_v13 = vld [vmem:[%s10650_s14 + $0x138] sm:$0xff] }
 0x466   : > { %v6783_v45 = vpack.c.bf16 %v2505_v22, %v2504_v7  ;;  %v2512_v7 = vld [vmem:[%s10650_s14 + $0x70] sm:$0xff]  ;;  %v2513_v22 = vld [vmem:[%s10650_s14 + $0x78] sm:$0xff] }
 0x467   : > { %5377 = vmatmul.mubr.msk.f32.gmra.mrb[22].mxu1 %vm10725_vm8, %v1886_v15  ;;  %5383 = vmatmul.mubr.msk.f32.gmra.mrb[22].mxu0 %vm10725_vm8, %v1886_v15 }
 0x468   : > { %2215 = vmatprep.mubr.f32.mxu1 %v10702_v41  ;;  %2304 = vmatprep.mubr.f32.mxu0 %v10702_v41 }
 0x46b   : > { %5386 = vmatmul.mubr.msk.f32.vlgmr.msra.gmra.mrb[24].mxu1 %vm10725_vm8, %v1871_v23  ;;  %5392 = vmatmul.mubr.msk.f32.vlgmr.msra.gmra.mrb[24].mxu0 %vm10725_vm8, %v1871_v23  ;;  %v2502_v23 = vld [vmem:[%s10650_s14 + $0x20] sm:$0xff] }
 0x46c   : > { %2221 = vmatprep.mubr.f32.mxu1 %v10702_v41  ;;  %2310 = vmatprep.mubr.f32.mxu0 %v10702_v41  ;;  %v6779_v29 = vpack.c.bf16 %v2503_v2, %v2502_v23  ;;  %v2510_v23 = vld [vmem:[%s10650_s14 + $0x60] sm:$0xff]  ;;  %v2511_v2 = vld [vmem:[%s10650_s14 + $0x68] sm:$0xff] }
 0x46d   : > { %6772 = vmatpush3.bf16.msra.mxu1 %v6771_v20  ;;  %6804 = vmatpush3.bf16.msra.mxu0 %v6803_v42  ;;  %v6787_v20 = vpack.c.bf16 %v2507_v43, %v2506_v40  ;;  %v2524_v42 = vld [vmem:[%s10650_s14 + $0xd0] sm:$0xff]  ;;  %v8602_v40 = vld [vmem:[%s10802_s12 + $0x20] sm:$0xff]  ;;  %v8607_v43 = vld [vmem:[%s10802_s12 + $0x28] sm:$0xff] }
 0x46e   : > { %6774 = vmatprep.subr.bf16.mxu1 %v6773_v56  ;;  %6806 = vmatprep.subr.bf16.mxu0 %v6805_v57  ;;  %v6789_v55 = vpack.c.bf16 %v2525_v52, %v2524_v42  ;;  %v2557_v56 = vld [vmem:[%s10650_s14 + $0x1d8] sm:$0xff]  ;;  %v2508_v57 = vld [vmem:[%s10650_s14 + $0x50] sm:$0xff]  ;;  %v10693_v52 = vunpack.c.l.bf16 %v8602_v40 }
 0x46f   : > { %5387 = vmatmul.mubr.msk.f32.gmra.mrb[26].mxu1 %vm10725_vm8, %v1876_v33  ;;  %5393 = vmatmul.mubr.msk.f32.gmra.mrb[26].mxu0 %vm10725_vm8, %v1876_v33  ;;  %v6811_v33 = vpack.c.bf16 %v2535_v32, %v2534_v30  ;;  %v6821_v58 = vpack.c.bf16 %v2557_v56, %v2556_v54  ;;  %v6791_v63 = vpack.c.bf16 %v2509_v59, %v2508_v57  ;;  %v2542_v30 = vld [vmem:[%s10650_s14 + $0x160] sm:$0xff]  ;;  %v2543_v32 = vld [vmem:[%s10650_s14 + $0x168] sm:$0xff]  ;;  %v10692_v54 = vunpack.c.l.bf16 %v8607_v43 }
 0x470   : > { %2227 = vmatprep.mubr.f32.mxu1 %v10702_v41  ;;  %2316 = vmatprep.mubr.f32.mxu0 %v10702_v41  ;;  %v8621_v56 = vld [vmem:[%s10802_s12 + $0x48] sm:$0xff]  ;;  %v10697_v59 = vunpack.c.h.bf16 %v8602_v40 }
 0x471   : > { %6776 = vmatpush3.bf16.msra.mxu1 %v6775_v61  ;;  %6808 = vmatpush3.bf16.msra.mxu0 %v6807_v6  ;;  %v2541_v61 = vld [vmem:[%s10650_s14 + $0x158] sm:$0xff] }
 0x472   : > { %6778 = vmatprep.subr.bf16.mxu1 %v6777_v21  ;;  %6810 = vmatprep.subr.bf16.mxu0 %v6809_v28  ;;  %v6823_v6 = vpack.c.bf16 %v2541_v61, %v2540_v60  ;;  %v6793_v21 = vpack.c.bf16 %v2527_v14, %v2526_v9  ;;  %v6825_v28 = vpack.c.bf16 %v2559_v0, %v2558_v47  ;;  %v10696_v60 = vunpack.c.h.bf16 %v8607_v43 }
 0x473   : > { %5388 = vmatmul.mubr.msk.f32.gmra.mrb[28].mxu1 %vm10725_vm8, %v1881_v44  ;;  %5394 = vmatmul.mubr.msk.f32.gmra.mrb[28].mxu0 %vm10725_vm8, %v1881_v44  ;;  %v6813_v44 = vpack.c.bf16 %v2553_v39, %v2552_v36  ;;  %v2560_v36 = vld [vmem:[%s10650_s14 + $0x1f0] sm:$0xff]  ;;  %v2561_v39 = vld [vmem:[%s10650_s14 + $0x1f8] sm:$0xff]  ;;  %v10688_v9 = vunpack.c.l.bf16 %v8621_v56 }
 0x474   : > { %2233 = vmatprep.mubr.f32.mxu1 %v10702_v41  ;;  %2322 = vmatprep.mubr.f32.mxu0 %v10702_v41 }
 0x475   : > { %6780 = vmatpush3.bf16.msra.mxu1 %v6779_v29  ;;  %6812 = vmatpush3.bf16.msra.mxu0 %v6811_v33  ;;  %v6795_v29 = vpack.c.bf16 %v2511_v2, %v2510_v23  ;;  %v6827_v33 = vpack.c.bf16 %v2543_v32, %v2542_v30 }
 0x476   : > { %6782 = vmatprep.subr.bf16.mxu1 %v6781_v34  ;;  %6814 = vmatprep.subr.bf16.mxu0 %v6813_v44  ;;  %v6797_v34 = vpack.c.bf16 %v2529_v35, %v2528_v12  ;;  %v6829_v44 = vpack.c.bf16 %v2561_v39, %v2560_v36  ;;  %v8658_v35 = vld [vmem:[%s10802_s12 + $0x10] sm:$0xff]  ;;  %v8663_v36 = vld [vmem:[%s10802_s12 + $0x18] sm:$0xff] }
 0x477   : > { %5389 = vmatmul.mubr.msk.f32.gmra.mrb[30].mxu1 %vm10725_vm8, %v1886_v15  ;;  %5395 = vmatmul.mubr.msk.f32.gmra.mrb[30].mxu0 %vm10725_vm8, %v1886_v15  ;;  %v6815_v15 = vpack.c.bf16 %v2537_v13, %v2536_v8  ;;  %v2544_v8 = vld [vmem:[%s10650_s14 + $0x170] sm:$0xff]  ;;  %v2545_v13 = vld [vmem:[%s10650_s14 + $0x178] sm:$0xff] }
 0x479   : > { %6784 = vmatpush3.bf16.msra.mxu1 %v6783_v45  ;;  %6816 = vmatpush3.bf16.msra.mxu0 %v6815_v15  ;;  %v6799_v45 = vpack.c.bf16 %v2513_v22, %v2512_v7  ;;  %v6831_v15 = vpack.c.bf16 %v2545_v13, %v2544_v8  ;;  %v10690_v22 = vunpack.c.h.bf16 %v8621_v56 }
 0x47a   : > { %6786 = vmatprep.subr.bf16.mxu1 %v6785_v19  ;;  %6818 = vmatprep.subr.bf16.mxu0 %v6817_v48  ;;  %v8592_v19 = vld [vmem:[%s10802_s12] sm:$0xff] }
 0x47b   : > { %v10699_v49 = vunpack.c.l.bf16 %v8592_v19  ;;  %v10701_v57 = vunpack.c.h.bf16 %v8592_v19 }
 0x47d   : > { %6788 = vmatpush3.bf16.msra.mxu1 %v6787_v20  ;;  %6820 = vmatpush3.bf16.msra.mxu0 %v6819_v51 }
 0x47e   : > { %6790 = vmatprep.subr.bf16.mxu1 %v6789_v55  ;;  %6822 = vmatprep.subr.bf16.mxu0 %v6821_v58  ;;  %v8616_v55 = vld [vmem:[%s10802_s12 + $0x40] sm:$0xff]  ;;  %v10700_v58 = vunpack.c.h.bf16 %v8597_v46 }
 0x47f   : > { %v10691_v7 = vunpack.c.h.bf16 %v8616_v55 }
 0x481   : > { %6792 = vmatpush3.bf16.msra.mxu1 %v6791_v63  ;;  %6824 = vmatpush3.bf16.msra.mxu0 %v6823_v6  ;;  %v10689_v6 = vunpack.c.l.bf16 %v8616_v55 }
 0x482   : > { %6794 = vmatprep.subr.bf16.mxu1 %v6793_v21  ;;  %6826 = vmatprep.subr.bf16.mxu0 %v6825_v28  ;;  %v8640_v28 = vld [vmem:[%s10802_s12 + $0x60] sm:$0xff] }
 0x483   : > { %v10695_v8 = vunpack.c.l.bf16 %v8640_v28 }
 0x485   : > { %6796 = vmatpush3.bf16.msra.mxu1 %v6795_v29  ;;  %6828 = vmatpush3.bf16.msra.mxu0 %v6827_v33  ;;  %v8645_v29 = vld [vmem:[%s10802_s12 + $0x68] sm:$0xff] }
 0x486   : > { %6798 = vmatprep.subr.bf16.mxu1 %v6797_v34  ;;  %6830 = vmatprep.subr.bf16.mxu0 %v6829_v44  ;;  %v10694_v13 = vunpack.c.l.bf16 %v8645_v29 }
 0x489   : > { %6800 = vmatpush3.bf16.msra.mxu1 %v6799_v45  ;;  %6832 = vmatpush3.bf16.msra.mxu0 %v6831_v15  ;;  %v8672_v15 = vld [vmem:[%s10802_s12 + $0x30] sm:$0xff] }
 0x48a   : > { %6865 = vmatprep.subr.bf16.mxu0 %v10704_v53  ;;  %6834 = vmatprep.subr.bf16.mxu1 %v6833_v1  ;;  %v10706_v1 = vunpack.c.h.bf16 %v8640_v28  ;;  %v10716_v3 = vunpack.c.h.bf16 %v8672_v15 }
 0x52d   : > { %v2039_v48 = vpop.f32.mrb[16].mxu1  ;;  %v2128_v20 = vpop.f32.mrb[16].mxu0 }
 0x52e   : > { %v2041_v51 = vpop.f32.mrb[17].mxu1  ;;  %v2130_v42 = vpop.f32.mrb[17].mxu0  ;;  %v2329_v14 = vmul.f32 %v2039_v48, %v10699_v49  ;;  %v2331_v47 = vmul.f32 %v2128_v20, %v10698_v50  ;;  %v10707_v48 = vunpack.c.h.bf16 %v8645_v29  ;;  %v10710_v20 = vunpack.c.l.bf16 %v8658_v35 }
 0x52f   : > { %v2330_v30 = vmul.f32 %v2041_v51, %v10701_v57  ;;  %v2332_v32 = vmul.f32 %v2130_v42, %v10700_v58  ;;  %v10709_v51 = vunpack.c.l.bf16 %v8663_v36  ;;  %v8681_v42 = vld [vmem:[%s10802_s12 + $0x38] sm:$0xff] }
 0x531   : > { %v2045_v61 = vpop.f32.mrb[18].mxu1  ;;  %v2134_v63 = vpop.f32.mrb[18].mxu0 }
 0x532   : > { %v2337_v21 = vmul.f32 %v2045_v61, %v10693_v52  ;;  %v2339_v0 = vmul.f32 %v2134_v63, %v10692_v54  ;;  %v2047_v23 = vpop.f32.mrb[19].mxu1  ;;  %v2136_v2 = vpop.f32.mrb[19].mxu0  ;;  %v827_v54 = vunpack.c.h.bf16 %v8681_v42  ;;  %v8717_v52 = vld [vmem:[%s10802_s12 + $0x70] sm:$0xff] }
 0x533   : > { %v2338_v33 = vmul.f32 %v2047_v23, %v10697_v59  ;;  %v2340_v12 = vmul.f32 %v2136_v2, %v10696_v60  ;;  %v10708_v23 = vunpack.c.h.bf16 %v8663_v36 }
 0x534   : > { %v2361_v34 = vadd.f32 %v2337_v21, %v2329_v14  ;;  %v2379_v39 = vadd.f32 %v2339_v0, %v2331_v47  ;;  %v8690_v21 = vld [vmem:[%s10803_s10] sm:$0xff]  ;;  %v10713_v0 = vunpack.c.h.bf16 %v8658_v35  ;;  %s11022_s10 = sshll.u32 %s7638_s9, 5 }
 0x535   : > { %v2370_v44 = vadd.f32 %v2338_v33, %v2330_v30  ;;  %v2388_v45 = vadd.f32 %v2340_v12, %v2332_v32  ;;  %v10711_v32 = vunpack.c.l.bf16 %v8672_v15  ;;  %v8702_v33 = vld [vmem:[%s10802_s12 + $0x50] sm:$0xff]  ;;  %v8707_v12 = vld [vmem:[%s10802_s12 + $0x58] sm:$0xff] }
 0x536   : > { %v2051_v38 = vpop.f32.mrb[20].mxu1  ;;  %v2140_v37 = vpop.f32.mrb[20].mxu0  ;;  %v10804_v27 = vunpack.c.l.bf16 %v8702_v33 }
 0x537   : > { %v2345_v61 = vmul.f32 %v2051_v38, %v10689_v6  ;;  %v2347_v63 = vmul.f32 %v2140_v37, %v10688_v9  ;;  %v2053_v14 = vpop.f32.mrb[21].mxu1  ;;  %v2142_v47 = vpop.f32.mrb[21].mxu0 }
 0x538   : > { %v2346_v2 = vmul.f32 %v2053_v14, %v10691_v7  ;;  %v2348_v30 = vmul.f32 %v2142_v47, %v10690_v22  ;;  %v10712_v14 = vunpack.c.l.bf16 %v8681_v42 }
 0x539   : > { %v2362_v38 = vadd.f32 %v2361_v34, %v2345_v61  ;;  %v2380_v37 = vadd.f32 %v2379_v39, %v2347_v63 }
 0x53a   : > { %v2371_v47 = vadd.f32 %v2370_v44, %v2346_v2  ;;  %v2389_v9 = vadd.f32 %v2388_v45, %v2348_v30  ;;  %v2057_v6 = vpop.f32.mrb[22].mxu1  ;;  %v2146_v7 = vpop.f32.mrb[22].mxu0  ;;  %v8728_v2 = vld [vmem:[%s10802_s12 + $0x78] sm:$0xff]  ;;  %s11023_s12 = sld [smem:[#allocation36_spill]] }
 0x53b   : > { %v2353_v34 = vmul.f32 %v2057_v6, %v10695_v8  ;;  %v2355_v39 = vmul.f32 %v2146_v7, %v10694_v13  ;;  %v2059_v44 = vpop.f32.mrb[23].mxu1  ;;  %v2148_v45 = vpop.f32.mrb[23].mxu0 }
 0x53c   : > { %v2354_v6 = vmul.f32 %v2059_v44, %v10706_v1  ;;  %v2356_v7 = vmul.f32 %v2148_v45, %v10707_v48 }
 0x53d   : > { %v2363_v8 = vadd.f32 %v2362_v38, %v2353_v34  ;;  %v2381_v60 = vadd.f32 %v2380_v37, %v2355_v39 }
 0x53e   : > { %v2372_v49 = vadd.f32 %v2371_v47, %v2354_v6  ;;  %v2390_v58 = vadd.f32 %v2389_v9, %v2356_v7  ;;  %v2217_v57 = vpop.f32.mrb[24].mxu1  ;;  %v2306_v41 = vpop.f32.mrb[24].mxu0  ;;  %v2447_v9 = vrot.slane %v8690_v21, %v8234_v18 }
 0x53f   : > { %v2364_v44 = vrot.slane %v2363_v8, 4  ;;  %v2382_v1 = vrot.slane %v2381_v60, 4  ;;  %v2219_v22 = vpop.f32.mrb[25].mxu1  ;;  %v2308_v45 = vpop.f32.mrb[25].mxu0  ;;  %v2333_v7 = vmul.f32 %v2217_v57, %v10710_v20  ;;  %v2335_v53 = vmul.f32 %v2306_v41, %v10709_v51 }
 0x540   : > { %v2373_v37 = vrot.slane %v2372_v49, 4  ;;  %v2391_v34 = vrot.slane %v2390_v58, 4  ;;  %v2336_v47 = vmul.f32 %v2308_v45, %v10708_v23  ;;  %v2334_v38 = vmul.f32 %v2219_v22, %v10713_v0 }
 0x541   : > { %v2365_v39 = vadd.f32 %v2364_v44, %v2363_v8  ;;  %v2383_v6 = vadd.f32 %v2382_v1, %v2381_v60 }
 0x542   : > { %v2374_v30 = vadd.f32 %v2373_v37, %v2372_v49  ;;  %v2392_v48 = vadd.f32 %v2391_v34, %v2390_v58  ;;  %v2425_v50 = vsel %vm2424_vm0, %v2336_v47, 0.0  ;;  %v2223_v59 = vpop.f32.mrb[26].mxu1  ;;  %v2312_v45 = vpop.f32.mrb[26].mxu0 }
 0x543   : > { %v2366_v23 = vrot.slane %v2365_v39, 2  ;;  %v2384_v13 = vrot.slane %v2383_v6, 2  ;;  %v2341_v60 = vmul.f32 %v2223_v59, %v10711_v32  ;;  %v2343_v57 = vmul.f32 %v2312_v45, %v10712_v14  ;;  %v2225_v8 = vpop.f32.mrb[27].mxu1  ;;  %v2314_v1 = vpop.f32.mrb[27].mxu0 }
 0x544   : > { %v2375_v41 = vrot.slane %v2374_v30, 2  ;;  %v2393_v49 = vrot.slane %v2392_v48, 2  ;;  %v2342_v58 = vmul.f32 %v2225_v8, %v10716_v3  ;;  %v2344_v22 = vmul.f32 %v2314_v1, %v827_v54 }
 0x545   : > { %v2367_v44 = vadd.f32 %v2366_v23, %v2365_v39  ;;  %v2385_v37 = vadd.f32 %v2384_v13, %v2383_v6  ;;  %v2397_v34 = vadd.f32 %v2341_v60, %v2333_v7  ;;  %v2415_v47 = vadd.f32 %v2343_v57, %v2335_v53 }
 0x546   : > { %v2376_v51 = vadd.f32 %v2375_v41, %v2374_v30  ;;  %v2394_v20 = vadd.f32 %v2393_v49, %v2392_v48  ;;  %v2406_v59 = vadd.f32 %v2342_v58, %v2334_v38  ;;  %v2426_v32 = vsel %vm2424_vm0, %v2344_v22, 0.0  ;;  %v2229_v45 = vpop.f32.mrb[28].mxu1  ;;  %v2318_v14 = vpop.f32.mrb[28].mxu0 }
 0x547   : > { %v2368_v0 = vrot.slane %v2367_v44, 1  ;;  %v2386_v63 = vrot.slane %v2385_v37, 1  ;;  %v2427_v61 = vadd.f32 %v2426_v32, %v2425_v50  ;;  %v2349_v8 = vmul.f32 %v2229_v45, %v10804_v27  ;;  %v2231_v3 = vpop.f32.mrb[29].mxu1  ;;  %v2320_v26 = vpop.f32.mrb[29].mxu0 }
 0x548   : > { %v10805_v23 = vunpack.c.l.bf16 %v8707_v12  ;;  %v10806_v53 = vunpack.c.h.bf16 %v8702_v33  ;;  %v10807_v48 = vunpack.c.h.bf16 %v8707_v12  ;;  %v2377_v39 = vrot.slane %v2376_v51, 1 }
 0x549   : > { %v2369_v6 = vadd.f32 %v2368_v0, %v2367_v44  ;;  %v2387_v7 = vadd.f32 %v2386_v63, %v2385_v37  ;;  %v2398_v60 = vadd.f32 %v2397_v34, %v2349_v8  ;;  %v2395_v57 = vrot.slane %v2394_v20, 1 }
 0x54a   : > { %v2351_v13 = vmul.f32 %v2318_v14, %v10805_v23  ;;  %v2350_v30 = vmul.f32 %v2231_v3, %v10806_v53  ;;  %v2352_v38 = vmul.f32 %v2320_v26, %v10807_v48  ;;  %v2235_v1 = vpop.f32.mrb[30].mxu1  ;;  %v2324_v41 = vpop.f32.mrb[30].mxu0  ;;  %v2378_v49 = vadd.f32 %v2377_v39, %v2376_v51  ;;  %v2562_v14 = vld [vmem:[%s10650_s14 + $0x200] sm:$0xff]  ;;  %v2563_v3 = vld [vmem:[%s10650_s14 + $0x208] sm:$0xff] }
 0x54b   : > { %v10808_v26 = vrot.slane %v8690_v21, %v8225_v16  ;;  %v10809_v58 = vunpack.c.l.bf16 %v8717_v52  ;;  %v2237_v44 = vpop.f32.mrb[31].mxu1  ;;  %v2326_v37 = vpop.f32.mrb[31].mxu0  ;;  %v10810_v51 = vsub.s32 3, %v7661_v31  ;;  %v10812_v45 = vunpack.c.h.bf16 %v8717_v52 }
 0x54c   : > { %v2416_v50 = vadd.f32 %v2415_v47, %v2351_v13  ;;  %v2407_v32 = vadd.f32 %v2406_v59, %v2350_v30  ;;  %v2428_v27 = vsel %vm2424_vm0, %v2352_v38, 0.0  ;;  %v10811_v47 = vunpack.c.l.bf16 %v8728_v2  ;;  %v2581_v30 = vld [vmem:[%s10650_s14 + $0x298] sm:$0xff] }
 0x54d   : > { %v2480_v0 = vadd.f32 %v10808_v26, %v2369_v6  ;;  %v2429_v63 = vadd.f32 %v2428_v27, %v2427_v61  ;;  %v2357_v22 = vmul.f32 %v2235_v1, %v10809_v58  ;;  %v2455_v34 = vrot.slane %v8690_v21, %v10810_v51  ;;  %v2580_v61 = vld [vmem:[%s10650_s14 + $0x290] sm:$0xff]  ;;  %v2594_v26 = vld [vmem:[%s10650_s14 + $0x300] sm:$0xff]  ;;  %v2595_v58 = vld [vmem:[%s10650_s14 + $0x308] sm:$0xff] }
 0x54e   : > { %v2359_v59 = vmul.f32 %v2324_v41, %v10811_v47  ;;  %v2358_v8 = vmul.f32 %v2237_v44, %v10812_v45  ;;  %v10813_v23 = vunpack.c.h.bf16 %v8728_v2  ;;  %v2481_v53 = vadd.f32 %v2447_v9, %v2378_v49  ;;  %v2596_v47 = vld [vmem:[%s10650_s14 + $0x310] sm:$0xff] }
 0x54f   : > { %v10814_v48 = vrot.slane %v8690_v21, %v8228_v17  ;;  %v2399_v39 = vadd.f32 %v2398_v60, %v2357_v22  ;;  %v2396_v6 = vadd.f32 %v2395_v57, %v2394_v20  ;;  %v6835_v27 = vpack.c.bf16 %v2563_v3, %v2562_v14  ;;  %v2564_v20 = vld [vmem:[%s10650_s14 + $0x210] sm:$0xff]  ;;  %v2565_v57 = vld [vmem:[%s10650_s14 + $0x218] sm:$0xff]  ;;  %v2583_v14 = vld [vmem:[%s10650_s14 + $0x2a8] sm:$0xff] }
 0x550   : > { %v2360_v13 = vmul.f32 %v2326_v37, %v10813_v23  ;;  %v8801_v1 = vadd.f32 %v2416_v50, %v2359_v59  ;;  %v2408_v41 = vadd.f32 %v2407_v32, %v2358_v8  ;;  %v2489_v49 = vmax.f32 %v2481_v53, 0.0  ;;  %v2582_v32 = vld [vmem:[%s10650_s14 + $0x2a0] sm:$0xff]  ;;  %v2597_v59 = vld [vmem:[%s10650_s14 + $0x318] sm:$0xff]  ;;  %v2567_v53 = vld [vmem:[%s10650_s14 + $0x228] sm:$0xff] }
 0x551   : > { %v2482_v38 = vadd.f32 %v10814_v48, %v2387_v7  ;;  %v2488_v44 = vmax.f32 %v2480_v0, 0.0  ;;  %v2483_v7 = vadd.f32 %v2455_v34, %v2396_v6  ;;  %v6837_v60 = vpack.c.bf16 %v2581_v30, %v2580_v61  ;;  %v2584_v30 = vld [vmem:[%s10650_s14 + $0x2b0] sm:$0xff]  ;;  %v2585_v48 = vld [vmem:[%s10650_s14 + $0x2b8] sm:$0xff] }
 0x552   : > { %v2430_v9 = vsel %vm2424_vm0, %v2360_v13, 0.0  ;;  %v2409_v50 = vrot.slane %v2408_v41, 4  ;;  %2683 = vmatprep.mubr.f32.mxu1 %v2489_v49  ;;  %v6839_v34 = vpack.c.bf16 %v2565_v57, %v2564_v20  ;;  %v2400_v45 = vrot.slane %v2399_v39, 4  ;;  %v2566_v13 = vld [vmem:[%s10650_s14 + $0x220] sm:$0xff]  ;;  %v2568_v20 = vld [vmem:[%s10650_s14 + $0x230] sm:$0xff]  ;;  %v2569_v57 = vld [vmem:[%s10650_s14 + $0x238] sm:$0xff] }
 0x553   : > { %v2431_v37 = vadd.f32 %v2430_v9, %v2429_v63  ;;  %v2491_v0 = vmax.f32 %v2483_v7, 0.0  ;;  %2684 = vmatmul.mubr.f32.vlgmr.msra.gmra.mrb[32].mxu1 %v2488_v44  ;;  %v6866_v63 = vpack.c.bf16 %v2595_v58, %v2594_v26  ;;  %v2490_v22 = vmax.f32 %v2482_v38, 0.0  ;;  %v2598_v58 = vld [vmem:[%s10650_s14 + $0x320] sm:$0xff]  ;;  %v2599_v44 = vld [vmem:[%s10650_s14 + $0x328] sm:$0xff] }
 0x554   : > { %v2410_v51 = vadd.f32 %v2409_v50, %v2408_v41  ;;  %6836 = vmatpush3.bf16.msra.mxu1 %v6835_v27  ;;  %v6841_v23 = vpack.c.bf16 %v2583_v14, %v2582_v32  ;;  %v2462_v38 = vsub.s32 5, %v7661_v31  ;;  %v6869_v27 = vpack.c.bf16 %v2597_v59, %v2596_v47  ;;  %v2586_v32 = vld [vmem:[%s10650_s14 + $0x2c0] sm:$0xff]  ;;  %v2601_v47 = vld [vmem:[%s10650_s14 + $0x338] sm:$0xff] }
 0x555   : > { %v2432_v3 = vrot.slane %v2431_v37, 4  ;;  %2753 = vmatprep.mubr.f32.mxu0 %v2491_v0  ;;  %6838 = vmatprep.subr.bf16.mxu1 %v6837_v60  ;;  %v2470_v41 = vsub.s32 7, %v7661_v31  ;;  %v10815_v49 = vmov 0.0|0.0   ;;  %v6843_v26 = vpack.c.bf16 %v2567_v53, %v2566_v13  ;;  %v2570_v13 = vld [vmem:[%s10650_s14 + $0x240] sm:$0xff]  ;;  %v2571_v53 = vld [vmem:[%s10650_s14 + $0x248] sm:$0xff] }
 0x556   : > { %v2411_v61 = vrot.slane %v2410_v51, 2  ;;  %2754 = vmatmul.mubr.f32.vlgmr.msra.gmra.mrb[32].mxu0 %v2490_v22  ;;  %v6845_v60 = vpack.c.bf16 %v2585_v48, %v2584_v30  ;;  %v2418_v50 = vrot.slane %v8801_v1, 4  ;;  %v2588_v48 = vld [vmem:[%s10650_s14 + $0x2d0] sm:$0xff] }
 0x557   : > { %v2433_v8 = vadd.f32 %v2432_v3, %v2431_v37  ;;  %6867 = vmatpush1.bf16.msra.mxu0 %v6866_v63  ;;  %v2401_v37 = vadd.f32 %v2400_v45, %v2399_v39  ;;  %v2587_v39 = vld [vmem:[%s10650_s14 + $0x2c8] sm:$0xff]  ;;  %v2463_v3 = vrot.slane %v8690_v21, %v2462_v38  ;;  %v6872_v63 = vpack.c.bf16 %v2599_v44, %v2598_v58 }
 0x558   : > { %v2412_v9 = vadd.f32 %v2411_v61, %v2410_v51  ;;  %6868 = vmatprep.subr.bf16.mxu0 %v10815_v49  ;;  %6840 = vmatpush3.bf16.msra.mxu1 %v6839_v34  ;;  %v2471_v22 = vrot.slane %v8690_v21, %v2470_v41  ;;  %v6847_v51 = vpack.c.bf16 %v2569_v57, %v2568_v20  ;;  %v2600_v34 = vld [vmem:[%s10650_s14 + $0x330] sm:$0xff]  ;;  %v2603_v44 = vld [vmem:[%s10650_s14 + $0x348] sm:$0xff] }
 0x559   : > { %v2434_v6 = vrot.slane %v2433_v8, 2  ;;  %6842 = vmatprep.subr.bf16.mxu1 %v6841_v23  ;;  %v2402_v45 = vrot.slane %v2401_v37, 2  ;;  %v6849_v23 = vpack.c.bf16 %v2587_v39, %v2586_v32  ;;  %v2419_v61 = vadd.f32 %v2418_v50, %v8801_v1  ;;  %v2602_v1 = vld [vmem:[%s10650_s14 + $0x340] sm:$0xff]  ;;  %v2572_v57 = vld [vmem:[%s10650_s14 + $0x250] sm:$0xff]  ;;  %v2573_v50 = vld [vmem:[%s10650_s14 + $0x258] sm:$0xff] }
 0x55a   : > { %v2413_v14 = vrot.slane %v2412_v9, 1  ;;  %v6851_v58 = vpack.c.bf16 %v2571_v53, %v2570_v13  ;;  %v2590_v39 = vld [vmem:[%s10650_s14 + $0x2e0] sm:$0xff] }
 0x55b   : > { %v2435_v7 = vadd.f32 %v2434_v6, %v2433_v8  ;;  %6870 = vmatpush1.bf16.msra.mxu0 %v6869_v27  ;;  %v2589_v6 = vld [vmem:[%s10650_s14 + $0x2d8] sm:$0xff]  ;;  %v6875_v27 = vpack.c.bf16 %v2601_v47, %v2600_v34  ;;  %v2420_v32 = vrot.slane %v2419_v61, 2  ;;  %v2574_v34 = vld [vmem:[%s10650_s14 + $0x260] sm:$0xff]  ;;  %v2575_v47 = vld [vmem:[%s10650_s14 + $0x268] sm:$0xff] }
 0x55c   : > { %6871 = vmatprep.subr.bf16.mxu0 %v10815_v49  ;;  %6844 = vmatpush3.bf16.msra.mxu1 %v6843_v26  ;;  %v2414_v59 = vadd.f32 %v2413_v14, %v2412_v9  ;;  %v6853_v20 = vpack.c.bf16 %v2589_v6, %v2588_v48  ;;  %v6878_v14 = vpack.c.bf16 %v2603_v44, %v2602_v1  ;;  %v2466_v1 = vsub.s32 6, %v7661_v31 }
 0x55d   : > { %v2436_v0 = vrot.slane %v2435_v7, 1  ;;  %6846 = vmatprep.subr.bf16.mxu1 %v6845_v60  ;;  %v6859_v53 = vpack.c.bf16 %v2575_v47, %v2574_v34  ;;  %v2904_v34 = vld [vmem:[%s10652_s16 + $0x10] sm:$0xff]  ;;  %v2905_v47 = vld [vmem:[%s10652_s16 + $0x18] sm:$0xff] }
 0x55e   : > { %v2485_v30 = vadd.f32 %v2463_v3, %v2414_v59  ;;  %v6855_v3 = vpack.c.bf16 %v2573_v50, %v2572_v57  ;;  %v2458_v59 = vsub.s32 4, %v7661_v31 }
 0x55f   : > { %v2437_v8 = vadd.f32 %v2436_v0, %v2435_v7  ;;  %6873 = vmatpush1.bf16.msra.mxu0 %v6872_v63  ;;  %v2403_v7 = vadd.f32 %v2402_v45, %v2401_v37  ;;  %v2591_v37 = vld [vmem:[%s10650_s14 + $0x2e8] sm:$0xff]  ;;  %v2604_v0 = vld [vmem:[%s10650_s14 + $0x350] sm:$0xff]  ;;  %v2605_v63 = vld [vmem:[%s10650_s14 + $0x358] sm:$0xff]  ;;  %v2421_v45 = vadd.f32 %v2420_v32, %v2419_v61  ;;  %v2467_v32 = vrot.slane %v8690_v21, %v2466_v1 }
 0x560   : > { %6874 = vmatprep.subr.bf16.mxu0 %v10815_v49  ;;  %6848 = vmatpush3.bf16.msra.mxu1 %v6847_v51  ;;  %v2493_v26 = vmax.f32 %v2485_v30, 0.0  ;;  %v6857_v51 = vpack.c.bf16 %v2591_v37, %v2590_v39  ;;  %v6881_v13 = vpack.c.bf16 %v2605_v63, %v2604_v0  ;;  %v2606_v30 = vld [vmem:[%s10650_s14 + $0x360] sm:$0xff]  ;;  %v2607_v61 = vld [vmem:[%s10650_s14 + $0x368] sm:$0xff] }
 0x561   : > { %v2487_v9 = vadd.f32 %v2471_v22, %v2437_v8  ;;  %6850 = vmatprep.subr.bf16.mxu1 %v6849_v23  ;;  %v2404_v22 = vrot.slane %v2403_v7, 1  ;;  %v2592_v8 = vld [vmem:[%s10650_s14 + $0x2f0] sm:$0xff]  ;;  %v2593_v23 = vld [vmem:[%s10650_s14 + $0x2f8] sm:$0xff]  ;;  %v6884_v44 = vpack.c.bf16 %v2607_v61, %v2606_v30  ;;  %v2610_v0 = vld [vmem:[%s10650_s14 + $0x380] sm:$0xf] }
 0x562   : > { %2823 = vmatprep.mubr.f32.mxu1 %v2493_v26  ;;  %v6861_v6 = vpack.c.bf16 %v2593_v23, %v2592_v8  ;;  %v2459_v26 = vrot.slane %v8690_v21, %v2458_v59  ;;  %v2902_v21 = vld [vmem:[%s10652_s16] sm:$0xff]  ;;  %v2983_v8 = vld [vmem:[%s10654_s18 + $0x8] sm:$0xff]  ;;  %v2993_v30 = vld [vmem:[%s10654_s18 + $0x58] sm:$0xff] }
 0x563   : > { %v2495_v60 = vmax.f32 %v2487_v9, 0.0  ;;  %6876 = vmatpush1.bf16.msra.mxu0 %v6875_v27  ;;  %v2405_v48 = vadd.f32 %v2404_v22, %v2403_v7  ;;  %v2576_v27 = vld [vmem:[%s10650_s14 + $0x270] sm:$0xff]  ;;  %v2577_v9 = vld [vmem:[%s10650_s14 + $0x278] sm:$0xff]  ;;  %v2903_v22 = vld [vmem:[%s10652_s16 + $0x8] sm:$0xff] }
 0x564   : > { %6877 = vmatprep.subr.bf16.mxu0 %v10815_v49  ;;  %6852 = vmatpush3.bf16.msra.mxu1 %v6851_v58  ;;  %v2422_v58 = vrot.slane %v2421_v45, 1  ;;  %v6863_v7 = vpack.c.bf16 %v2577_v9, %v2576_v27  ;;  %v2991_v23 = vld [vmem:[%s10654_s18 + $0x48] sm:$0xff]  ;;  %v3001_v9 = vld [vmem:[%s10654_s18 + $0x98] sm:$0xff] }
 0x565   : > { %5397 = vmatprep.mubr.msk.f32.mxu0 %vm2424_vm0, %v2495_v60  ;;  %6854 = vmatprep.subr.bf16.mxu1 %v6853_v20  ;;  %v2608_v60 = vld [vmem:[%s10650_s14 + $0x370] sm:$0xff]  ;;  %v2609_v20 = vld [vmem:[%s10650_s14 + $0x378] sm:$0xff]  ;;  %v2484_v57 = vadd.f32 %v2459_v26, %v2405_v48 }
 0x566   : > { %v2423_v50 = vadd.f32 %v2422_v58, %v2421_v45  ;;  %v6887_v39 = vpack.c.bf16 %v2609_v20, %v2608_v60  ;;  %v6893_v45 = vpack.c.bf16 %v2905_v47, %v2904_v34  ;;  %v2984_v48 = vld [vmem:[%s10654_s18 + $0x10] sm:$0xff]  ;;  %v3009_v26 = vld [vmem:[%s10654_s18 + $0xd8] sm:$0xff] }
 0x567   : > { %6879 = vmatpush1.bf16.msra.mxu0 %v6878_v14  ;;  %v2492_v37 = vmax.f32 %v2484_v57, 0.0  ;;  %v6915_v58 = vpack.c.bf16 %v3009_v26, %v3001_v9  ;;  %v3017_v20 = vld [vmem:[%s10654_s18 + $0x118] sm:$0xff]  ;;  %v2982_v9 = vld [vmem:[%s10654_s18] sm:$0xff] }
 0x568   : > { %6880 = vmatprep.subr.bf16.mxu0 %v10815_v49  ;;  %6856 = vmatpush3.bf16.msra.mxu1 %v6855_v3  ;;  %v2486_v14 = vadd.f32 %v2467_v32, %v2423_v50  ;;  %v10816_v3 = vmov 0.0   ;;  %v3025_v57 = vld [vmem:[%s10654_s18 + $0x158] sm:$0xff]  ;;  %v3016_v32 = vld [vmem:[%s10654_s18 + $0x110] sm:$0xff]  ;;  %v2990_v26 = vld [vmem:[%s10654_s18 + $0x40] sm:$0xff] }
 0x569   : > { %6858 = vmatprep.subr.bf16.mxu1 %v6857_v51  ;;  %v6890_v51 = vpack.c.bf16 %v2903_v22, %v2902_v21  ;;  %v6919_v50 = vpack.c.bf16 %v3025_v57, %v3017_v20 }
 0x56a   : > { %v2494_v63 = vmax.f32 %v2486_v14, 0.0 }
 0x56b   : > { %6882 = vmatpush1.bf16.msra.mxu0 %v6881_v13  ;;  %v2985_v13 = vld [vmem:[%s10654_s18 + $0x18] sm:$0xff] }
 0x56c   : > { %6883 = vmatprep.subr.bf16.mxu0 %v10815_v49  ;;  %6860 = vmatpush3.bf16.msra.mxu1 %v6859_v53  ;;  %v6895_v53 = vpack.c.bf16 %v2991_v23, %v2983_v8  ;;  %v6911_v61 = vpack.c.bf16 %v2993_v30, %v2985_v13 }
 0x56d   : > { %6862 = vmatprep.subr.bf16.mxu1 %v6861_v6  ;;  %v2992_v6 = vld [vmem:[%s10654_s18 + $0x50] sm:$0xff] }
 0x56e   : > { %v6913_v27 = vpack.c.bf16 %v2992_v6, %v2984_v48  ;;  %v2497_v6 = vld [vmem:[%s2496_s1] sm:$0x1]  ;;  %s9556_s1 = sld [smem:[#allocation2 + $0x1]] }
 0x56f   : > { %6885 = vmatpush1.bf16.msra.mxu0 %v6884_v44  ;;  %v3000_v44 = vld [vmem:[%s10654_s18 + $0x90] sm:$0xff] }
 0x570   : > { %6886 = vmatprep.subr.bf16.mxu0 %v10815_v49  ;;  %6864 = vmatpush3.bf16.msra.mxu1 %v6863_v7  ;;  %v3008_v7 = vld [vmem:[%s10654_s18 + $0xd0] sm:$0xff] }
 0x571   : > { %6889 = vmatprep.subr.bf16.mxu1 %v10815_v49  ;;  %v6917_v60 = vpack.c.bf16 %v3008_v7, %v3000_v44  ;;  %v3007_v44 = vld [vmem:[%s10654_s18 + $0xc8] sm:$0xff] }
 0x573   : > { %6888 = vmatpush1.bf16.msra.mxu0 %v6887_v39  ;;  %2824 = vmatmul.mubr.f32.vlgmr.msra.gmra.mrb[34].mxu1 %v2492_v37  ;;  %v3024_v39 = vld [vmem:[%s10654_s18 + $0x150] sm:$0xff] }
 0x574   : > { %2861 = vmatprep.subr.mxu0 %v10816_v3  ;;  %6891 = vmatpush3.bf16.msra.mxu1 %v6890_v51  ;;  %v6921_v37 = vpack.c.bf16 %v3024_v39, %v3016_v32  ;;  %v3006_v32 = vld [vmem:[%s10654_s18 + $0xc0] sm:$0xff]  ;;  %v3015_v39 = vld [vmem:[%s10654_s18 + $0x108] sm:$0xff] }
 0x575   : > { %6497 = vmatprep.mubr.msk.f32.mxu1 %vm7431_vm2, %v10816_v3  ;;  %6892 = vmatprep.subr.bf16.mxu1 %v10815_v49 }
 0x577   : > { %5396 = vmatpush1.msk.msra.mxu0 %vm10719_vm11, %v2610_v0  ;;  %v2611_v0 = vld [vmem:[%s10651_s15] sm:$0x1] }
 0x578   : > { %2894 = vmatmul.mubr.f32.vlgmr.msra.gmra.mrb[34].mxu0 %v2494_v63  ;;  %6894 = vmatpush3.bf16.msra.mxu1 %v6893_v45 }
 0x579   : > { %3227 = vmatprep.mubr.f32.mxu0 %v10816_v3  ;;  %6896 = vmatprep.subr.bf16.mxu1 %v6895_v53 }
 0x57a   : > { %6912 = vmatprep.subr.bf16.mxu0 %v6911_v61 }
 0x57b   : > { %6914 = vmatpush1.bf16.msra.mxu0 %v6913_v27 }
 0x57c   : > { %6916 = vmatprep.subr.bf16.mxu0 %v6915_v58  ;;  %v2999_v58 = vld [vmem:[%s10654_s18 + $0x88] sm:$0xff] }
 0x57d   : > { %v6899_v57 = vpack.c.bf16 %v3007_v44, %v2999_v58  ;;  %v2997_v58 = vld [vmem:[%s10654_s18 + $0x78] sm:$0xff] }
 0x57f   : > { %6918 = vmatpush1.bf16.msra.mxu0 %v6917_v60  ;;  %v6897_v60 = vpack.c.bf16 %v2990_v26, %v2982_v9  ;;  %v2995_v9 = vld [vmem:[%s10654_s18 + $0x68] sm:$0xff]  ;;  %v2989_v26 = vld [vmem:[%s10654_s18 + $0x38] sm:$0xff] }
 0x580   : > { %6920 = vmatprep.subr.bf16.mxu0 %v6919_v50  ;;  %v2998_v50 = vld [vmem:[%s10654_s18 + $0x80] sm:$0xff] }
 0x583   : > { %6922 = vmatpush1.bf16.msra.mxu0 %v6921_v37  ;;  %v3023_v37 = vld [vmem:[%s10654_s18 + $0x148] sm:$0xff] }
 0x626   : > { %v6039_v14 = vpop.f32.mrb[32].mxu1 }
 0x627   : > { %v6040_v63 = vpop.f32.mrb[33].mxu1 }
 0x628   : > { %v6041_v21 = vadd.f32 %v6040_v63, %v6039_v14  ;;  %v6901_v14 = vpack.c.bf16 %v3006_v32, %v2998_v50  ;;  %v3014_v63 = vld [vmem:[%s10654_s18 + $0x100] sm:$0xff]  ;;  %v2988_v50 = vld [vmem:[%s10654_s18 + $0x30] sm:$0xff] }
 0x629   : > { %v6074_v22 = vpop.f32.mrb[32].mxu0  ;;  %v2996_v32 = vld [vmem:[%s10654_s18 + $0x70] sm:$0xff] }
 0x62a   : > { %v2686_v51 = vadd.f32 %v6041_v21, %v2611_v0  ;;  %v6075_v34 = vpop.f32.mrb[33].mxu0  ;;  %v6903_v0 = vpack.c.bf16 %v3023_v37, %v3015_v39  ;;  %v3022_v21 = vld [vmem:[%s10654_s18 + $0x140] sm:$0xff]  ;;  %v3003_v39 = vld [vmem:[%s10654_s18 + $0xa8] sm:$0xff] }
 0x62b   : > { %v6076_v47 = vadd.f32 %v6075_v34, %v6074_v22  ;;  %v6905_v22 = vpack.c.bf16 %v3022_v21, %v3014_v63  ;;  %v3039_v34 = vld [vmem:[%s10654_s18 + $0x1c8] sm:$0xff]  ;;  %v3013_v63 = vld [vmem:[%s10654_s18 + $0xf8] sm:$0xff] }
 0x62d   : > { %v2756_v45 = vadd.f32 %v6076_v47, %v2686_v51  ;;  %v3031_v51 = vld [vmem:[%s10654_s18 + $0x188] sm:$0xff]  ;;  %v3033_v47 = vld [vmem:[%s10654_s18 + $0x198] sm:$0xff] }
 0x646   : > { %v6109_v8 = vpop.f32.mrb[34].mxu1 }
 0x647   : > { %v6110_v23 = vpop.f32.mrb[35].mxu1 }
 0x648   : > { %v6111_v13 = vadd.f32 %v6110_v23, %v6109_v8  ;;  %v3041_v8 = vld [vmem:[%s10654_s18 + $0x1d8] sm:$0xff]  ;;  %v3030_v23 = vld [vmem:[%s10654_s18 + $0x180] sm:$0xff] }
 0x64a   : > { %v2826_v53 = vadd.f32 %v6111_v13, %v2756_v45  ;;  %v6907_v45 = vpack.c.bf16 %v3039_v34, %v3031_v51  ;;  %v3038_v13 = vld [vmem:[%s10654_s18 + $0x1c0] sm:$0xff]  ;;  %v6945_v34 = vpack.c.bf16 %v2996_v32, %v2988_v50  ;;  %v3035_v50 = vld [vmem:[%s10654_s18 + $0x1a8] sm:$0xff] }
 0x64b   : > { %v2895_v30 = vpop.f32.mrb[34].mxu0  ;;  %v3043_v32 = vld [vmem:[%s10654_s18 + $0x1e8] sm:$0xff] }
 0x64c   : > { %v2896_v61 = vadd.f32 %v2895_v30, %v2826_v53  ;;  %v2897_v48 = vpop.f32.mrb[35].mxu0  ;;  %v6923_v53 = vpack.c.bf16 %v3041_v8, %v3033_v47  ;;  %v6909_v30 = vpack.c.bf16 %v3038_v13, %v3030_v23  ;;  %v3002_v47 = vld [vmem:[%s10654_s18 + $0xa0] sm:$0xff] }
 0x64d   : > { %v3040_v48 = vld [vmem:[%s10654_s18 + $0x1d0] sm:$0xff] }
 0x64e   : > { %v2899_v27 = vmax.f32 %v2896_v61, 0.0  ;;  %v3032_v61 = vld [vmem:[%s10654_s18 + $0x190] sm:$0xff]  ;;  %6924 = vmatprep.subr.bf16.mxu0 %v6923_v53 }
 0x64f   : > { %v3004_v53 = vld [vmem:[%s10654_s18 + $0xb0] sm:$0xff] }
 0x650   : > { %v2900_v7 = vadd.f32 %v2899_v27, %v2497_v6  ;;  %v2987_v6 = vld [vmem:[%s10654_s18 + $0x28] sm:$0xff]  ;;  %v6925_v27 = vpack.c.bf16 %v3040_v48, %v3032_v61 }
 0x651   : > { %v6927_v44 = vpack.c.bf16 %v2995_v9, %v2987_v6  ;;  %v3019_v61 = vld [vmem:[%s10654_s18 + $0x128] sm:$0xff]  ;;  %v3021_v6 = vld [vmem:[%s10654_s18 + $0x138] sm:$0xff] }
 0x652   : > { %v2901_v20 = vmax.f32 %v2900_v7, 0.0  ;;  %v6943_v7 = vpack.c.bf16 %v2997_v58, %v2989_v26  ;;  %6926 = vmatpush1.bf16.msra.mxu0 %v6925_v27  ;;  %v3027_v48 = vld [vmem:[%s10654_s18 + $0x168] sm:$0xff]  ;;  %v3029_v27 = vld [vmem:[%s10654_s18 + $0x178] sm:$0xff]  ;;  %v3018_v58 = vld [vmem:[%s10654_s18 + $0x120] sm:$0xff] }
 0x654   : > { %6498 = vmatmul.mubr.msk.f32.vlgmr.msra.gmra.mrb[36].mxu1 %vm2907_vm3, %v2901_v20  ;;  %6944 = vmatprep.subr.bf16.mxu0 %v6943_v7  ;;  %v2986_v20 = vld [vmem:[%s10654_s18 + $0x20] sm:$0xff]  ;;  %v6935_v7 = vpack.c.bf16 %v3027_v48, %v3019_v61  ;;  %v5883_v48 = vld [vmem:[%s10649_s13 + $0x48] sm:$0xff]  }
 0x655   : > { %6898 = vmatpush1.bf16.msra.mxu1 %v6897_v60  ;;  %3156 = vmatprep.mubr.f32.mxu1 %v10816_v3  ;;  %v2906_v60 = vld [vmem:[%s10653_s17] sm:$0x1] }
 0x656   : > { %6900 = vmatprep.subr.bf16.mxu1 %v6899_v57  ;;  %v2994_v57 = vld [vmem:[%s10654_s18 + $0x60] sm:$0xff] }
 0x657   : > { %v6929_v51 = vpack.c.bf16 %v2994_v57, %v2986_v20  ;;  %v3020_v20 = vld [vmem:[%s10654_s18 + $0x130] sm:$0xff]  ;;  %v5890_v61 = vld [vmem:[%s10649_s13 + $0x80] sm:$0xff]  }
 0x658   : > { %v3028_v57 = vld [vmem:[%s10654_s18 + $0x170] sm:$0xff] }
 0x659   : > { %6902 = vmatpush1.bf16.msra.mxu1 %v6901_v14  ;;  %v3011_v14 = vld [vmem:[%s10654_s18 + $0xe8] sm:$0xff] }
 0x65a   : > { %6904 = vmatprep.subr.bf16.mxu1 %v6903_v0  ;;  %v3005_v0 = vld [vmem:[%s10654_s18 + $0xb8] sm:$0xff]  ;;  %v6931_v23 = vpack.c.bf16 %v3011_v14, %v3003_v39 }
 0x65b   : > { %v6947_v13 = vpack.c.bf16 %v3013_v63, %v3005_v0  ;;  %v3037_v39 = vld [vmem:[%s10654_s18 + $0x1b8] sm:$0xff]  ;;  %v6953_v0 = vpack.c.bf16 %v3028_v57, %v3020_v20  ;;  %v3034_v63 = vld [vmem:[%s10654_s18 + $0x1a0] sm:$0xff] }
 0x65c   : > { %v5877_v20 = vld [vmem:[%s10649_s13 + $0x18] sm:$0xff]  }
 0x65d   : > { %6906 = vmatpush1.bf16.msra.mxu1 %v6905_v22  ;;  %v5893_v57 = vld [vmem:[%s10649_s13 + $0x98] sm:$0xff]  }
 0x65e   : > { %6908 = vmatprep.subr.bf16.mxu1 %v6907_v45  ;;  %v3010_v45 = vld [vmem:[%s10654_s18 + $0xe0] sm:$0xff] }
 0x65f   : > { %v6933_v9 = vpack.c.bf16 %v3010_v45, %v3002_v47  ;;  %v3044_v47 = vld [vmem:[%s10654_s18 + $0x1f0] sm:$0xff] }
 0x661   : > { %6910 = vmatpush1.bf16.msra.mxu1 %v6909_v30  ;;  %v3012_v30 = vld [vmem:[%s10654_s18 + $0xf0] sm:$0xff] }
 0x662   : > { %6928 = vmatprep.subr.bf16.mxu1 %v6927_v44  ;;  %v6949_v26 = vpack.c.bf16 %v3012_v30, %v3004_v53  ;;  %v3026_v44 = vld [vmem:[%s10654_s18 + $0x160] sm:$0xff] }
 0x663   : > { %v6937_v14 = vpack.c.bf16 %v3026_v44, %v3018_v58  ;;  %v5898_v53 = vld [vmem:[%s10649_s13 + $0xc0] sm:$0xff]   ;;  %v5876_v58 = vld [vmem:[%s10649_s13 + $0x10] sm:$0xff]  }
 0x664   : > { %v5631_v30 = vld [vmem:[%s10649_s13] sm:$0xff]   ;;  %v5892_v44 = vld [vmem:[%s10649_s13 + $0x90] sm:$0xff]  }
 0x727   : > { %v2977_v37 = vpop.f32.mrb[36].mxu1 }
 0x728   : > { %v2978_v21 = vadd.f32 %v2977_v37, %v2906_v60  ;;  %v6499_v22 = vpop.f32.mrb[37].mxu1  ;;  %v6951_v60 = vpack.c.bf16 %v3029_v27, %v3021_v6  ;;  %v3045_v37 = vld [vmem:[%s10654_s18 + $0x1f8] sm:$0xff]  ;;  %v5899_v6 = vld [vmem:[%s10649_s13 + $0xc8] sm:$0xff]  }
 0x729   : > { %v6955_v22 = vpack.c.bf16 %v3045_v37, %v3037_v39  ;;  %v5875_v27 = vld [vmem:[%s10649_s13 + $0x8] sm:$0xff]   ;;  %v5878_v39 = vld [vmem:[%s10649_s13 + $0x20] sm:$0xff]  }
 0x72a   : > { %v2981_v8 = vmax.f32 %v2978_v21, 0.0  ;;  %v6939_v21 = vpack.c.bf16 %v3043_v32, %v3035_v50  ;;  %v5886_v50 = vld [vmem:[%s10649_s13 + $0x60] sm:$0xff]  }
 0x72b   : > { %v5902_v32 = vld [vmem:[%s10649_s13 + $0xe0] sm:$0xff]  }
 0x72c   : > { %5399 = vmatmul.mubr.msk.f32.vlgmr.msra.gmra.mrb[38].mxu1 %vm3088_vm5, %v2981_v8  ;;  %5400 = vmatmul.mubr.msk.f32.vlgmr.msra.gmra.mrb[36].mxu0 %vm3088_vm5, %v2981_v8  ;;  %v5894_v37 = vld [vmem:[%s10649_s13 + $0xa0] sm:$0xff]  }
 0x72d   : > { %6930 = vmatpush1.bf16.msra.mxu1 %v6929_v51  ;;  %6946 = vmatpush1.bf16.msra.mxu0 %v6945_v34  ;;  %v3042_v51 = vld [vmem:[%s10654_s18 + $0x1e0] sm:$0xff]  ;;  %v3036_v34 = vld [vmem:[%s10654_s18 + $0x1b0] sm:$0xff] }
 0x72e   : > { %6932 = vmatprep.subr.bf16.mxu1 %v6931_v23  ;;  %6948 = vmatprep.subr.bf16.mxu0 %v6947_v13  ;;  %v6941_v45 = vpack.c.bf16 %v3042_v51, %v3034_v63  ;;  %v6957_v23 = vpack.c.bf16 %v3044_v47, %v3036_v34  ;;  %v5882_v13 = vld [vmem:[%s10649_s13 + $0x40] sm:$0xff]   ;;  %v5879_v63 = vld [vmem:[%s10649_s13 + $0x28] sm:$0xff]   ;;  %v5904_v51 = vld [vmem:[%s10649_s13 + $0xf0] sm:$0xff]  }
 0x72f   : > { %3298 = vmatprep.mubr.f32.mxu1 %v10816_v3  ;;  %3369 = vmatprep.mubr.f32.mxu0 %v10816_v3  ;;  %v5880_v34 = vld [vmem:[%s10649_s13 + $0x30] sm:$0xff]  }
 0x730   : > { %v5896_v47 = vld [vmem:[%s10649_s13 + $0xb0] sm:$0xff]  }
 0x731   : > { %6934 = vmatpush1.bf16.msra.mxu1 %v6933_v9  ;;  %6950 = vmatpush1.bf16.msra.mxu0 %v6949_v26  ;;  %v5891_v9 = vld [vmem:[%s10649_s13 + $0x88] sm:$0xff]   ;;  %v5884_v26 = vld [vmem:[%s10649_s13 + $0x50] sm:$0xff]  }
 0x732   : > { %6936 = vmatprep.subr.bf16.mxu1 %v6935_v7  ;;  %6952 = vmatprep.subr.bf16.mxu0 %v6951_v60  ;;  %v5885_v7 = vld [vmem:[%s10649_s13 + $0x58] sm:$0xff]  }
 0x733   : > { %v5901_v60 = vld [vmem:[%s10649_s13 + $0xd8] sm:$0xff]  }
 0x735   : > { %6938 = vmatpush1.bf16.msra.mxu1 %v6937_v14  ;;  %6954 = vmatpush1.bf16.msra.mxu0 %v6953_v0  ;;  %v5887_v14 = vld [vmem:[%s10649_s13 + $0x68] sm:$0xff]  }
 0x736   : > { %6940 = vmatprep.subr.bf16.mxu1 %v6939_v21  ;;  %6956 = vmatprep.subr.bf16.mxu0 %v6955_v22  ;;  %v5903_v0 = vld [vmem:[%s10649_s13 + $0xe8] sm:$0xff]   ;;  %v5888_v22 = vld [vmem:[%s10649_s13 + $0x70] sm:$0xff]  }
 0x737   : > { %v5895_v21 = vld [vmem:[%s10649_s13 + $0xa8] sm:$0xff]  }
 0x739   : > { %6942 = vmatpush1.bf16.msra.mxu1 %v6941_v45  ;;  %6958 = vmatpush1.bf16.msra.mxu0 %v6957_v23  ;;  %v5889_v45 = vld [vmem:[%s10649_s13 + $0x78] sm:$0xff]  }
 0x73a   : > { %6960 = vmatprep.subr.bf16.mxu1 %v5882_v13  ;;  %6992 = vmatprep.subr.bf16.mxu0 %v5898_v53  ;;  %v5905_v23 = vld [vmem:[%s10649_s13 + $0xf8] sm:$0xff]  }
 0x73b   : > { %v5881_v13 = vld [vmem:[%s10649_s13 + $0x38] sm:$0xff]  }
 0x73c   : > { %5401 = vmatmul.mubr.msk.f32.vlgmr.msra.gmra.mrb[40].mxu1 %vm3088_vm5, %v2981_v8  ;;  %5402 = vmatmul.mubr.msk.f32.vlgmr.msra.gmra.mrb[38].mxu0 %vm3088_vm5, %v2981_v8  ;;  %v5900_v8 = vld [vmem:[%s10649_s13 + $0xd0] sm:$0xff]   ;;  %v5897_v53 = vld [vmem:[%s10649_s13 + $0xb8] sm:$0xff]  }
 0x73d   : > { %6962 = vmatpush3.bf16.msra.mxu1 %v5631_v30  ;;  %6994 = vmatpush3.bf16.msra.mxu0 %v5890_v61  ;;  %v5914_v30 = vld [vmem:[%s10649_s13 + $0x140] sm:$0xff]  }
 0x73e   : > { %6964 = vmatprep.subr.bf16.mxu1 %v5883_v48  ;;  %6996 = vmatprep.subr.bf16.mxu0 %v5899_v6  ;;  %v9289_v61 = vld [vmem:[%s10655_s19] sm:$0xff] }
 0x73f   : > { %v3051_v48 = vrot.slane %v9289_v61, %v8225_v16  ;;  %v3059_v6 = vrot.slane %v9289_v61, %v8228_v17 }
 0x741   : > { %6966 = vmatpush3.bf16.msra.mxu1 %v5875_v27  ;;  %6998 = vmatpush3.bf16.msra.mxu0 %v5891_v9  ;;  %v3055_v27 = vrot.slane %v9289_v61, %v8234_v18  ;;  %v10818_v9 = vsub.s32 3, %v7661_v31 }
 0x742   : > { %6968 = vmatprep.subr.bf16.mxu1 %v5884_v26  ;;  %7000 = vmatprep.subr.bf16.mxu0 %v5900_v8 }
 0x743   : > { %v3063_v26 = vrot.slane %v9289_v61, %v10818_v9 }
 0x745   : > { %6970 = vmatpush3.bf16.msra.mxu1 %v5876_v58  ;;  %7002 = vmatpush3.bf16.msra.mxu0 %v5892_v44 }
 0x746   : > { %6972 = vmatprep.subr.bf16.mxu1 %v5885_v7  ;;  %7004 = vmatprep.subr.bf16.mxu0 %v5901_v60 }
 0x749   : > { %6974 = vmatpush3.bf16.msra.mxu1 %v5877_v20  ;;  %7006 = vmatpush3.bf16.msra.mxu0 %v5893_v57 }
 0x74a   : > { %6976 = vmatprep.subr.bf16.mxu1 %v5886_v50  ;;  %7008 = vmatprep.subr.bf16.mxu0 %v5902_v32 }
 0x74d   : > { %6978 = vmatpush3.bf16.msra.mxu1 %v5878_v39  ;;  %7010 = vmatpush3.bf16.msra.mxu0 %v5894_v37 }
 0x74e   : > { %6980 = vmatprep.subr.bf16.mxu1 %v5887_v14  ;;  %7012 = vmatprep.subr.bf16.mxu0 %v5903_v0 }
 0x751   : > { %6982 = vmatpush3.bf16.msra.mxu1 %v5879_v63  ;;  %7014 = vmatpush3.bf16.msra.mxu0 %v5895_v21 }
 0x752   : > { %6984 = vmatprep.subr.bf16.mxu1 %v5888_v22  ;;  %7016 = vmatprep.subr.bf16.mxu0 %v5904_v51  ;;  %v10819_v51 = vunpack.c.h.bf16 %v8592_v19 }
 0x755   : > { %6986 = vmatpush3.bf16.msra.mxu1 %v5880_v34  ;;  %7018 = vmatpush3.bf16.msra.mxu0 %v5896_v47  ;;  %v10820_v47 = vunpack.c.h.bf16 %v8597_v46 }
 0x756   : > { %6988 = vmatprep.subr.bf16.mxu1 %v5889_v45  ;;  %7020 = vmatprep.subr.bf16.mxu0 %v5905_v23  ;;  %v10821_v23 = vunpack.c.l.bf16 %v8592_v19  ;;  %v10824_v19 = vunpack.c.h.bf16 %v8607_v43 }
 0x759   : > { %6990 = vmatpush3.bf16.msra.mxu1 %v5881_v13  ;;  %7022 = vmatpush3.bf16.msra.mxu0 %v5897_v53  ;;  %v10822_v53 = vunpack.c.l.bf16 %v8597_v46  ;;  %v5915_v46 = vld [vmem:[%s10649_s13 + $0x148] sm:$0xff]  }
 0x75a   : > { %7024 = vmatprep.subr.bf16.mxu1 %v5914_v30  ;;  %7055 = vmatprep.subr.bf16.mxu0 %v10815_v49 }
 0x7ff   : > { %v3158_v8 = vpop.f32.mrb[38].mxu1  ;;  %v3229_v58 = vpop.f32.mrb[36].mxu0 }
 0x800   : > { %v3159_v44 = vadd.f32 %v3158_v8, %v3051_v48  ;;  %v3230_v7 = vadd.f32 %v3229_v58, %v3059_v6  ;;  %v3160_v60 = vpop.f32.mrb[39].mxu1  ;;  %v3231_v20 = vpop.f32.mrb[37].mxu0  ;;  %v5906_v48 = vld [vmem:[%s10649_s13 + $0x100] sm:$0xff]   ;;  %v10825_v8 = vunpack.c.l.bf16 %v8602_v40 }
 0x801   : > { %v3161_v57 = vadd.f32 %v3160_v60, %v3055_v27  ;;  %v3232_v50 = vadd.f32 %v3231_v20, %v3063_v26  ;;  %v5922_v6 = vld [vmem:[%s10649_s13 + $0x180] sm:$0xff]   ;;  %v10823_v27 = vunpack.c.h.bf16 %v8602_v40  ;;  %v5907_v60 = vld [vmem:[%s10649_s13 + $0x108] sm:$0xff]   ;;  %v3079_v40 = vrot.slane %v9289_v61, %v2470_v41 }
 0x802   : > { %v3376_v32 = vmax.f32 %v3159_v44, 0.0  ;;  %v3378_v39 = vmax.f32 %v3230_v7, 0.0  ;;  %v10826_v44 = vunpack.c.l.bf16 %v8607_v43  ;;  %v5923_v20 = vld [vmem:[%s10649_s13 + $0x188] sm:$0xff]   ;;  %v10827_v43 = vunpack.c.h.bf16 %v8616_v55 }
 0x803   : > { %v3377_v37 = vmax.f32 %v3161_v57, 0.0  ;;  %v3379_v14 = vmax.f32 %v3232_v50, 0.0  ;;  %v3071_v57 = vrot.slane %v9289_v61, %v2462_v38  ;;  %v10829_v41 = vunpack.c.l.bf16 %v8616_v55 }
 0x804   : > { %v3387_v0 = vrot.slane %v3376_v32, %v8225_v16  ;;  %v3395_v63 = vrot.slane %v3378_v39, %v8225_v16  ;;  %v10828_v32 = vunpack.c.h.bf16 %v8621_v56  ;;  %v10831_v55 = vunpack.c.h.bf16 %v8640_v28 }
 0x805   : > { %v3391_v21 = vrot.slane %v3377_v37, %v8225_v16  ;;  %v3399_v22 = vrot.slane %v3379_v14, %v8225_v16  ;;  %v5916_v37 = vld [vmem:[%s10649_s13 + $0x150] sm:$0xff]  }
 0x806   : > { %v3416_v13 = vmul.f32 %v3387_v0, %v10821_v23  ;;  %v3418_v30 = vmul.f32 %v3395_v63, %v10822_v53  ;;  %v3424_v58 = vmul.f32 %v3387_v0, %v10825_v8  ;;  %v3426_v7 = vmul.f32 %v3395_v63, %v10826_v44  ;;  %v5924_v53 = vld [vmem:[%s10649_s13 + $0x190] sm:$0xff]  }
 0x807   : > { %v3417_v34 = vmul.f32 %v3391_v21, %v10819_v51  ;;  %v3419_v45 = vmul.f32 %v3399_v22, %v10820_v47  ;;  %v3425_v9 = vmul.f32 %v3391_v21, %v10823_v27  ;;  %v3427_v26 = vmul.f32 %v3399_v22, %v10824_v19 }
 0x808   : > { %v3433_v50 = vmul.f32 %v3391_v21, %v10827_v43  ;;  %v3435_v39 = vmul.f32 %v3399_v22, %v10828_v32  ;;  %v3432_v47 = vmul.f32 %v3387_v0, %v10829_v41  ;;  %v5926_v43 = vld [vmem:[%s10649_s13 + $0x1a0] sm:$0xff]   ;;  %v5921_v41 = vld [vmem:[%s10649_s13 + $0x178] sm:$0xff]  }
 0x809   : > { %3753 = vmatprep.mubr.f32.mxu1 %v3417_v34  ;;  %3838 = vmatprep.mubr.f32.mxu0 %v3419_v45  ;;  %v10830_v45 = vunpack.c.l.bf16 %v8621_v56  ;;  %v10832_v56 = vunpack.c.h.bf16 %v8645_v29 }
 0x80a   : > { %3754 = vmatmul.mubr.f32.vlgmr.msra.gmra.mrb[42].mxu1 %v3416_v13  ;;  %3839 = vmatmul.mubr.f32.vlgmr.msra.gmra.mrb[40].mxu0 %v3418_v30  ;;  %v5908_v13 = vld [vmem:[%s10649_s13 + $0x110] sm:$0xff]  }
 0x80b   : > { %7026 = vmatpush3.bf16.msra.mxu1 %v5906_v48  ;;  %7057 = vmatpush1.bf16.msra.mxu0 %v5922_v6  ;;  %v3434_v23 = vmul.f32 %v3395_v63, %v10830_v45  ;;  %v3441_v6 = vmul.f32 %v3391_v21, %v10831_v55  ;;  %v3443_v27 = vmul.f32 %v3399_v22, %v10832_v56  ;;  %v5909_v21 = vld [vmem:[%s10649_s13 + $0x118] sm:$0xff]   ;;  %v10838_v55 = vunpack.c.h.bf16 %v8672_v15 }
 0x80c   : > { %3758 = vmatprep.mubr.f32.mxu1 %v3425_v9  ;;  %3843 = vmatprep.mubr.f32.mxu0 %v3427_v26  ;;  %v5917_v9 = vld [vmem:[%s10649_s13 + $0x158] sm:$0xff]   ;;  %v10839_v56 = vunpack.c.l.bf16 %v8663_v36 }
 0x80d   : > { %7028 = vmatprep.subr.bf16.mxu1 %v5915_v46  ;;  %7058 = vmatprep.subr.bf16.mxu0 %v10815_v49  ;;  %v10833_v46 = vunpack.c.l.bf16 %v8640_v28  ;;  %v5925_v22 = vld [vmem:[%s10649_s13 + $0x198] sm:$0xff]   ;;  %v5918_v28 = vld [vmem:[%s10649_s13 + $0x160] sm:$0xff]  }
 0x80e   : > { %3759 = vmatmul.mubr.f32.gmra.mrb[44].mxu1 %v3424_v58  ;;  %3844 = vmatmul.mubr.f32.gmra.mrb[42].mxu0 %v3426_v7  ;;  %v10834_v58 = vunpack.c.l.bf16 %v8645_v29  ;;  %v10835_v29 = vunpack.c.h.bf16 %v8658_v35  ;;  %v5913_v45 = vld [vmem:[%s10649_s13 + $0x138] sm:$0xff]  }
 0x80f   : > { %v3300_v14 = vpop.f32.mrb[40].mxu1  ;;  %v3371_v51 = vpop.f32.mrb[38].mxu0  ;;  %7030 = vmatpush3.bf16.msra.mxu1 %v5907_v60  ;;  %7060 = vmatpush1.bf16.msra.mxu0 %v5923_v20  ;;  %v3440_v8 = vmul.f32 %v3387_v0, %v10833_v46 }
 0x810   : > { %v3302_v38 = vpop.f32.mrb[41].mxu1  ;;  %v3373_v34 = vpop.f32.mrb[39].mxu0  ;;  %3763 = vmatprep.mubr.f32.mxu1 %v3433_v50  ;;  %3848 = vmatprep.mubr.f32.mxu0 %v3435_v39  ;;  %v3442_v44 = vmul.f32 %v3395_v63, %v10834_v58  ;;  %v10836_v63 = vunpack.c.h.bf16 %v8663_v36  ;;  %v5919_v50 = vld [vmem:[%s10649_s13 + $0x168] sm:$0xff]   ;;  %v10842_v36 = vunpack.c.l.bf16 %v8681_v42  ;;  %v10843_v58 = vunpack.c.h.bf16 %v8707_v12 }
 0x811   : > { %v3303_v30 = vadd.f32 %v3302_v38, %v3071_v57  ;;  %v3374_v48 = vadd.f32 %v3373_v34, %v3079_v40  ;;  %7032 = vmatprep.subr.bf16.mxu1 %v5916_v37  ;;  %7061 = vmatprep.subr.bf16.mxu0 %v10815_v49  ;;  %v3067_v57 = vrot.slane %v9289_v61, %v2458_v59  ;;  %v5910_v40 = vld [vmem:[%s10649_s13 + $0x120] sm:$0xff]   ;;  %v5911_v39 = vld [vmem:[%s10649_s13 + $0x128] sm:$0xff]   ;;  %v5920_v38 = vld [vmem:[%s10649_s13 + $0x170] sm:$0xff]  }
 0x812   : > { %3764 = vmatmul.mubr.f32.gmra.mrb[46].mxu1 %v3432_v47  ;;  %3849 = vmatmul.mubr.f32.gmra.mrb[44].mxu0 %v3434_v23  ;;  %v3075_v59 = vrot.slane %v9289_v61, %v2466_v1  ;;  %v5927_v37 = vld [vmem:[%s10649_s13 + $0x1a8] sm:$0xff]   ;;  %v5912_v61 = vld [vmem:[%s10649_s13 + $0x130] sm:$0xff]   ;;  %v5929_v23 = vld [vmem:[%s10649_s13 + $0x1b8] sm:$0xff]  }
 0x813   : > { %v3381_v19 = vmax.f32 %v3303_v30, 0.0  ;;  %v3383_v26 = vmax.f32 %v3374_v48, 0.0  ;;  %7034 = vmatpush3.bf16.msra.mxu1 %v5908_v13  ;;  %7063 = vmatpush1.bf16.msra.mxu0 %v5924_v53  ;;  %v3301_v32 = vadd.f32 %v3300_v14, %v3067_v57  ;;  %v5928_v14 = vld [vmem:[%s10649_s13 + $0x1b0] sm:$0xff]   ;;  %v3560_v13 = vld [vmem:[%s10649_s13 + $0x1c0] sm:$0x3]  ;;  %v10837_v48 = vunpack.c.l.bf16 %v8658_v35 }
 0x814   : > { %3768 = vmatprep.mubr.f32.mxu1 %v3441_v6  ;;  %3853 = vmatprep.mubr.f32.mxu0 %v3443_v27  ;;  %v3372_v34 = vadd.f32 %v3371_v51, %v3075_v59  ;;  %v3673_v30 = vunpack.c.l.bf16 %v3560_v13  ;;  %v10840_v35 = vunpack.c.l.bf16 %v8672_v15  ;;  %v4108_v13 = vld [vmem:[%s10656_s20 + $0x78] sm:$0xff] }
 0x815   : > { %v9378_v7 = vrot.slane %v3381_v19, %v8225_v16  ;;  %v9381_v60 = vrot.slane %v3383_v26, %v8225_v16  ;;  %7036 = vmatprep.subr.bf16.mxu1 %v5917_v9  ;;  %7064 = vmatprep.subr.bf16.mxu0 %v10815_v49  ;;  %v3380_v1 = vmax.f32 %v3301_v32, 0.0  ;;  %v10841_v26 = vunpack.c.h.bf16 %v8702_v33  ;;  %v4095_v32 = vld [vmem:[%s10656_s20 + $0x10] sm:$0xff] }
 0x816   : > { %3769 = vmatmul.mubr.f32.gmra.mrb[48].mxu1 %v3440_v8  ;;  %3854 = vmatmul.mubr.f32.gmra.mrb[46].mxu0 %v3442_v44  ;;  %v3382_v47 = vmax.f32 %v3372_v34, 0.0  ;;  %v4102_v34 = vld [vmem:[%s10656_s20 + $0x48] sm:$0xff] }
 0x817   : > { %7038 = vmatpush3.bf16.msra.mxu1 %v5909_v21  ;;  %7066 = vmatpush1.bf16.msra.mxu0 %v5925_v22  ;;  %v3421_v0 = vmul.f32 %v9378_v7, %v10835_v29  ;;  %v3423_v20 = vmul.f32 %v9381_v60, %v10836_v63  ;;  %v3403_v51 = vrot.slane %v3380_v1, %v8225_v16  ;;  %v10845_v21 = vunpack.c.h.bf16 %v8717_v52 }
 0x818   : > { %7040 = vmatprep.subr.bf16.mxu1 %v5918_v28  ;;  %7067 = vmatprep.subr.bf16.mxu0 %v10815_v49  ;;  %v3411_v53 = vrot.slane %v3382_v47, %v8225_v16  ;;  %v3429_v6 = vmul.f32 %v9378_v7, %v10838_v55  ;;  %v3431_v9 = vmul.f32 %v9381_v60, %v827_v54  ;;  %v10844_v54 = vunpack.c.l.bf16 %v8702_v33  ;;  %v4101_v47 = vld [vmem:[%s10656_s20 + $0x40] sm:$0xff] }
 0x819   : > { %3923 = vmatprep.mubr.f32.mxu1 %v3421_v0  ;;  %5404 = vmatprep.mubr.msk.f32.mxu0 %vm2424_vm0, %v3423_v20  ;;  %v3428_v19 = vmul.f32 %v3403_v51, %v10840_v35  ;;  %v3437_v46 = vmul.f32 %v9378_v7, %v10841_v26  ;;  %v3439_v44 = vmul.f32 %v9381_v60, %v10843_v58  ;;  %v10846_v28 = vunpack.c.l.bf16 %v8707_v12  ;;  %v4094_v12 = vld [vmem:[%s10656_s20 + $0x8] sm:$0xff] }
 0x81a   : > { %v3422_v27 = vmul.f32 %v3411_v53, %v10839_v56  ;;  %v3430_v8 = vmul.f32 %v3411_v53, %v10842_v36  ;;  %v3436_v15 = vmul.f32 %v3403_v51, %v10844_v54  ;;  %v3445_v22 = vmul.f32 %v9378_v7, %v10845_v21  ;;  %v4097_v7 = vld [vmem:[%s10656_s20 + $0x20] sm:$0xff]  ;;  %v4111_v56 = vld [vmem:[%s10656_s20 + $0x90] sm:$0xff] }
 0x81b   : > { %7042 = vmatpush3.bf16.msra.mxu1 %v5910_v40  ;;  %7069 = vmatpush1.bf16.msra.mxu0 %v5926_v43  ;;  %v3438_v42 = vmul.f32 %v3411_v53, %v10846_v28  ;;  %v10847_v29 = vunpack.c.h.bf16 %v8728_v2  ;;  %v10848_v63 = vunpack.c.l.bf16 %v8717_v52  ;;  %v10849_v20 = vunpack.c.l.bf16 %v8728_v2  ;;  %v4093_v52 = vld [vmem:[%s10656_s20] sm:$0xff]  ;;  %v4096_v2 = vld [vmem:[%s10656_s20 + $0x18] sm:$0xff] }
 0x81c   : > { %7044 = vmatprep.subr.bf16.mxu1 %v5919_v50  ;;  %7070 = vmatprep.subr.bf16.mxu0 %v10815_v49  ;;  %v7081_v40 = vpack.c.bf16 %v4096_v2, %v4093_v52  ;;  %v4100_v43 = vld [vmem:[%s10656_s20 + $0x38] sm:$0xff]  ;;  %v4103_v50 = vld [vmem:[%s10656_s20 + $0x50] sm:$0xff] }
 0x81d   : > { %v3447_v0 = vmul.f32 %v9381_v60, %v10847_v29  ;;  %v3444_v33 = vmul.f32 %v3403_v51, %v10848_v63  ;;  %v3446_v57 = vmul.f32 %v3411_v53, %v10849_v20  ;;  %v7079_v60 = vpack.c.bf16 %v4097_v7, %v4094_v12 }
 0x81e   : > { %v7083_v59 = vpack.c.bf16 %v4103_v50, %v4100_v43 }
 0x81f   : > { %7046 = vmatpush3.bf16.msra.mxu1 %v5911_v39  ;;  %7072 = vmatpush1.bf16.msra.mxu0 %v5927_v37  ;;  %v4098_v39 = vld [vmem:[%s10656_s20 + $0x28] sm:$0xff] }
 0x820   : > { %7048 = vmatprep.subr.bf16.mxu1 %v5920_v38  ;;  %7073 = vmatprep.subr.bf16.mxu0 %v10815_v49  ;;  %v7105_v37 = vpack.c.bf16 %v4098_v39, %v4095_v32  ;;  %v4099_v38 = vld [vmem:[%s10656_s20 + $0x30] sm:$0xff]  ;;  %v4118_v32 = vld [vmem:[%s10656_s20 + $0xc8] sm:$0xff]  ;;  %v4121_v39 = vld [vmem:[%s10656_s20 + $0xe0] sm:$0xff] }
 0x821   : > { %v7085_v1 = vpack.c.bf16 %v4102_v34, %v4099_v38  ;;  %v7095_v38 = vpack.c.bf16 %v4121_v39, %v4118_v32  ;;  %v4116_v34 = vld [vmem:[%s10656_s20 + $0xb8] sm:$0xff] }
 0x823   : > { %7050 = vmatpush3.bf16.msra.mxu1 %v5912_v61  ;;  %7075 = vmatpush1.bf16.msra.mxu0 %v5928_v14  ;;  %v4106_v61 = vld [vmem:[%s10656_s20 + $0x68] sm:$0xff]  ;;  %v4109_v14 = vld [vmem:[%s10656_s20 + $0x80] sm:$0xff] }
 0x824   : > { %7052 = vmatprep.subr.bf16.mxu1 %v5921_v41  ;;  %7076 = vmatprep.subr.bf16.mxu0 %v10815_v49  ;;  %v3420_v49 = vmul.f32 %v3403_v51, %v10837_v48  ;;  %v7087_v41 = vpack.c.bf16 %v4109_v14, %v4106_v61  ;;  %v4104_v51 = vld [vmem:[%s10656_s20 + $0x58] sm:$0xff]  ;;  %v4115_v48 = vld [vmem:[%s10656_s20 + $0xb0] sm:$0xff] }
 0x825   : > { %v4120_v61 = vld [vmem:[%s10656_s20 + $0xd8] sm:$0xff] }
 0x827   : > { %7054 = vmatpush3.bf16.msra.mxu1 %v5913_v45  ;;  %7078 = vmatpush1.bf16.msra.mxu0 %v5929_v23  ;;  %v7109_v45 = vpack.c.bf16 %v4104_v51, %v4101_v47  ;;  %v4105_v23 = vld [vmem:[%s10656_s20 + $0x60] sm:$0xff]  ;;  %v4124_v47 = vld [vmem:[%s10656_s20 + $0xf8] sm:$0xff]  ;;  %v4127_v51 = vld [vmem:[%s10656_s20 + $0x110] sm:$0x3] }
 0x828   : > { %3976 = vmatprep.subr.mxu0 %v10816_v3  ;;  %7080 = vmatprep.subr.bf16.mxu1 %v7079_v60  ;;  %v7089_v53 = vpack.c.bf16 %v4108_v13, %v4105_v23  ;;  %v7099_v13 = vpack.c.bf16 %v4127_v51, %v4124_v47 }
 0x82a   : > { %3924 = vmatmul.mubr.f32.vlgmr.msra.gmra.mrb[50].mxu1 %v3420_v49  ;;  %v4107_v49 = vld [vmem:[%s10656_s20 + $0x70] sm:$0xff] }
 0x82b   : > { %3928 = vmatprep.mubr.f32.mxu1 %v3429_v6  ;;  %5403 = vmatpush1.msk.msra.mxu0 %vm10719_vm11, %v3673_v30  ;;  %v4112_v30 = vld [vmem:[%s10656_s20 + $0x98] sm:$0xff]  ;;  %v4110_v6 = vld [vmem:[%s10656_s20 + $0x88] sm:$0xff]  ;;  %vm10857_vm11 = vcmp.lt.s32.totalorder %v7661_v31, 1 }
 0x82c   : > { %4009 = vmatmul.mubr.f32.vlgmr.msra.gmra.mrb[48].mxu0 %v3422_v27  ;;  %7082 = vmatpush1.bf16.msra.mxu1 %v7081_v40  ;;  %v7091_v55 = vpack.c.bf16 %v4115_v48, %v4112_v30  ;;  %v4114_v27 = vld [vmem:[%s10656_s20 + $0xa8] sm:$0xff]  ;;  %v4123_v30 = vld [vmem:[%s10656_s20 + $0xf0] sm:$0xff] }
 0x82d   : > { %5405 = vmatprep.mubr.msk.f32.mxu0 %vm2424_vm0, %v3431_v9  ;;  %7084 = vmatprep.subr.bf16.mxu1 %v7083_v59  ;;  %v7113_v9 = vpack.c.bf16 %v4110_v6, %v4107_v49  ;;  %v7093_v35 = vpack.c.bf16 %v4114_v27, %v4111_v56  ;;  %v4126_v48 = vld [vmem:[%s10656_s20 + $0x108] sm:$0x3] }
 0x82e   : > { %3929 = vmatmul.mubr.f32.gmra.mrb[52].mxu1 %v3428_v19  ;;  %7106 = vmatprep.subr.bf16.mxu0 %v7105_v37  ;;  %v7102_v6 = vpack.c.bf16 %v4126_v48, %v4123_v30 }
 0x82f   : > { %3933 = vmatprep.mubr.f32.mxu1 %v3437_v46  ;;  %7108 = vmatpush3.bf16.msra.mxu0 %v7105_v37  ;;  %v4113_v37 = vld [vmem:[%s10656_s20 + $0xa0] sm:$0xff] }
 0x830   : > { %4014 = vmatmul.mubr.f32.gmra.mrb[50].mxu0 %v3430_v8  ;;  %7086 = vmatpush1.bf16.msra.mxu1 %v7085_v1  ;;  %v4117_v1 = vld [vmem:[%s10656_s20 + $0xc0] sm:$0xff]  ;;  %v7117_v14 = vpack.c.bf16 %v4116_v34, %v4113_v37  ;;  %v7372_v34 = vld [vmem:[%s10770_s3 + $0x8] sm:$0xff] }
 0x831   : > { %5406 = vmatprep.mubr.msk.f32.mxu0 %vm2424_vm0, %v3439_v44  ;;  %7088 = vmatprep.subr.bf16.mxu1 %v7087_v41  ;;  %v7097_v41 = vpack.c.bf16 %v4120_v61, %v4117_v1 }
 0x832   : > { %3934 = vmatmul.mubr.f32.gmra.mrb[54].mxu1 %v3436_v15  ;;  %7110 = vmatprep.subr.bf16.mxu0 %v7109_v45 }
 0x833   : > { %3938 = vmatprep.mubr.f32.mxu1 %v3445_v22  ;;  %7112 = vmatpush3.bf16.msra.mxu0 %v7109_v45  ;;  %v4119_v45 = vld [vmem:[%s10656_s20 + $0xd0] sm:$0xff] }
 0x834   : > { %4019 = vmatmul.mubr.f32.gmra.mrb[52].mxu0 %v3438_v42  ;;  %7090 = vmatpush1.bf16.msra.mxu1 %v7089_v53  ;;  %v4122_v53 = vld [vmem:[%s10656_s20 + $0xe8] sm:$0xff] }
 0x835   : > { %5407 = vmatprep.mubr.msk.f32.mxu0 %vm2424_vm0, %v3447_v0  ;;  %7114 = vmatprep.subr.bf16.mxu0 %v7113_v9 }
 0x836   : > { %3939 = vmatmul.mubr.f32.gmra.mrb[56].mxu1 %v3444_v33  ;;  %7092 = vmatprep.subr.bf16.mxu1 %v7091_v55  ;;  %v7121_v55 = vpack.c.bf16 %v4122_v53, %v4119_v45 }
 0x837   : > { %4231 = vmatprep.mubr.f32.mxu1 %v10816_v3  ;;  %7116 = vmatpush3.bf16.msra.mxu0 %v7113_v9 }
 0x838   : > { %4024 = vmatmul.mubr.f32.gmra.mrb[54].mxu0 %v3446_v57  ;;  %7094 = vmatpush1.bf16.msra.mxu1 %v7093_v35  ;;  %v9602_v35 = vstv %s9556_s1  ;;  %s5534_s1 = sld [smem:[#allocation4 + $0x1]] }
 0x839   : > { %7096 = vmatprep.subr.bf16.mxu1 %v7095_v38  ;;  %7118 = vmatprep.subr.bf16.mxu0 %v7117_v14  ;;  %vm5149_vm5 = vcmp.ge.s32.totalorder %v7372_v34, %v9602_v35 }
 0x83b   : > { %7120 = vmatpush3.bf16.msra.mxu0 %v7117_v14 }
 0x83c   : > { %7098 = vmatpush1.bf16.msra.mxu1 %v7097_v41  ;;  %7122 = vmatprep.subr.bf16.mxu0 %v7121_v55 }
 0x83d   : > { %7101 = vmatprep.subr.msk.bf16.mxu1 %vm7738_vm12, %v7099_v13 }
 0x83f   : > { %7124 = vmatpush3.bf16.msra.mxu0 %v7121_v55 }
 0x840   : > { %7104 = vmatpush1.bf16.msk.msra.mxu1 %vm7738_vm12, %v7102_v6  ;;  %v10895_v6 = vld [vmem:[#allocation12_spill] sm:$0xff] }
 0x8dd   : > { %v6149_v19 = vpop.f32.mrb[42].mxu1  ;;  %v6193_v26 = vpop.f32.mrb[40].mxu0 }
 0x8de   : > { %v6150_v46 = vpop.f32.mrb[43].mxu1  ;;  %v6194_v36 = vpop.f32.mrb[41].mxu0 }
 0x8df   : > { %v6151_v8 = vadd.f32 %v6150_v46, %v6149_v19  ;;  %v6195_v58 = vadd.f32 %v6194_v36, %v6193_v26  ;;  %v9605_v19 = vstv %s9560_s29  ;;  %v4125_v36 = vld [vmem:[%s10656_s20 + $0x100] sm:$0xff] }
 0x8e1   : > { %v3841_v44 = vadd.f32 %v6195_v58, %v6151_v8  ;;  %v6152_v54 = vpop.f32.mrb[44].mxu1  ;;  %v6196_v15 = vpop.f32.mrb[42].mxu0  ;;  %v4128_v8 = vld [vmem:[%s10656_s20 + $0x118] sm:$0x3] }
 0x8e2   : > { %v6153_v21 = vpop.f32.mrb[45].mxu1  ;;  %v6197_v22 = vpop.f32.mrb[43].mxu0 }
 0x8e3   : > { %v6154_v28 = vadd.f32 %v6153_v21, %v6152_v54  ;;  %v6198_v42 = vadd.f32 %v6197_v22, %v6196_v15  ;;  %v7125_v54 = vpack.c.bf16 %v4128_v8, %v4125_v36 }
 0x8e5   : > { %v9548_v29 = vadd.f32 %v6198_v42, %v6154_v28  ;;  %v6155_v0 = vpop.f32.mrb[46].mxu1  ;;  %v6199_v63 = vpop.f32.mrb[44].mxu0  ;;  %7127 = vmatprep.subr.msk.bf16.mxu0 %vm7738_vm12, %v7125_v54 }
 0x8e6   : > { %v6156_v33 = vpop.f32.mrb[47].mxu1  ;;  %v6200_v20 = vpop.f32.mrb[45].mxu0  ;;  %7130 = vmatpush3.bf16.msk.msra.mxu0 %vm7738_vm12, %v7125_v54 }
 0x8e7   : > { %v6157_v57 = vadd.f32 %v6156_v33, %v6155_v0  ;;  %v6201_v12 = vadd.f32 %v6200_v20, %v6199_v63  ;;  %v5171_v63 = vstv %s5170_s0 }
 0x8e8   : > { %vm9641_vm3 = vcmp.eq.s32.totalorder %v5171_v63, 1  ;;  %v4481_v63 = vld [vmem:[%s10658_s22 + $0x88] sm:$0xff] }
 0x8e9   : > { %v9550_v7 = vadd.f32 %v6201_v12, %v6157_v57  ;;  %v6158_v60 = vpop.f32.mrb[48].mxu1  ;;  %v6202_v52 = vpop.f32.mrb[46].mxu0 }
 0x8ea   : > { %v6159_v2 = vpop.f32.mrb[49].mxu1  ;;  %v6203_v40 = vpop.f32.mrb[47].mxu0 }
 0x8eb   : > { %v6160_v43 = vadd.f32 %v6159_v2, %v6158_v60  ;;  %v6204_v50 = vadd.f32 %v6203_v40, %v6202_v52  ;;  %v5179_v40 = vstv %s9627_s26  ;;  %s791_s26 = scalar_lea.vmem %s11023_s12, %s11022_s10 }
 0x8ec   : > { %vm9677_vm1 = vcmp.eq.s32.totalorder %v5179_v40, 1 }
 0x8ed   : > { %v9552_v59 = vadd.f32 %v6204_v50, %v6160_v43 }
 0x8fd   : > { %v6237_v23 = vpop.f32.mrb[50].mxu1 }
 0x8fe   : > { %v6238_v49 = vpop.f32.mrb[51].mxu1 }
 0x8ff   : > { %v6239_v56 = vadd.f32 %v6238_v49, %v6237_v23  ;;  %v4010_v27 = vpop.f32.mrb[48].mxu0  ;;  %v4469_v23 = vld [vmem:[%s10658_s22 + $0x28] sm:$0xff] }
 0x900   : > { %v4012_v9 = vpop.f32.mrb[49].mxu0 }
 0x901   : > { %v3926_v26 = vadd.f32 %v6239_v56, %v3841_v44  ;;  %v6240_v46 = vpop.f32.mrb[52].mxu1  ;;  %v7371_v44 = vld [vmem:[%s10770_s3] sm:$0xff] }
 0x902   : > { %v6241_v58 = vpop.f32.mrb[53].mxu1  ;;  %vm5148_vm6 = vcmp.ge.s32.totalorder %v7371_v44, %v9602_v35  ;;  %vm5153_vm4 = vcmp.lt.s32.totalorder %v7371_v44, %v9605_v19  ;;  %vm5161_vm2 = vcmp.lt.s32.totalorder %v7371_v44, 30 }
 0x903   : > { %v9618_v15 = vadd.f32 %v4010_v27, %v3926_v26  ;;  %v6242_v21 = vadd.f32 %v6241_v58, %v6240_v46  ;;  %v4015_v22 = vpop.f32.mrb[50].mxu0  ;;  %vm9636_vm0 = vmand %vm5148_vm6, %vm5153_vm4  ;;  %vm5154_vm6 = vcmp.lt.s32.totalorder %v7372_v34, %v9605_v19 }
 0x904   : > { %v4017_v28 = vpop.f32.mrb[51].mxu0  ;;  %vm9651_vm12 = vmand %vm9636_vm0, %vm5161_vm2  ;;  %vm10856_vm2 = vcmp.lt.s32.totalorder %v7661_v31, 7 }
 0x905   : > { %v3931_v42 = vadd.f32 %v6242_v21, %v9548_v29  ;;  %v6243_v0 = vpop.f32.mrb[54].mxu1  ;;  %4057 = vrot.lane.b32.xlu0 %v9618_v15, %s10790_s8  ;;  %v4029_v52 = vrot.slane %v9618_v15, 7  ;;  %v4041_v62 = vrot.slane %v9618_v15, 1  ;;  %vm5173_vm7 = vmand %vm9651_vm12, %vm9641_vm3  ;;  %v10877_v15 = vmov 0  }
 0x906   : > { %v6244_v33 = vpop.f32.mrb[55].mxu1 }
 0x907   : > { %v4016_v57 = vadd.f32 %v4015_v22, %v3931_v42  ;;  %v6245_v12 = vadd.f32 %v6244_v33, %v6243_v0  ;;  %v4020_v60 = vpop.f32.mrb[52].mxu0  ;;  %v4480_v0 = vld [vmem:[%s10658_s22 + $0x80] sm:$0xff] }
 0x908   : > { %v4022_v29 = vpop.f32.mrb[53].mxu0  ;;  %v7131_v33 = vpack.c.bf16 %v4481_v63, %v4480_v0  ;;  %v4496_v0 = vld [vmem:[%s10658_s22 + $0x100] sm:$0xff] }
 0x909   : > { %v4030_v43 = vrot.slane %v4016_v57, 7  ;;  %v4042_v50 = vrot.slane %v4016_v57, 1  ;;  %v3936_v32 = vadd.f32 %v6245_v12, %v9550_v7  ;;  %v6246_v39 = vpop.f32.mrb[56].mxu1  ;;  %4059 = vrot.lane.b32.xlu1 %v4016_v57, %s10790_s8  ;;  %v7373_v7 = vld [vmem:[%s10770_s3 + $0x10] sm:$0xff]  ;;  %v4464_v57 = vld [vmem:[%s10658_s22] sm:$0xff]  ;;  %v4465_v12 = vld [vmem:[%s10658_s22 + $0x8] sm:$0xff] }
 0x90a   : > { %v6247_v38 = vpop.f32.mrb[57].mxu1  ;;  %vm5150_vm4 = vcmp.ge.s32.totalorder %v7373_v7, %v9602_v35  ;;  %vm5155_vm0 = vcmp.lt.s32.totalorder %v7373_v7, %v9605_v19  ;;  %7132 = vmatprep.subr.bf16.mxu1 %v7131_v33  ;;  %v7133_v2 = vpack.c.bf16 %v4465_v12, %v4464_v57  ;;  %v4497_v33 = vld [vmem:[%s10658_s22 + $0x108] sm:$0xff]  ;;  %v4475_v57 = vld [vmem:[%s10658_s22 + $0x58] sm:$0xff] }
 0x90b   : > { %v4021_v1 = vadd.f32 %v4020_v60, %v3936_v32  ;;  %v6248_v61 = vadd.f32 %v6247_v38, %v6246_v39  ;;  %v4025_v14 = vpop.f32.mrb[54].mxu0  ;;  %v4047_v41 = vsel %vm10856_vm2, %v4041_v62, %v4042_v50  ;;  %v9669_v47 = vsel %vm10857_vm11, %v4029_v52, %v4030_v43  ;;  %vm9691_vm12 = vmand %vm5150_vm4, %vm5155_vm0  ;;  %v4482_v60 = vld [vmem:[%s10658_s22 + $0x90] sm:$0xff]  ;;  %v4467_v39 = vld [vmem:[%s10658_s22 + $0x18] sm:$0xff] }
 0x90c   : > { %v4027_v51 = vpop.f32.mrb[55].mxu0  ;;  %v4049_v45 = vsel %vm10858_vm15, %v4047_v41, 0.0  ;;  %vm5158_vm15 = vmand %vm5149_vm5, %vm5154_vm6  ;;  %vm5162_vm11 = vcmp.lt.s32.totalorder %v7372_v34, 30  ;;  %vm5163_vm2 = vcmp.lt.s32.totalorder %v7373_v7, 30  ;;  %vm10866_vm4 = vcmp.lt.s32.totalorder %v7661_v31, 1  ;;  %v4466_v32 = vld [vmem:[%s10658_s22 + $0x10] sm:$0xff] }
 0x90d   : > { %v4031_v13 = vrot.slane %v4021_v1, 7  ;;  %v4043_v53 = vrot.slane %v4021_v1, 1  ;;  %v3941_v30 = vadd.f32 %v6248_v61, %v9552_v59  ;;  %4073 = vrot.lane.b32.xlu0 %v4049_v45, %s10782_s6  ;;  %v7374_v59 = vld [vmem:[%s10770_s3 + $0x18] sm:$0xff]  ;;  %vm9703_vm5 = vmand %vm5173_vm7, %vm9677_vm1  ;;  %vm10867_vm0 = vcmp.eq.s32.totalorder %v7760_v11, 1  ;;  %v4484_v38 = vld [vmem:[%s10658_s22 + $0xa0] sm:$0xff] }
 0x90e   : > { %vm5151_vm14 = vcmp.ge.s32.totalorder %v7374_v59, %v9602_v35  ;;  %vm5156_vm6 = vcmp.lt.s32.totalorder %v7374_v59, %v9605_v19  ;;  %vm9714_vm8 = vmand %vm5158_vm15, %vm5162_vm11  ;;  %v5185_v21 = vsel %vm9703_vm5, 1, %v10877_v15  ;;  %v4485_v34 = vld [vmem:[%s10658_s22 + $0xa8] sm:$0xff]  ;;  %v4468_v45 = vld [vmem:[%s10658_s22 + $0x20] sm:$0xff]  ;;  %v7163_v12 = vpack.c.bf16 %v4497_v33, %v4496_v0 }
 0x90f   : > { %v4026_v49 = vadd.f32 %v4025_v14, %v3941_v30  ;;  %v4046_v55 = vsel %vm10863_vm9, %v4042_v50, %v4043_v53  ;;  %v9710_v56 = vsel %vm10866_vm4, %v4030_v43, %v4031_v13  ;;  %vm9722_vm9 = vmand %vm9691_vm12, %vm5163_vm2  ;;  %vm5164_vm4 = vcmp.lt.s32.totalorder %v7374_v59, 30  ;;  %v4487_v19 = vld [vmem:[%s10658_s22 + $0xb8] sm:$0xff] }
 0x910   : > { %v4050_v27 = vsel %vm10867_vm0, %v4046_v55, 0.0  ;;  %vm5160_vm7 = vmand %vm5151_vm14, %vm5156_vm6  ;;  %vm10872_vm0 = vcmp.lt.s32.totalorder %v7661_v31, 7  ;;  %vm10876_vm14 = vcmp.eq.s32.totalorder %v7747_v4, 1  ;;  %v7139_v51 = vpack.c.bf16 %v4485_v34, %v4484_v38  ;;  %7164 = vmatprep.subr.bf16.mxu0 %v7163_v12  ;;  %v4494_v38 = vld [vmem:[%s10658_s22 + $0xf0] sm:$0xff]  ;;  %v4495_v34 = vld [vmem:[%s10658_s22 + $0xf8] sm:$0xff] }
 0x911   : > { %v4032_v35 = vrot.slane %v4026_v49, 7  ;;  %v4044_v26 = vrot.slane %v4026_v49, 1  ;;  %4075 = vrot.lane.b32.xlu1 %v4050_v27, %s10782_s6  ;;  %4061 = vrot.lane.b32.xlu0 %v4021_v1, %s10790_s8  ;;  %vm10873_vm15 = vmmov %vm10872_vm0  ;;  %v7137_v1 = vpack.c.bf16 %v4467_v39, %v4466_v32  ;;  %v7141_v30 = vpack.c.bf16 %v4469_v23, %v4468_v45  ;;  %v5435_v23 = vld [vmem:[%s10658_s22 + $0x1b0] sm:$0xff]  ;;  %v10021_v0 = vld [vmem:[%s10658_s22 + $0x1d8] sm:$0xff] }
 0x912   : > { %vm5174_vm11 = vmand %vm9714_vm8, %vm9641_vm3 }
 0x913   : > { %v4045_v46 = vsel %vm10872_vm0, %v4043_v53, %v4044_v26  ;;  %v4048_v36 = vsel %vm10873_vm15, %v4044_v26, %v4041_v62  ;;  %v4036_v8 = vsel %vm10874_vm13, %v4032_v35, %v4029_v52  ;;  %vm10875_vm12 = vmmov %vm10874_vm13  ;;  %vm10878_vm0 = vcmp.eq.s32.totalorder %v7758_v10, 1  ;;  %v4483_v52 = vld [vmem:[%s10658_s22 + $0x98] sm:$0xff]  ;;  %v4486_v26 = vld [vmem:[%s10658_s22 + $0xb0] sm:$0xff] }
 0x914   : > { %v9738_v58 = vsel %vm10875_vm12, %v4031_v13, %v4032_v35  ;;  %v4051_v54 = vsel %vm10876_vm14, %v4045_v46, 0.0  ;;  %vm5175_vm2 = vmand %vm9722_vm9, %vm9641_vm3  ;;  %v4052_v22 = vsel %vm10878_vm0, %v4048_v36, 0.0  ;;  %v7135_v50 = vpack.c.bf16 %v4483_v52, %v4482_v60  ;;  %v10889_v13 = vld [vmem:[#allocation11_spill] sm:$0xff]  ;;  %v4471_v36 = vld [vmem:[%s10658_s22 + $0x38] sm:$0xff] }
 0x915   : > { %4063 = vrot.lane.b32.xlu1 %v4026_v49, %s10790_s8  ;;  %4077 = vrot.lane.b32.xlu0 %v4051_v54, %s10782_s6  ;;  %vm5168_vm8 = vmand %vm5160_vm7, %vm5164_vm4  ;;  %vm10881_vm7 = vcmask 490496   ;;  %vm10882_vm4 = vcmask 736256   ;;  %v7143_v46 = vpack.c.bf16 %v4487_v19, %v4486_v26  ;;  %v4489_v54 = vld [vmem:[%s10658_s22 + $0xc8] sm:$0xff]  ;;  %v4492_v52 = vld [vmem:[%s10658_s22 + $0xe0] sm:$0xff] }
 0x916   : > { %vm5182_vm13 = vmand %vm5174_vm11, %vm9677_vm1  ;;  %vm10884_vm11 = vcmp.eq.s32.totalorder %v7790_v25, 1  ;;  %v9968_v26 = vld [vmem:[%s10658_s22 + $0x1c8] sm:$0xff] }
 0x917   : > { %vm5183_vm6 = vmand %vm5175_vm2, %vm9677_vm1  ;;  %v5186_v44 = vsel %vm5182_vm13, 1, %v10877_v15  ;;  %v4038_v7 = vsel %vm10884_vm11, %v9669_v47, 0.0  ;;  %vm10890_vm13 = vcmp.eq.s32.totalorder %v10889_v13, 1  ;;  %vm10900_vm11 = vcmask 1043456  }
 0x918   : > { %vm5176_vm9 = vmand %vm5168_vm8, %vm9641_vm3  ;;  %v5187_v28 = vsel %vm5183_vm6, 1, %v10877_v15  ;;  %vm10880_vm3 = vcmask 244736   ;;  %v4039_v53 = vsel %vm10890_vm13, %v9710_v56, 0.0 }
 0x919   : > { %4079 = vrot.lane.b32.xlu1 %v4052_v22, %s10782_s6  ;;  %5190 = vperm.xlu0 %7349, %v5185_v21   ;;  %vm5184_vm5 = vmand %vm5176_vm9, %vm9677_vm1  ;;  %vm10879_vm1 = vcmp.eq.s32.totalorder %v7788_v24, 1  ;;  %v4472_v21 = vld [vmem:[%s10658_s22 + $0x40] sm:$0xff]  ;;  %v4473_v22 = vld [vmem:[%s10658_s22 + $0x48] sm:$0xff] }
 0x91a   : > { %v5188_v42 = vsel %vm5184_vm5, 1, %v10877_v15  ;;  %v4037_v29 = vsel %vm10879_vm1, %v4036_v8, 0.0  ;;  %vm10883_vm15 = vmmov %vm10882_vm4  ;;  %vm10896_vm1 = vcmp.eq.s32.totalorder %v10895_v6, 1 }
 0x91b   : > { %vm10885_vm12 = vmmov %vm10880_vm3  ;;  %v4040_v27 = vsel %vm10896_vm1, %v9738_v58, 0.0  ;;  %v4488_v58 = vld [vmem:[%s10658_s22 + $0xc0] sm:$0xff] }
 0x91c   : > { %vm10886_vm14 = vmmov %vm10881_vm7  ;;  %v7147_v15 = vpack.c.bf16 %v4489_v54, %v4488_v58 }
 0x91d   : > { %5193 = vperm.xlu1 %7350, %v5186_v44   ;;  %5196 = vperm.xlu0 %7349, %v5187_v28   ;;  %vm10887_vm2 = vmmov %vm10882_vm4  ;;  %v7149_v44 = vpack.c.bf16 %v4473_v22, %v4472_v21  ;;  %v4490_v28 = vld [vmem:[%s10658_s22 + $0xd0] sm:$0xff]  ;;  %v10004_v22 = vld [vmem:[%s10658_s22 + $0x278] sm:$0xff] }
 0x91e   : > { %vm10888_vm8 = vmmov %vm10887_vm2  ;;  %v9999_v21 = vld [vmem:[%s10658_s22 + $0x270] sm:$0xff] }
 0x91f   : > { %vm10891_vm6 = vmmov %vm10880_vm3 }
 0x920   : > { %vm10892_vm0 = vmmov %vm10881_vm7 }
 0x921   : > { %5199 = vperm.xlu1 %7350, %v5188_v42   ;;  %vm10893_vm9 = vmmov %vm10887_vm2  ;;  %v4491_v42 = vld [vmem:[%s10658_s22 + $0xd8] sm:$0xff] }
 0x922   : > { %vm10894_vm5 = vmmov %vm10887_vm2  ;;  %v7151_v63 = vpack.c.bf16 %v4491_v42, %v4490_v28  ;;  %v10016_v42 = vld [vmem:[%s10658_s22 + $0x1d0] sm:$0xff]  ;;  %v10929_v28 = vmov 0 }
 0x977   : > { %v4058_v20 = vpop.permute.xlu0 %4057 }
 0x978   : > { %v4085_v40 = vsel %vm10880_vm3, %v4037_v29, %v4058_v20  ;;  %v4474_v20 = vld [vmem:[%s10658_s22 + $0x50] sm:$0xff]  ;;  %v4493_v29 = vld [vmem:[%s10658_s22 + $0xe8] sm:$0xff] }
 0x979   : > { %v7153_v60 = vpack.c.bf16 %v4475_v57, %v4474_v20  ;;  %v10032_v20 = vld [vmem:[%s10658_s22 + $0x300] sm:$0xff]  ;;  %v10037_v57 = vld [vmem:[%s10658_s22 + $0x308] sm:$0xff] }
 0x97b   : > { %v4060_v62 = vpop.permute.xlu1 %4059 }
 0x97c   : > { %v4086_v61 = vsel %vm10885_vm12, %v4038_v7, %v4060_v62  ;;  %v4499_v62 = vld [vmem:[%s10658_s22 + $0x118] sm:$0xff]  ;;  %vm9893_vm12 = vmpackc.low %vm10900_vm11, %vm10799_vm10  ;;  %v4500_v7 = vld [vmem:[%s10658_s22 + $0x120] sm:$0xff] }
 0x97f   : > { %v4074_v43 = vpop.permute.xlu0 %4073 }
 0x980   : > { %v4089_v37 = vsel %vm10881_vm7, %v4085_v40, %v4074_v43  ;;  %vm10897_vm7 = vmmov %vm10892_vm0  ;;  %v7155_v40 = vpack.c.bf16 %v4493_v29, %v4492_v52  ;;  %v4476_v43 = vld [vmem:[%s10658_s22 + $0x60] sm:$0xff]  ;;  %v10915_v29 = vmov 0 }
 0x981   : > { %5410 = vmatmul.mubr.msk.f32.vlgmr.msra.gmra.mrb[58].mxu1 %vm10882_vm4, %v4089_v37  ;;  %6524 = vmatprep.mubr.msk.f32.mxu0 %vm10883_vm15, %v4089_v37  ;;  %vm10898_vm4 = vmmov %vm10887_vm2  ;;  %v10901_v37 = vmov 0 }
 0x982   : > { %4237 = vmatprep.mubr.f32.mxu1 %v10816_v3  ;;  %7134 = vmatpush3.bf16.msra.mxu1 %v7133_v2  ;;  %vm10899_vm15 = vmmov %vm10887_vm2  ;;  %v4498_v2 = vld [vmem:[%s10658_s22 + $0x110] sm:$0xff]  ;;  %v10902_v37 = vsel %vm9893_vm12, 4294967295, %v10901_v37 }
 0x983   : > { %v4076_v14 = vpop.permute.xlu1 %4075  ;;  %v4062_v41 = vpop.permute.xlu0 %4061  ;;  %7136 = vmatprep.subr.bf16.mxu1 %v7135_v50  ;;  %v4477_v50 = vld [vmem:[%s10658_s22 + $0x68] sm:$0xff]  ;;  %v7167_v32 = vpack.c.bf16 %v4499_v62, %v4498_v2  ;;  %10903 = vst [vmem:[#allocation11_spill] sm:$0xff] %v10902_v37  ;;  %v5443_v62 = vld [vmem:[%s10658_s22 + $0x1f0] sm:$0xff] }
 0x984   : > { %v4090_v47 = vsel %vm10886_vm14, %v4086_v61, %v4076_v14  ;;  %v4087_v48 = vsel %vm10891_vm6, %v4039_v53, %v4062_v41  ;;  %v7157_v39 = vpack.c.bf16 %v4477_v50, %v4476_v43  ;;  %v4501_v61 = vld [vmem:[%s10658_s22 + $0x128] sm:$0xf]  ;;  %v4478_v14 = vld [vmem:[%s10658_s22 + $0x70] sm:$0xff]  ;;  %v4479_v41 = vld [vmem:[%s10658_s22 + $0x78] sm:$0xff] }
 0x985   : > { %5411 = vmatmul.mubr.msk.f32.gmra.mrb[60].mxu1 %vm10887_vm2, %v4090_v47  ;;  %6525 = vmatmul.mubr.msk.f32.vlgmr.msra.gmra.mrb[56].mxu0 %vm10888_vm8, %v4090_v47  ;;  %v7161_v45 = vpack.c.bf16 %v4479_v41, %v4478_v14  ;;  %v5436_v47 = vld [vmem:[%s10658_s22 + $0x1b8] sm:$0xff]  ;;  %v5499_v53 = vld [vmem:[%s10658_s22 + $0x2e0] sm:$0xff]  ;;  %v10908_v41 = vmov 0  ;;  %v10920_v14 = vmov 0 }
 0x986   : > { %4243 = vmatprep.mubr.f32.mxu1 %v10816_v3  ;;  %7138 = vmatpush3.bf16.msra.mxu1 %v7137_v1  ;;  %v7159_v1 = vpack.c.bf16 %v4495_v34, %v4494_v38 }
 0x987   : > { %v4064_v59 = vpop.permute.xlu1 %4063  ;;  %v4078_v49 = vpop.permute.xlu0 %4077  ;;  %7140 = vmatprep.subr.bf16.mxu1 %v7139_v51  ;;  %7166 = vmatpush3.bf16.msra.mxu0 %v7163_v12  ;;  %v7171_v51 = vpack.c.bf16 %v4501_v61, %v4500_v7 }
 0x988   : > { %v4091_v55 = vsel %vm10892_vm0, %v4087_v48, %v4078_v49  ;;  %v4088_v56 = vsel %vm10880_vm3, %v4040_v27, %v4064_v59  ;;  %7168 = vmatprep.subr.bf16.mxu0 %v7167_v32  ;;  %v5500_v48 = vld [vmem:[%s10658_s22 + $0x2e8] sm:$0xff]  ;;  %v4129_v49 = vld [vmem:[%s10657_s21] sm:$0x7] }
 0x989   : > { %5412 = vmatmul.mubr.msk.f32.gmra.mrb[62].mxu1 %vm10893_vm9, %v4091_v55  ;;  %6527 = vmatprep.mubr.msk.f32.mxu0 %vm10894_vm5, %v4091_v55  ;;  %v7223_v59 = vpack.c.bf16 %v5500_v48, %v5499_v53  ;;  %v9935_v55 = vrot.slane %v4129_v49, %v8225_v16  ;;  %v9938_v27 = vrot.slane %v4129_v49, %v8234_v18  ;;  %v9958_v16 = vld [vmem:[%s10658_s22 + $0x268] sm:$0xff]  ;;  %v9963_v18 = vld [vmem:[%s10658_s22 + $0x1c0] sm:$0xff] }
 0x98a   : > { %4249 = vmatprep.mubr.f32.mxu1 %v10816_v3  ;;  %7142 = vmatpush3.bf16.msra.mxu1 %v7141_v30  ;;  %v4470_v3 = vld [vmem:[%s10658_s22 + $0x30] sm:$0xff]  ;;  %v7177_v30 = vpack.c.bf16 %v5436_v47, %v5435_v23  ;;  %v9989_v54 = vrot.slane %v4129_v49, %v8228_v17 }
 0x98b   : > { %v4080_v9 = vpop.permute.xlu1 %4079  ;;  %v7145_v8 = vpack.c.bf16 %v4471_v36, %v4470_v3  ;;  %7144 = vmatprep.subr.bf16.mxu1 %v7143_v46  ;;  %7170 = vmatpush3.bf16.msra.mxu0 %v7167_v32  ;;  %v9973_v46 = vld [vmem:[%s10658_s22 + $0x2f0] sm:$0xff]  ;;  %v9978_v3 = vld [vmem:[%s10658_s22 + $0x2f8] sm:$0xff]  ;;  %v9983_v36 = vld [vmem:[%s10658_s22 + $0x140] sm:$0xff] }
 0x98c   : > { %v4092_v35 = vsel %vm10897_vm7, %v4088_v56, %v4080_v9  ;;  %7173 = vmatprep.subr.msk.bf16.mxu0 %vm9893_vm12, %v7171_v51  ;;  %v9943_v56 = vld [vmem:[%s10658_s22 + $0x130] sm:$0xff]  ;;  %v9948_v9 = vld [vmem:[%s10658_s22 + $0x138] sm:$0xff] }
 0x98d   : > { %5413 = vmatmul.mubr.msk.f32.gmra.mrb[64].mxu1 %vm10898_vm4, %v4092_v35  ;;  %6528 = vmatmul.mubr.msk.f32.gmra.mrb[58].mxu0 %vm10899_vm15, %v4092_v35  ;;  %v9953_v35 = vld [vmem:[%s10658_s22 + $0x260] sm:$0xff] }
 0x98e   : > { %7146 = vmatpush3.bf16.msra.mxu1 %v7145_v8 }
 0x98f   : > { %7148 = vmatprep.subr.bf16.mxu1 %v7147_v15  ;;  %7176 = vmatpush3.bf16.msk.msra.mxu0 %vm9893_vm12, %v7171_v51  ;;  %v9994_v15 = vld [vmem:[%s10658_s22 + $0x148] sm:$0xff] }
 0x990   : > { %7178 = vmatprep.subr.bf16.mxu0 %v7177_v30 }
 0x992   : > { %7150 = vmatpush3.bf16.msra.mxu1 %v7149_v44 }
 0x993   : > { %7152 = vmatprep.subr.bf16.mxu1 %v7151_v63 }
 0x996   : > { %7154 = vmatpush3.bf16.msra.mxu1 %v7153_v60 }
 0x997   : > { %7156 = vmatprep.subr.bf16.mxu1 %v7155_v40 }
 0x99a   : > { %7158 = vmatpush3.bf16.msra.mxu1 %v7157_v39 }
 0x99b   : > { %7160 = vmatprep.subr.bf16.mxu1 %v7159_v1 }
 0x99e   : > { %7162 = vmatpush3.bf16.msra.mxu1 %v7161_v45 }
 0x99f   : > { %7224 = vmatprep.subr.bf16.mxu1 %v7223_v59 }
 0xa54   : > { %v4233_v19 = vpop.f32.mrb[58].mxu1 }
 0xa55   : > { %v9986_v8 = vadd.f32 %v4233_v19, %v9935_v55  ;;  %v4235_v58 = vpop.f32.mrb[59].mxu1 }
 0xa56   : > { %v10007_v44 = vadd.f32 %v4235_v58, %v9938_v27 }
 0xa57   : > { %vm4341_vm10 = vcmp.gt.f32.partialorder %v9986_v8, 0.0  ;;  %vm4353_vm14 = vcmp.le.f32.partialorder %v9986_v8, 1.0 }
 0xa58   : > { %vm10039_vm2 = vmand %vm4341_vm10, %vm4353_vm14  ;;  %vm4342_vm8 = vcmp.gt.f32.partialorder %v10007_v44, 0.0  ;;  %vm4354_vm13 = vcmp.le.f32.partialorder %v10007_v44, 1.0  ;;  %v4239_v60 = vpop.f32.mrb[60].mxu1  ;;  %v6526_v52 = vpop.f32.mrb[56].mxu0 }
 0xa59   : > { %v10052_v40 = vsel %vm10039_vm2, %v9986_v8, 0.0  ;;  %vm10054_vm6 = vmand %vm4342_vm8, %vm4354_vm13  ;;  %v10059_v43 = vadd.f32 %v4239_v60, %v9935_v55  ;;  %v4328_v50 = vadd.f32 %v6526_v52, %v9989_v54  ;;  %v4241_v32 = vpop.f32.mrb[61].mxu1  ;;  %v4322_v39 = vpop.f32.mrb[57].mxu0 }
 0xa5a   : > { %v10068_v7 = vsel %vm10054_vm6, %v10007_v44, 0.0  ;;  %v10071_v1 = vadd.f32 %v4241_v32, %v9938_v27  ;;  %v4323_v51 = vadd.f32 %v4322_v39, %v9989_v54 }
 0xa5b   : > { %vm4344_vm0 = vcmp.gt.f32.partialorder %v10059_v43, 0.0  ;;  %vm4356_vm9 = vcmp.le.f32.partialorder %v10059_v43, 1.0  ;;  %vm4346_vm5 = vcmp.gt.f32.partialorder %v4328_v50, 0.0  ;;  %vm4358_vm1 = vcmp.le.f32.partialorder %v4328_v50, 1.0 }
 0xa5c   : > { %vm10078_vm3 = vmand %vm4344_vm0, %vm4356_vm9  ;;  %vm4345_vm7 = vcmp.gt.f32.partialorder %v10071_v1, 0.0  ;;  %vm4357_vm4 = vcmp.le.f32.partialorder %v10071_v1, 1.0  ;;  %v4245_v45 = vpop.f32.mrb[62].mxu1  ;;  %v10728_v30 = vrot.slane %v10068_v7, 7  ;;  %vm4343_vm10 = vcmp.gt.f32.partialorder %v4323_v51, 0.0 }
 0xa5d   : > { %v10909_v41 = vsel %vm10078_vm3, 4294967295, %v10908_v41  ;;  %v10088_v23 = vsel %vm10078_vm3, %v10059_v43, 0.0  ;;  %vm4370_vm15 = vmand %vm4346_vm5, %vm4358_vm1  ;;  %v10091_v47 = vadd.f32 %v4245_v45, %v9935_v55  ;;  %v4247_v53 = vpop.f32.mrb[63].mxu1  ;;  %vm4355_vm14 = vcmp.le.f32.partialorder %v4323_v51, 1.0 }
 0xa5e   : > { %10910 = vst [vmem:[#allocation12_spill] sm:$0xff] %v10909_v41  ;;  %v10096_v49 = vsel %vm4370_vm15, %v4328_v50, 0.0  ;;  %vm10098_vm11 = vmand %vm4345_vm7, %vm4357_vm4  ;;  %v10114_v32 = vadd.f32 %v4247_v53, %v9938_v27  ;;  %vm10926_vm9 = vcmp.lt.s32.totalorder %v7661_v31, 1  ;;  %v4431_v48 = vrot.slane %v10088_v23, 7 }
 0xa5f   : > { %10911 = vst [vmem:[#allocation13_spill] sm:$0xff] %v10091_v47  ;;  %v10727_v58 = vrot.slane %v10096_v49, 7  ;;  %v10107_v52 = vsel %vm10098_vm11, %v10071_v1, 0.0  ;;  %vm4367_vm8 = vmand %vm4343_vm10, %vm4355_vm14  ;;  %vm4347_vm13 = vcmp.gt.f32.partialorder %v10091_v47, 0.0  ;;  %vm4359_vm0 = vcmp.le.f32.partialorder %v10091_v47, 1.0 }
 0xa60   : > { %v10110_v50 = vsel %vm4367_vm8, %v4323_v51, 0.0  ;;  %10914 = vst [vmem:[#allocation14_spill] sm:$0xff] %v10114_v32  ;;  %v4251_v39 = vpop.f32.mrb[64].mxu1  ;;  %v6529_v45 = vpop.f32.mrb[58].mxu0  ;;  %v4432_v61 = vrot.slane %v10107_v52, 7  ;;  %vm10119_vm5 = vmand %vm4347_vm13, %vm4359_vm0  ;;  %vm4348_vm1 = vcmp.gt.f32.partialorder %v10114_v32, 0.0 }
 0xa61   : > { %v4430_v38 = vrot.slane %v10110_v50, 7  ;;  %v10916_v29 = vsel %vm10119_vm5, 4294967295, %v10915_v29  ;;  %v10124_v51 = vadd.f32 %v4251_v39, %v9935_v55  ;;  %v4338_v60 = vadd.f32 %v6529_v45, %v9989_v54  ;;  %v4253_v53 = vpop.f32.mrb[65].mxu1  ;;  %v4332_v33 = vpop.f32.mrb[59].mxu0 }
 0xa62   : > { %10917 = vst [vmem:[#allocation15_spill] sm:$0xff] %v10916_v29  ;;  %v10130_v63 = vsel %vm10119_vm5, %v10091_v47, 0.0  ;;  %vm4360_vm7 = vcmp.le.f32.partialorder %v10114_v32, 1.0  ;;  %v10135_v2 = vadd.f32 %v4253_v53, %v9938_v27  ;;  %v10923_v39 = vmov 0  ;;  %v10201_v47 = vld [vmem:[%s10658_s22 + $0x150] sm:$0xff] }
 0xa63   : > { %10918 = vst [vmem:[#allocation16_spill] sm:$0xff] %v10124_v51  ;;  %vm10137_vm4 = vmand %vm4348_vm1, %vm4360_vm7  ;;  %vm4350_vm15 = vcmp.gt.f32.partialorder %v10124_v51, 0.0  ;;  %vm4362_vm10 = vcmp.le.f32.partialorder %v10124_v51, 1.0  ;;  %vm4352_vm14 = vcmp.gt.f32.partialorder %v4338_v60, 0.0  ;;  %vm4364_vm8 = vcmp.le.f32.partialorder %v4338_v60, 1.0 }
 0xa64   : > { %10919 = vst [vmem:[#allocation17_spill] sm:$0xff] %v10135_v2  ;;  %v10921_v14 = vsel %vm10137_vm4, 4294967295, %v10920_v14  ;;  %v10146_v55 = vsel %vm10137_vm4, %v10114_v32, 0.0  ;;  %vm10148_vm13 = vmand %vm4350_vm15, %vm4362_vm10  ;;  %vm4351_vm0 = vcmp.gt.f32.partialorder %v10135_v2, 0.0  ;;  %vm4363_vm1 = vcmp.le.f32.partialorder %v10135_v2, 1.0 }
 0xa65   : > { %10922 = vst [vmem:[#allocation18_spill] sm:$0xff] %v10921_v14  ;;  %v10924_v39 = vsel %vm10148_vm13, 4294967295, %v10923_v39  ;;  %v4333_v27 = vadd.f32 %v4332_v33, %v9989_v54  ;;  %v10158_v45 = vsel %vm10148_vm13, %v10124_v51, 0.0  ;;  %vm4376_vm7 = vmand %vm4352_vm14, %vm4364_vm8  ;;  %v4448_v53 = vsel %vm10926_vm9, %v4430_v38, %v10727_v58 }
 0xa66   : > { %10925 = vst [vmem:[#allocation19_spill] sm:$0xff] %v10924_v39  ;;  %vm10927_vm15 = vmmov %vm10926_vm9  ;;  %v4437_v54 = vrot.slane %v10158_v45, 7  ;;  %v10170_v33 = vsel %vm4376_vm7, %v4338_v60, 0.0  ;;  %v10934_v51 = vrot.slane %v10052_v40, 7  ;;  %v4434_v37 = vrot.slane %v10130_v63, 7 }
 0xa67   : > { %v4447_v59 = vsel %vm10927_vm15, %v10728_v30, %v4432_v61  ;;  %10928 = vst [vmem:[#allocation20_spill] sm:$0xff] %v10170_v33  ;;  %vm10172_vm10 = vmand %vm4351_vm0, %vm4363_vm1  ;;  %vm4349_vm14 = vcmp.gt.f32.partialorder %v4333_v27, 0.0  ;;  %vm4361_vm8 = vcmp.le.f32.partialorder %v4333_v27, 1.0  ;;  %v4439_v17 = vrot.slane %v10170_v33, 7  ;;  %v10995_v19 = vld [vmem:[#allocation14_spill] sm:$0xff] }
 0xa68   : > { %v10930_v28 = vsel %vm10172_vm10, 4294967295, %v10929_v28  ;;  %v4884_v58 = vrot.slane %v10170_v33, 1  ;;  %v4387_v30 = vsel %vm10172_vm10, %v10135_v2, 0.0  ;;  %vm4373_vm9 = vmand %vm4349_vm14, %vm4361_vm8  ;;  %vm10932_vm15 = vcmp.eq.s32.totalorder %v7790_v25, 1 }
 0xa69   : > { %10931 = vst [vmem:[#allocation21_spill] sm:$0xff] %v10930_v28  ;;  %v4457_v34 = vsel %vm10932_vm15, %v4448_v53, 0.0  ;;  %v10183_v60 = vsel %vm4373_vm9, %v4333_v27, 0.0  ;;  %v4438_v39 = vrot.slane %v4387_v30, 7  ;;  %vm10935_vm0 = vcmp.lt.s32.totalorder %v7661_v31, 1 }
 0xa6a   : > { %10933 = vst [vmem:[#allocation22_spill] sm:$0xff] %v10183_v60  ;;  %v4449_v10 = vsel %vm10935_vm0, %v4437_v54, %v10934_v51  ;;  %v10936_v29 = vmov %v10934_v51  ;;  %vm10937_vm1 = vmmov %vm10935_vm0  ;;  %v4436_v28 = vrot.slane %v10183_v60, 7  ;;  %v4881_v2 = vrot.slane %v10183_v60, 1  ;;  %v10206_v51 = vld [vmem:[%s10658_s22 + $0x158] sm:$0xff] }
 0xa6b   : > { %v4446_v33 = vsel %vm10937_vm1, %v10936_v29, %v4431_v48  ;;  %vm10938_vm7 = vmmov %vm10935_vm0  ;;  %v4435_v27 = vrot.slane %v10146_v55, 7  ;;  %v10939_v29 = vrot.slane %v10068_v7, 7  ;;  %vm10941_vm8 = vcmp.eq.s32.totalorder %v7788_v24, 1 }
 0xa6c   : > { %v4451_v53 = vsel %vm10938_vm7, %v4439_v17, %v4430_v38  ;;  %vm10940_vm14 = vmmov %vm10935_vm0  ;;  %v4877_v4 = vrot.slane %v10107_v52, 1  ;;  %vm10943_vm15 = vcmask 359424   ;;  %v10944_v14 = vrot.slane %v10096_v49, 7 }
 0xa6d   : > { %v4450_v60 = vsel %vm10940_vm14, %v4438_v39, %v10939_v29  ;;  %v4454_v38 = vsel %vm10941_vm8, %v4451_v53, 0.0  ;;  %vm10942_vm9 = vmmov %vm10941_vm8  ;;  %v4880_v41 = vrot.slane %v10146_v55, 1  ;;  %v10963_v55 = vpack.c.bf16 %v9968_v26, %v9963_v18 }
 0xa6e   : > { %5457 = vmatprep.mubr.msk.f32.mxu1 %vm10942_vm9, %v4450_v60  ;;  %6542 = vmatprep.mubr.msk.f32.mxu0 %vm10943_vm15, %v4454_v38  ;;  %v4445_v32 = vsel %vm10935_vm0, %v10944_v14, %v4436_v28  ;;  %vm10945_vm1 = vmmov %vm10935_vm0  ;;  %vm10949_vm9 = vcmp.eq.s32.totalorder %v10889_v13, 1  ;;  %v7187_v14 = vpack.c.bf16 %v10206_v51, %v10201_v47  ;;  %v10956_v47 = vrot.slane %v10088_v23, 1  ;;  %v5505_v23 = vld [vmem:[%s10658_s22 + $0x310] sm:$0xff] }
 0xa6f   : > { %v4442_v29 = vsel %vm10945_vm1, %v4436_v28, %v4439_v17  ;;  %vm10946_vm7 = vmmov %vm10935_vm0  ;;  %v4460_v52 = vsel %vm10949_vm9, %v4445_v32, 0.0  ;;  %v4441_v17 = vsel %vm10935_vm0, %v4435_v27, %v4438_v39  ;;  %v10951_v28 = vpack.c.bf16 %v9948_v9, %v9943_v56 }
 0xa70   : > { %v4444_v53 = vsel %vm10946_vm7, %v4432_v61, %v4435_v27  ;;  %vm10947_vm14 = vmmov %vm10941_vm8  ;;  %vm10955_vm7 = vcmp.lt.s32.totalorder %v7661_v31, 7  ;;  %v4879_v9 = vrot.slane %v10130_v63, 1  ;;  %vm10960_vm9 = vcmask 359424   ;;  %v5490_v31 = vld [vmem:[%s10658_s22 + $0x298] sm:$0xff] }
 0xa71   : > { %5458 = vmatmul.mubr.msk.f32.vlgmr.msra.gmra.mrb[66].mxu1 %vm10947_vm14, %v4449_v10  ;;  %vm10948_vm8 = vmmov %vm10943_vm15  ;;  %v10952_v10 = vpack.c.bf16 %v9958_v16, %v9953_v35  ;;  %v5488_v35 = vld [vmem:[%s10658_s22 + $0x288] sm:$0xff]  ;;  %v4883_v32 = vrot.slane %v4387_v30, 1  ;;  %v4882_v63 = vrot.slane %v10158_v45, 1  ;;  %v10964_v39 = vpack.c.bf16 %v9978_v3, %v9973_v46 }
 0xa72   : > { %6543 = vmatmul.mubr.msk.f32.vlgmr.msra.gmra.mrb[60].mxu0 %vm10948_vm8, %v4457_v34  ;;  %vm10950_vm15 = vmmov %vm10935_vm0  ;;  %v10954_v34 = vrot.slane %v10068_v7, 1  ;;  %vm10959_vm8 = vcmp.eq.s32.totalorder %v7790_v25, 1  ;;  %v5442_v30 = vld [vmem:[%s10658_s22 + $0x1e8] sm:$0xff]  ;;  %v10966_v45 = vmov %v10956_v47  ;;  %v10968_v26 = vrot.slane %v10110_v50, 1 }
 0xa73   : > { %v4443_v60 = vsel %vm10950_vm15, %v4431_v48, %v4434_v37  ;;  %7180 = vmatpush3.bf16.msra.mxu0 %v10951_v28  ;;  %7226 = vmatpush3.bf16.msra.mxu1 %v10952_v10  ;;  %vm10953_vm1 = vmmov %vm10935_vm0  ;;  %v10957_v48 = vrot.slane %v10052_v40, 1  ;;  %v10970_v3 = vrot.slane %v10096_v49, 1  ;;  %v10979_v28 = vpack.c.bf16 %v10004_v22, %v9999_v21  ;;  %v5425_v10 = vld [vmem:[%s10658_s22 + $0x160] sm:$0xff]  ;;  %v5426_v21 = vld [vmem:[%s10658_s22 + $0x168] sm:$0xff] }
 0xa74   : > { %v10247_v24 = vsel %vm10953_vm1, %v4434_v37, %v4437_v54  ;;  %v10253_v61 = vsel %vm10955_vm7, %v10954_v34, %v4877_v4  ;;  %vm10958_vm14 = vmmov %vm10955_vm7  ;;  %5459 = vmatprep.mubr.msk.f32.mxu1 %vm10959_vm8, %v4447_v59  ;;  %6545 = vmatprep.mubr.msk.f32.mxu0 %vm10960_vm9, %v4460_v52  ;;  %v5487_v37 = vld [vmem:[%s10658_s22 + $0x280] sm:$0xff]  ;;  %vm10965_vm1 = vcmp.eq.s32.totalorder %v10895_v6, 1  ;;  %v10971_v27 = vmov %v10968_v26  ;;  %v5489_v22 = vld [vmem:[%s10658_s22 + $0x290] sm:$0xff] }
 0xa75   : > { %v10261_v56 = vsel %vm10958_vm14, %v10957_v48, %v10956_v47  ;;  %vm10961_vm15 = vmmov %vm10955_vm7  ;;  %7182 = vmatprep.subr.bf16.mxu0 %v10963_v55  ;;  %7228 = vmatprep.subr.bf16.mxu1 %v10964_v39  ;;  %v4463_v54 = vsel %vm10965_vm1, %v4442_v29, 0.0  ;;  %vm10973_vm9 = vcmp.eq.s32.totalorder %v7790_v25, 1  ;;  %v10976_v25 = vmov %v10954_v34 }
 0xa76   : > { %v10275_v16 = vsel %vm10961_vm15, %v4877_v4, %v4880_v41  ;;  %vm10962_vm0 = vmmov %vm10955_vm7  ;;  %v5441_v4 = vld [vmem:[%s10658_s22 + $0x1e0] sm:$0xff]  ;;  %5460 = vmatmul.mubr.msk.f32.gmra.mrb[68].mxu1 %vm10973_vm9, %v4446_v33  ;;  %vm10974_vm15 = vcmask 359424   ;;  %v10978_v52 = vpack.c.bf16 %v9994_v15, %v9983_v36  ;;  %v10980_v34 = vmov %v10957_v48  ;;  %v5427_v48 = vld [vmem:[%s10658_s22 + $0x170] sm:$0xff] }
 0xa77   : > { %v10280_v59 = vsel %vm10962_vm0, %v4881_v2, %v4884_v58  ;;  %vm10967_vm7 = vmmov %vm10962_vm0  ;;  %6546 = vmatmul.mubr.msk.f32.gmra.mrb[62].mxu0 %vm10974_vm15, %v4463_v54  ;;  %v10327_v38 = vsel %vm10962_vm0, %v4880_v41, %v4883_v32  ;;  %7230 = vmatpush3.bf16.msra.mxu1 %v10979_v28  ;;  %v7233_v41 = vpack.c.bf16 %v5488_v35, %v5487_v37  ;;  %vm10984_vm9 = vcmp.eq.s32.totalorder %v10889_v13, 1  ;;  %v5428_v13 = vld [vmem:[%s10658_s22 + $0x178] sm:$0xff]  ;;  %v5445_v37 = vld [vmem:[%s10658_s22 + $0x200] sm:$0xff] }
 0xa78   : > { %v10300_v18 = vsel %vm10967_vm7, %v10966_v45, %v4879_v9  ;;  %vm10969_vm14 = vmmov %vm10962_vm0  ;;  %7184 = vmatpush3.bf16.msra.mxu0 %v10978_v52  ;;  %v10982_v47 = vmov %v10970_v3  ;;  %5461 = vmatprep.mubr.msk.f32.mxu1 %vm10984_vm9, %v4444_v53  ;;  %v7189_v15 = vpack.c.bf16 %v5442_v30, %v5441_v4  ;;  %v5444_v53 = vld [vmem:[%s10658_s22 + $0x1f8] sm:$0xff]  ;;  %vm10988_vm15 = vcmp.eq.s32.totalorder %v10895_v6, 1  ;;  %v5429_v54 = vld [vmem:[%s10658_s22 + $0x180] sm:$0xff] }
 0xa79   : > { %v10306_v46 = vsel %vm10969_vm14, %v4884_v58, %v10968_v26  ;;  %vm10972_vm8 = vmmov %vm10962_vm0  ;;  %v5506_v58 = vld [vmem:[%s10658_s22 + $0x318] sm:$0xff]  ;;  %5470 = vmatprep.mubr.msk.f32.mxu0 %vm10054_vm6, %v10007_v44  ;;  %v10986_v44 = vpack.c.bf16 %v10037_v57, %v10032_v20  ;;  %v7191_v20 = vpack.c.bf16 %v5426_v21, %v5425_v10  ;;  %v7237_v57 = vpack.c.bf16 %v5490_v31, %v5489_v22  ;;  %v5430_v4 = vld [vmem:[%s10658_s22 + $0x188] sm:$0xff] }
 0xa7a   : > { %v10314_v51 = vsel %vm10972_vm8, %v10971_v27, %v10970_v3  ;;  %vm10975_vm1 = vmmov %vm10962_vm0  ;;  %v7235_v40 = vpack.c.bf16 %v5506_v58, %v5505_v23  ;;  %v7195_v55 = vpack.c.bf16 %v5428_v13, %v5427_v48  ;;  %v5494_v45 = vld [vmem:[%s10658_s22 + $0x2b8] sm:$0xff]  ;;  %v5447_v26 = vld [vmem:[%s10658_s22 + $0x210] sm:$0xff]  ;;  %v7199_v23 = vpack.c.bf16 %v5430_v4, %v5429_v54 }
 0xa7b   : > { %v10331_v29 = vsel %vm10975_vm1, %v4879_v9, %v4882_v63  ;;  %vm10977_vm7 = vmmov %vm10962_vm0  ;;  %7232 = vmatprep.subr.bf16.mxu1 %v10986_v44  ;;  %v5492_v9 = vld [vmem:[%s10658_s22 + $0x2a8] sm:$0xff]  ;;  %vm10990_vm1 = vcmp.eq.s32.totalorder %v7749_v5, 1  ;;  %v5511_v3 = vld [vmem:[%s10658_s22 + $0x340] sm:$0xff] }
 0xa7c   : > { %v10337_v33 = vsel %vm10977_vm7, %v4883_v32, %v10976_v25  ;;  %vm10981_vm14 = vmmov %vm10962_vm0  ;;  %7234 = vmatpush3.bf16.msra.mxu1 %v7233_v41  ;;  %v5509_v32 = vld [vmem:[%s10658_s22 + $0x330] sm:$0xff]  ;;  %v5512_v27 = vld [vmem:[%s10658_s22 + $0x348] sm:$0xff] }
 0xa7d   : > { %v10352_v7 = vsel %vm10981_vm14, %v4882_v63, %v10980_v34  ;;  %vm10983_vm8 = vmmov %vm10962_vm0  ;;  %7236 = vmatprep.subr.bf16.mxu1 %v7235_v40  ;;  %v5510_v63 = vld [vmem:[%s10658_s22 + $0x338] sm:$0xff]  ;;  %v5431_v25 = vld [vmem:[%s10658_s22 + $0x190] sm:$0xff]  ;;  %v7247_v41 = vpack.c.bf16 %v5512_v27, %v5511_v3 }
 0xa7e   : > { %v10358_v36 = vsel %vm10983_vm8, %v10982_v47, %v4881_v2  ;;  %v10985_v2 = vpack.c.bf16 %v10021_v0, %v10016_v42  ;;  %vm10987_vm6 = vmmov %vm10984_vm9  ;;  %v5507_v42 = vld [vmem:[%s10658_s22 + $0x320] sm:$0xff]  ;;  %v5508_v0 = vld [vmem:[%s10658_s22 + $0x328] sm:$0xff]  ;;  %v7243_v6 = vpack.c.bf16 %v5510_v63, %v5509_v32  ;;  %vm11011_vm8 = vcmask 359424  }
 0xa7f   : > { %5462 = vmatmul.mubr.msk.f32.gmra.mrb[70].mxu1 %vm10987_vm6, %v4443_v60  ;;  %v7193_v60 = vpack.c.bf16 %v5444_v53, %v5443_v62  ;;  %v7239_v35 = vpack.c.bf16 %v5508_v0, %v5507_v42  ;;  %vm10989_vm0 = vmmov %vm10988_vm15  ;;  %v5432_v52 = vld [vmem:[%s10658_s22 + $0x198] sm:$0xff]  ;;  %v5495_v10 = vld [vmem:[%s10658_s22 + $0x2c0] sm:$0xff] }
 0xa80   : > { %7186 = vmatprep.subr.bf16.mxu0 %v10985_v2  ;;  %5463 = vmatprep.mubr.msk.f32.mxu1 %vm10988_vm15, %v4441_v17  ;;  %v5446_v17 = vld [vmem:[%s10658_s22 + $0x208] sm:$0xff]  ;;  %v5449_v47 = vld [vmem:[%s10658_s22 + $0x220] sm:$0xff]  ;;  %v5513_v21 = vld [vmem:[%s10658_s22 + $0x350] sm:$0xff]  ;;  %v7203_v31 = vpack.c.bf16 %v5432_v52, %v5431_v25 }
 0xa81   : > { %7188 = vmatpush3.bf16.msra.mxu0 %v7187_v14  ;;  %v5491_v14 = vld [vmem:[%s10658_s22 + $0x2a0] sm:$0xff]  ;;  %7238 = vmatpush3.bf16.msra.mxu1 %v7237_v57  ;;  %v7197_v30 = vpack.c.bf16 %v5446_v17, %v5445_v37  ;;  %v5496_v34 = vld [vmem:[%s10658_s22 + $0x2c8] sm:$0xff]  ;;  %v5514_v22 = vld [vmem:[%s10658_s22 + $0x358] sm:$0xff] }
 0xa82   : > { %7190 = vmatprep.subr.bf16.mxu0 %v7189_v15  ;;  %v7241_v39 = vpack.c.bf16 %v5492_v9, %v5491_v14  ;;  %7240 = vmatprep.subr.bf16.mxu1 %v7239_v35  ;;  %v5450_v15 = vld [vmem:[%s10658_s22 + $0x228] sm:$0xff]  ;;  %v7249_v2 = vpack.c.bf16 %v5496_v34, %v5495_v10  ;;  %v5433_v44 = vld [vmem:[%s10658_s22 + $0x1a0] sm:$0xff]  ;;  %v7251_v53 = vpack.c.bf16 %v5514_v22, %v5513_v21  ;;  %v5497_v42 = vld [vmem:[%s10658_s22 + $0x2d0] sm:$0xff] }
 0xa83   : > { %5464 = vmatmul.mubr.msk.f32.gmra.mrb[72].mxu1 %vm10989_vm0, %v10247_v24  ;;  %v5493_v24 = vld [vmem:[%s10658_s22 + $0x2b0] sm:$0xff]  ;;  %v5434_v40 = vld [vmem:[%s10658_s22 + $0x1a8] sm:$0xff]  ;;  %v7205_v62 = vpack.c.bf16 %v5450_v15, %v5449_v47  ;;  %v5498_v0 = vld [vmem:[%s10658_s22 + $0x2d8] sm:$0xff] }
 0xa84   : > { %5521 = vmatprep.mubr.msk.f32.mxu1 %vm10990_vm1, %v10253_v61  ;;  %v5448_v61 = vld [vmem:[%s10658_s22 + $0x218] sm:$0xff]  ;;  %v7245_v58 = vpack.c.bf16 %v5494_v45, %v5493_v24  ;;  %v5515_v48 = vld [vmem:[%s10658_s22 + $0x360] sm:$0xff]  ;;  %v5516_v13 = vld [vmem:[%s10658_s22 + $0x368] sm:$0xff]  ;;  %v7253_v14 = vpack.c.bf16 %v5498_v0, %v5497_v42 }
 0xa85   : > { %7192 = vmatpush3.bf16.msra.mxu0 %v7191_v20  ;;  %7242 = vmatpush3.bf16.msra.mxu1 %v7241_v39  ;;  %v7201_v28 = vpack.c.bf16 %v5448_v61, %v5447_v26  ;;  %v5451_v20 = vld [vmem:[%s10658_s22 + $0x230] sm:$0xff]  ;;  %v5452_v57 = vld [vmem:[%s10658_s22 + $0x238] sm:$0xff]  ;;  %v7255_v37 = vpack.c.bf16 %v5516_v13, %v5515_v48  ;;  %v5453_v35 = vld [vmem:[%s10658_s22 + $0x240] sm:$0xff] }
 0xa86   : > { %7194 = vmatprep.subr.bf16.mxu0 %v7193_v60  ;;  %7244 = vmatprep.subr.bf16.mxu1 %v7243_v6  ;;  %v7207_v60 = vpack.c.bf16 %v5434_v40, %v5433_v44  ;;  %v7209_v9 = vpack.c.bf16 %v5452_v57, %v5451_v20  ;;  %v5454_v17 = vld [vmem:[%s10658_s22 + $0x248] sm:$0xff]  ;;  %v5517_v32 = vld [vmem:[%s10658_s22 + $0x370] sm:$0xff]  ;;  %v5518_v63 = vld [vmem:[%s10658_s22 + $0x378] sm:$0xff] }
 0xa87   : > { %v7259_v39 = vpack.c.bf16 %v5518_v63, %v5517_v32  ;;  %v5455_v54 = vld [vmem:[%s10658_s22 + $0x250] sm:$0xff]  ;;  %vm10991_vm7 = vmmov %vm10990_vm1  ;;  %v5456_v4 = vld [vmem:[%s10658_s22 + $0x258] sm:$0xf] }
 0xa88   : > { %v5520_v6 = vld [vmem:[%s10658_s22 + $0x388] sm:$0xf]  ;;  %v10997_v24 = vld [vmem:[#allocation9_spill] sm:$0xff]  ;;  %v11007_v61 = vld [vmem:[#allocation16_spill] sm:$0xff] }
 0xa89   : > { %7196 = vmatpush3.bf16.msra.mxu0 %v7195_v55  ;;  %7246 = vmatpush3.bf16.msra.mxu1 %v7245_v58  ;;  %v7213_v55 = vpack.c.bf16 %v5454_v17, %v5453_v35  ;;  %vm11012_vm9 = vmmov %vm11011_vm8 }
 0xa8a   : > { %7198 = vmatprep.subr.bf16.mxu0 %v7197_v30  ;;  %7248 = vmatprep.subr.bf16.mxu1 %v7247_v41  ;;  %v5519_v30 = vld [vmem:[%s10658_s22 + $0x380] sm:$0xff]  ;;  %vm11014_vm15 = vmmov %vm11011_vm8 }
 0xa8b   : > { %v7263_v12 = vpack.c.bf16 %v5520_v6, %v5519_v30  ;;  %vm11017_vm0 = vmmov %vm11011_vm8 }
 0xa8c   : > { %vm11019_vm1 = vmmov %vm11017_vm0 }
 0xa8d   : > { %7200 = vmatpush3.bf16.msra.mxu0 %v7199_v23  ;;  %7250 = vmatpush3.bf16.msra.mxu1 %v7249_v2 }
 0xa8e   : > { %7202 = vmatprep.subr.bf16.mxu0 %v7201_v28  ;;  %7252 = vmatprep.subr.bf16.mxu1 %v7251_v53 }
 0xa91   : > { %7204 = vmatpush3.bf16.msra.mxu0 %v7203_v31  ;;  %7254 = vmatpush3.bf16.msra.mxu1 %v7253_v14 }
 0xa92   : > { %7206 = vmatprep.subr.bf16.mxu0 %v7205_v62  ;;  %7269 = vmatprep.subr.bf16.mxu1 %v7255_v37 }
 0xa94   : > { %5522 = vmatmul.mubr.msk.f32.vlgmr.msra.gmra.mrb[74].mxu1 %vm10991_vm7, %v10261_v56 }
 0xa95   : > { %7208 = vmatpush3.bf16.msra.mxu0 %v7207_v60  ;;  %7272 = vmatpush3.bf16.msra.mxu1 %v7255_v37 }
 0xa96   : > { %7210 = vmatprep.subr.bf16.mxu0 %v7209_v9  ;;  %7270 = vmatprep.subr.bf16.mxu1 %v7259_v39 }
 0xa98   : > { %5471 = vmatmul.mubr.msk.f32.vlgmr.msra.gmra.mrb[64].mxu0 %vm10039_vm2, %v9986_v8  ;;  %vm10992_vm2 = vcmp.eq.s32.totalorder %v7760_v11, 1  ;;  %v7217_v8 = vpack.c.bf16 %v5456_v4, %v5455_v54 }
 0xa99   : > { %5472 = vmatprep.mubr.msk.f32.mxu0 %vm10098_vm11, %v10071_v1  ;;  %7212 = vmatpush3.bf16.msra.mxu0 %v7209_v9  ;;  %vm10994_vm14 = vmmov %vm10992_vm2  ;;  %vm10998_vm11 = vcmp.eq.s32.totalorder %v10997_v24, 1 }
 0xa9a   : > { %5523 = vmatprep.mubr.msk.f32.mxu1 %vm10992_vm2, %v10275_v16  ;;  %7214 = vmatprep.subr.bf16.mxu0 %v7213_v55  ;;  %vm11020_vm2 = vmmov %vm11017_vm0 }
 0xa9b   : > { %5524 = vmatmul.mubr.msk.f32.gmra.mrb[76].mxu1 %vm10994_vm14, %v10300_v18  ;;  %v11003_v18 = vld [vmem:[#allocation17_spill] sm:$0xff] }
 0xa9c   : > { %5473 = vmatmul.mubr.msk.f32.gmra.mrb[66].mxu0 %vm10078_vm3, %v10059_v43  ;;  %5525 = vmatprep.mubr.msk.f32.mxu1 %vm10998_vm11, %v10327_v38  ;;  %v11000_v43 = vld [vmem:[#allocation13_spill] sm:$0xff]  ;;  %vm11002_vm3 = vmmov %vm10998_vm11  ;;  %v11005_v38 = vld [vmem:[#allocation10_spill] sm:$0xff] }
 0xa9d   : > { %5474 = vmatprep.mubr.msk.f32.mxu0 %vm10137_vm4, %v10995_v19  ;;  %7216 = vmatpush3.bf16.msra.mxu0 %v7213_v55  ;;  %vm11006_vm4 = vcmp.eq.s32.totalorder %v11005_v38, 1  ;;  %vm11021_vm11 = vmmov %vm11017_vm0 }
 0xa9e   : > { %7273 = vmatpush3.bf16.msra.mxu1 %v7259_v39  ;;  %7219 = vmatprep.subr.msk.bf16.mxu0 %vm9893_vm12, %v7217_v8  ;;  %vm11013_vm6 = vmmov %vm11006_vm4 }
 0xa9f   : > { %7271 = vmatprep.subr.msk.bf16.mxu1 %vm9893_vm12, %v7263_v12  ;;  %5526 = vmatmul.mubr.msk.f32.gmra.mrb[78].mxu1 %vm11002_vm3, %v10331_v29 }
 0xaa0   : > { %5475 = vmatmul.mubr.msk.f32.gmra.mrb[68].mxu0 %vm10119_vm5, %v11000_v43  ;;  %5527 = vmatprep.mubr.msk.f32.mxu1 %vm11006_vm4, %v10337_v33  ;;  %vm11009_vm5 = vmmov %vm11006_vm4  ;;  %v4908_v33 = vsel %vm11013_vm6, %v10306_v46, 0.0  ;;  %v5138_v43 = vstv %s5534_s1 }
 0xaa1   : > { %5476 = vmatprep.mubr.msk.f32.mxu0 %vm10172_vm10, %v11003_v18  ;;  %7222 = vmatpush3.bf16.msk.msra.mxu0 %vm9893_vm12, %v7217_v8  ;;  %vm11010_vm10 = vmmov %vm11002_vm3  ;;  %v5194_v8 = vpop.permute.xlu1 %5193 }
 0xaa2   : > { %7274 = vmatpush3.bf16.msk.msra.mxu1 %vm9893_vm12, %v7263_v12  ;;  %7256 = vmatprep.subr.bf16.mxu0 %v7255_v37  ;;  %v4905_v29 = vsel %vm11010_vm10, %v10280_v59, 0.0  ;;  %v11018_v59 = vld [vmem:[#allocation20_spill] sm:$0xff]  ;;  %vm5202_vm6 = vcmp.eq.s32.totalorder %v5194_v8, 1 }
 0xaa3   : > { %5528 = vmatmul.mubr.msk.f32.gmra.mrb[80].mxu1 %vm11009_vm5, %v10352_v7  ;;  %v11016_v7 = vld [vmem:[#allocation22_spill] sm:$0xff] }
 0xaa4   : > { %5477 = vmatmul.mubr.msk.f32.gmra.mrb[70].mxu0 %vm10148_vm13, %v11007_v61  ;;  %6581 = vmatprep.mubr.msk.f32.mxu1 %vm11012_vm9, %v4905_v29  ;;  %vm11015_vm13 = vmmov %vm11011_vm8 }
 0xaa5   : > { %6560 = vmatprep.mubr.msk.f32.mxu0 %vm11011_vm8, %v10110_v50  ;;  %v4899_v50 = vsel %vm10991_vm7, %v10314_v51, 0.0  ;;  %v5200_v18 = vpop.permute.xlu1 %5199 }
 0xaa7   : > { %6582 = vmatmul.mubr.msk.f32.vlgmr.msra.gmra.mrb[82].mxu1 %vm11015_vm13, %v4908_v33 }
 0xaa8   : > { %6561 = vmatmul.mubr.msk.f32.vlgmr.msra.gmra.mrb[60].mxu0 %vm11014_vm15, %v10096_v49  ;;  %v4902_v49 = vsel %vm10994_vm14, %v10358_v36, 0.0 }
 0xaa9   : > { %7258 = vmatpush3.bf16.msra.mxu0 %v7255_v37  ;;  %6563 = vmatprep.mubr.msk.f32.mxu0 %vm11017_vm0, %v11016_v7 }
 0xaaa   : > { %7260 = vmatprep.subr.bf16.mxu0 %v7259_v39 }
 0xaac   : > { %6564 = vmatmul.mubr.msk.f32.gmra.mrb[62].mxu0 %vm11019_vm1, %v11018_v59 }
 0xaad   : > { %7262 = vmatpush3.bf16.msra.mxu0 %v7259_v39  ;;  %6578 = vmatprep.mubr.msk.f32.mxu0 %vm11020_vm2, %v4899_v50 }
 0xaae   : > { %7265 = vmatprep.subr.msk.bf16.mxu0 %vm9893_vm12, %v7263_v12 }
 0xab1   : > { %7268 = vmatpush3.bf16.msk.msra.mxu0 %vm9893_vm12, %v7263_v12  ;;  %v5191_v12 = vpop.permute.xlu0 %5190  ;;  %vm5204_vm12 = vcmp.eq.s32.totalorder %v5200_v18, 1 }
 0xab2   : > { %vm5201_vm13 = vcmp.eq.s32.totalorder %v5191_v12, 1 }
 0xab4   : > { %6579 = vmatmul.mubr.msk.f32.vlgmr.msra.gmra.mrb[60].mxu0 %vm11021_vm11, %v4902_v49  ;;  %v5228_v49 = vld [vmem:[%s10659_s23 + $0x18] sm:$0xff] }
 0xab5   : > { %v5197_v38 = vpop.permute.xlu0 %5196 }
 0xab6   : > { %vm5203_vm3 = vcmp.eq.s32.totalorder %v5197_v38, 1 }
 0xb44   : > { %v6297_v46 = vpop.f32.mrb[66].mxu1 }
 0xb45   : > { %v6298_v27 = vpop.f32.mrb[67].mxu1 }
 0xb46   : > { %v6299_v23 = vadd.f32 %v6298_v27, %v6297_v46 }
 0xb49   : > { %v6300_v5 = vpop.f32.mrb[68].mxu1 }
 0xb4a   : > { %v6301_v51 = vpop.f32.mrb[69].mxu1 }
 0xb4b   : > { %v6302_v58 = vadd.f32 %v6301_v51, %v6300_v5 }
 0xb52   : > { %v6303_v25 = vpop.f32.mrb[70].mxu1 }
 0xb53   : > { %v6304_v52 = vpop.f32.mrb[71].mxu1 }
 0xb54   : > { %v6305_v28 = vadd.f32 %v6304_v52, %v6303_v25 }
 0xb56   : > { %v6306_v41 = vpop.f32.mrb[72].mxu1 }
 0xb57   : > { %v6307_v10 = vpop.f32.mrb[73].mxu1 }
 0xb58   : > { %v6308_v34 = vadd.f32 %v6307_v10, %v6306_v41  ;;  %v5235_v41 = vld [vmem:[%s10660_s24 + $0x10] sm:$0xff] }
 0xb67   : > { %v6405_v15 = vpop.f32.mrb[74].mxu1 }
 0xb68   : > { %v6406_v22 = vpop.f32.mrb[75].mxu1 }
 0xb69   : > { %v6407_v36 = vadd.f32 %v6406_v22, %v6405_v15  ;;  %v5225_v22 = vld [vmem:[%s10659_s23] sm:$0xff] }
 0xb6b   : > { %v6351_v47 = vpop.f32.mrb[64].mxu0 }
 0xb6c   : > { %v6352_v21 = vpop.f32.mrb[65].mxu0 }
 0xb6d   : > { %v6353_v11 = vadd.f32 %v6352_v21, %v6351_v47  ;;  %v5226_v47 = vld [vmem:[%s10659_s23 + $0x8] sm:$0xff] }
 0xb6e   : > { %v6408_v44 = vpop.f32.mrb[76].mxu1 }
 0xb6f   : > { %v7278_v31 = vadd.f32 %v6353_v11, %v6299_v23  ;;  %v6354_v2 = vpop.f32.mrb[66].mxu0  ;;  %v6409_v62 = vpop.f32.mrb[77].mxu1  ;;  %v5227_v23 = vld [vmem:[%s10659_s23 + $0x10] sm:$0xff] }
 0xb70   : > { %v6355_v40 = vpop.f32.mrb[67].mxu0  ;;  %v6410_v42 = vadd.f32 %v6409_v62, %v6408_v44 }
 0xb71   : > { %v6356_v53 = vadd.f32 %v6355_v40, %v6354_v2  ;;  %v7279_v0 = vadd.f32 %v7278_v31, %v6407_v36  ;;  %v5234_v31 = vld [vmem:[%s10660_s24 + $0x8] sm:$0xff]  ;;  %v5233_v40 = vld [vmem:[%s10660_s24] sm:$0xff] }
 0xb72   : > { %v6411_v48 = vpop.f32.mrb[78].mxu1 }
 0xb73   : > { %v7275_v20 = vadd.f32 %v6356_v53, %v6302_v58  ;;  %v6357_v57 = vpop.f32.mrb[68].mxu0  ;;  %v6412_v60 = vpop.f32.mrb[79].mxu1  ;;  %v5236_v58 = vld [vmem:[%s10660_s24 + $0x18] sm:$0xff] }
 0xb74   : > { %v6358_v13 = vpop.f32.mrb[69].mxu0  ;;  %v6413_v9 = vadd.f32 %v6412_v60, %v6411_v48 }
 0xb75   : > { %v6359_v14 = vadd.f32 %v6358_v13, %v6357_v57  ;;  %v7276_v37 = vadd.f32 %v7275_v20, %v6410_v42 }
 0xb76   : > { %v6414_v17 = vpop.f32.mrb[80].mxu1 }
 0xb77   : > { %v6360_v35 = vpop.f32.mrb[70].mxu0  ;;  %v7285_v32 = vadd.f32 %v6359_v14, %v6305_v28  ;;  %v6415_v55 = vpop.f32.mrb[81].mxu1 }
 0xb78   : > { %v6361_v63 = vpop.f32.mrb[71].mxu0  ;;  %v6416_v54 = vadd.f32 %v6415_v55, %v6414_v17 }
 0xb79   : > { %v6362_v39 = vadd.f32 %v6361_v63, %v6360_v35 }
 0xb7a   : > { %v6583_v4 = vpop.f32.mrb[82].mxu1 }
 0xb7b   : > { %v7281_v30 = vadd.f32 %v6362_v39, %v6308_v34  ;;  %v5124_v6 = vpop.f32.mrb[83].mxu1 }
 0xb7f   : > { %v6565_v56 = vpop.f32.mrb[62].mxu0 }
 0xb80   : > { %v7282_v19 = vadd.f32 %v7281_v30, %v6565_v56  ;;  %v4864_v1 = vpop.f32.mrb[63].mxu0 }
 0xb81   : > { %v7286_v24 = vadd.f32 %v7285_v32, %v4864_v1 }
 0xb82   : > { %v7283_v16 = vadd.f32 %v7282_v19, %v6416_v54 }
 0xb83   : > { %v7287_v45 = vadd.f32 %v7286_v24, %v6413_v9 }
 0xb84   : > { %v7284_v26 = vadd.f32 %v7283_v16, %v6583_v4 }
 0xb85   : > { %v7288_v61 = vadd.f32 %v7287_v45, %v5124_v6 }
 0xb86   : > { %v5142_v3 = vadd.f32 %v7284_v26, %v5138_v43 }
 0xb87   : > { %v5141_v29 = vadd.f32 %v7288_v61, %v5138_v43  ;;  %v6580_v33 = vpop.f32.mrb[60].mxu0 }
 0xb88   : > { %v5208_v7 = vsel %vm5204_vm12, %v5142_v3, 0.0  ;;  %v7277_v59 = vadd.f32 %v7276_v37, %v6580_v33  ;;  %v5114_v50 = vpop.f32.mrb[61].mxu0 }
 0xb89   : > { %vm5212_vm4 = vcmp.gt.f32.partialorder %v5208_v7, 0.0  ;;  %vm5216_vm5 = vcmp.le.f32.partialorder %v5208_v7, 1.0  ;;  %v5207_v46 = vsel %vm5203_vm3, %v5141_v29, 0.0  ;;  %v7280_v27 = vadd.f32 %v7279_v0, %v5114_v50 }
 0xb8a   : > { %vm5220_vm10 = vmand %vm5212_vm4, %vm5216_vm5  ;;  %vm5211_vm8 = vcmp.gt.f32.partialorder %v5207_v46, 0.0  ;;  %vm5215_vm9 = vcmp.le.f32.partialorder %v5207_v46, 1.0  ;;  %v5140_v5 = vadd.f32 %v7277_v59, %v5138_v43 }
 0xb8b   : > { %v5224_v51 = vsel %vm5220_vm10, %v5208_v7, 0.0  ;;  %vm5219_vm15 = vmand %vm5211_vm8, %vm5215_vm9  ;;  %v5139_v25 = vadd.f32 %v7280_v27, %v5138_v43  ;;  %vm11024_vm9 = vcmask 244736  }
 0xb8c   : > { %v5232_v52 = vmul.f32 %v5228_v49, %v5224_v51  ;;  %v5223_v28 = vsel %vm5219_vm15, %v5207_v46, 0.0  ;;  %v5206_v10 = vsel %vm5202_vm6, %v5140_v5, 0.0  ;;  %vm11025_vm6 = vmmov %vm11024_vm9 }
 0xb8d   : > { %v5231_v34 = vmul.f32 %v5227_v23, %v5223_v28  ;;  %vm5210_vm0 = vcmp.gt.f32.partialorder %v5206_v10, 0.0  ;;  %vm5214_vm1 = vcmp.le.f32.partialorder %v5206_v10, 1.0  ;;  %v5205_v15 = vsel %vm5201_vm13, %v5139_v25, 0.0 }
 0xb8e   : > { %v5240_v21 = vadd.f32 %v5236_v58, %v5232_v52  ;;  %vm5218_vm7 = vmand %vm5210_vm0, %vm5214_vm1  ;;  %vm5209_vm2 = vcmp.gt.f32.partialorder %v5205_v15, 0.0  ;;  %vm5213_vm14 = vcmp.le.f32.partialorder %v5205_v15, 1.0 }
 0xb8f   : > { %v5239_v11 = vadd.f32 %v5235_v41, %v5231_v34  ;;  %v5222_v36 = vsel %vm5218_vm7, %v5206_v10, 0.0  ;;  %vm5217_vm11 = vmand %vm5209_vm2, %vm5213_vm14 }
 0xb90   : > { %vm5244_vm12 = vcmp.gt.f32.partialorder %v5240_v21, 0.0  ;;  %vm5248_vm3 = vcmp.le.f32.partialorder %v5240_v21, 1.0  ;;  %v5230_v2 = vmul.f32 %v5226_v47, %v5222_v36  ;;  %v5221_v44 = vsel %vm5217_vm11, %v5205_v15, 0.0  ;;  %vm11026_vm14 = vmmov %vm11025_vm6 }
 0xb91   : > { %vm5252_vm4 = vmand %vm5244_vm12, %vm5248_vm3  ;;  %vm5243_vm5 = vcmp.gt.f32.partialorder %v5239_v11, 0.0  ;;  %vm5247_vm10 = vcmp.le.f32.partialorder %v5239_v11, 1.0  ;;  %v5229_v62 = vmul.f32 %v5225_v22, %v5221_v44 }
 0xb92   : > { %v5256_v53 = vsel %vm5252_vm4, %v5240_v21, 0.0  ;;  %vm5251_vm8 = vmand %vm5243_vm5, %vm5247_vm10  ;;  %v5238_v42 = vadd.f32 %v5234_v31, %v5230_v2 }
 0xb93   : > { %5260 = vst.msk [vmem:[%s791_s26 + $0x18] sm:$0xff] %vm11024_vm9, %v5256_v53  ;;  %v5255_v0 = vsel %vm5251_vm8, %v5239_v11, 0.0  ;;  %v5237_v20 = vadd.f32 %v5233_v40, %v5229_v62  ;;  %vm11027_vm11 = vmmov %vm11025_vm6 }
 0xb94   : > { %5259 = vst.msk [vmem:[%s791_s26 + $0x10] sm:$0xff] %vm11025_vm6, %v5255_v0  ;;  %vm5242_vm15 = vcmp.gt.f32.partialorder %v5238_v42, 0.0  ;;  %vm5246_vm13 = vcmp.le.f32.partialorder %v5238_v42, 1.0 }
 0xb95   : > { %vm5250_vm0 = vmand %vm5242_vm15, %vm5246_vm13  ;;  %vm5241_vm1 = vcmp.gt.f32.partialorder %v5237_v20, 0.0  ;;  %vm5245_vm7 = vcmp.le.f32.partialorder %v5237_v20, 1.0 }
 0xb96   : > { %v5254_v57 = vsel %vm5250_vm0, %v5238_v42, 0.0  ;;  %vm5249_vm2 = vmand %vm5241_vm1, %vm5245_vm7 }
 0xb97   : > { %5258 = vst.msk [vmem:[%s791_s26 + $0x8] sm:$0xff] %vm11026_vm14, %v5254_v57  ;;  %v5253_v48 = vsel %vm5249_vm2, %v5237_v20, 0.0 }
 0xb98   : > { %5257 = vst.msk [vmem:[%s791_s26] sm:$0xff] %vm11027_vm11, %v5253_v48 }
 0xb99 PF: > { %s11028_s9 = sld [smem:[#allocation8_spill]] }
 0xb9f   : > { %s37_s29 = sadd.s32 1, %s11028_s9  }
 0xba0   : > { %p34_p13 = scmp.ge.s32.totalorder %s37_s29, 4  }
 0xba2   :  { %36 = sbr.rel (!%p34_p13) target bundleno = 17 (0x11), region = 162 }
 0xba9   :  { %5282 = vsyncpa [#allocation3], 1 }
 0xbaa   :  { %5284 = vsyncpa [#allocation3 + $0x1], 1 }
 0xbab   :  { %5285 = vsyncpa [#allocation5], 1 }

</bundles_post_ra>
